<compile_context>
chip_gen: v7x
topology: tpu7x:2x2x1
jax: 0.10.0
libtpu: 0.0.40
codegen_flags: <defaults>
</compile_context>

<pallas_src>
import functools

import numpy as np

import jax
import jax.numpy as jnp
from jax.experimental import pallas as pl
from jax.experimental.pallas import tpu as pltpu


_TB = 16  # samples per grid step (conv1 matmul M = 16*_TB = 256)


# ----------------------------- fused kernel ------------------------------

def _fused_kernel(xb_ref, oh_ref, a1_ref, b1_ref, a2_ref, b2_ref,
                  ge_ref, go_ref, w3_ref, b3_ref, w4_ref, b4_ref,
                  lm_ref, out_ref, *, tb, with_loss):
    f32 = jnp.float32
    bf16 = jnp.bfloat16
    n16 = tb * 16           # p1 rows per step (16 rows/sample, 12 valid)
    l2 = n16 - 8            # conv2 band-matmul M (covers all valid rows)

    # ---- layer1: conv(1->10,5x5) + maxpool(2) + relu == ONE matmul -------
    # xb lanes = (hi*5+ki)*28 + w ; rows = (sample, pooled-H).  Output lanes
    # are (hi*2+wi)*128 + wp*10 + co, so the 2x2 pool is 3 elementwise maxes
    # over 128-aligned lane blocks.
    xb = xb_ref[...]                                            # (n16, 280) bf16
    c1 = jnp.dot(xb, a1_ref[...], preferred_element_type=f32)   # (n16, 512)
    m1 = jnp.maximum(jnp.maximum(c1[:, 0:120], c1[:, 128:248]),
                     jnp.maximum(c1[:, 256:376], c1[:, 384:504]))
    p1 = jnp.maximum(m1 + b1_ref[...], 0.0)                     # (n16, 120) f32

    # ---- layer2: conv(10->20,5x5), 5 banded matmuls over the H shift ------
    # Valid conv2 rows are s*16 + h2 (h2<8); band ki reads p1 rows +ki, which
    # never cross a sample's 16-row slab for valid rows.
    c2 = jnp.zeros((l2, 256), f32)
    for ki in range(5):
        lhs = p1[ki:ki + l2, :].astype(bf16)                    # (l2, 120)
        c2 = c2 + jnp.dot(lhs, a2_ref[ki], preferred_element_type=f32)
    # W-pool: two 128-aligned lane slices; cast once for the selector dots.
    m2 = jnp.maximum(c2[:, 0:80], c2[:, 128:208]).astype(bf16)  # (l2, 80)

    # H-pool + per-sample gather (rows -> (h2p, sample)) via precomputed 0/1
    # bf16 selectors: row h2p*tb+s of ge/go picks conv2 row s*16 + 2*h2p (+1).
    qe = jnp.dot(ge_ref[...], m2, preferred_element_type=f32)   # (4*tb, 80)
    qo = jnp.dot(go_ref[...], m2, preferred_element_type=f32)
    p2 = jnp.maximum(jnp.maximum(qe, qo) + b2_ref[...], 0.0)    # bias + relu
    p2 = p2.astype(bf16)

    # ---- fc3 (PyTorch NCHW flatten folded into w3_ref) + relu ------------
    h3 = jnp.zeros((tb, 256), f32)
    for hp in range(4):
        h3 = h3 + jnp.dot(p2[hp * tb:(hp + 1) * tb, :], w3_ref[hp],
                          preferred_element_type=f32)
    h3 = jnp.maximum(h3 + b3_ref[...], 0.0)                     # (tb, 256)

    # ---- fc4 -> lane-dense padded logits (lanes>=10 pinned to -3e4) ------
    z = jnp.dot(h3.astype(bf16), w4_ref[...],
                preferred_element_type=f32) + b4_ref[...]       # (tb, 128)

    if with_loss:
        # per-sample cross entropy; pad lanes underflow to 0 in exp().
        zmax = jnp.max(z, axis=-1, keepdims=True)
        lse = zmax + jnp.log(jnp.sum(jnp.exp(z - zmax), axis=-1, keepdims=True))
        zlab = jnp.sum(z * oh_ref[...], axis=-1, keepdims=True)
        loss = lse - zlab                                       # (tb, 1)
        lm = lm_ref[...]                                        # (1, 128), 1 @ lane 10
        out_ref[...] = z * (1.0 - lm) + loss * lm
    else:
        out_ref[...] = z


# --------------------------- parameter prep ------------------------------

def init_params(key):
    """PyTorch-style params.  NOTE: w3/w4 are stored (in, out); a loaded
    PyTorch Linear weight ((out, in)) must be transposed first."""
    ks = jax.random.split(key, 8)

    def u(k, shape, fan_in):
        bound = 1.0 / (fan_in ** 0.5)
        return jax.random.uniform(k, shape, jnp.float32, -bound, bound)

    return {
        "w1": u(ks[0], (10, 1, 5, 5), 1 * 5 * 5),
        "b1": u(ks[1], (10,), 1 * 5 * 5),
        "w2": u(ks[2], (20, 10, 5, 5), 10 * 5 * 5),
        "b2": u(ks[3], (20,), 10 * 5 * 5),
        "w3": u(ks[4], (320, 256), 320),   # row index = PyTorch flatten c*16+h*4+w
        "b3": u(ks[5], (256,), 320),
        "w4": u(ks[6], (256, 10), 256),
        "b4": u(ks[7], (10,), 256),
    }


def prepare_params(params):
    """One-time host-side reshuffle of the weights into the folded layouts
    the fused kernel consumes (bf16 for MXU operands)."""
    w1 = np.asarray(params["w1"], np.float32)
    b1 = np.asarray(params["b1"], np.float32)
    w2 = np.asarray(params["w2"], np.float32)
    b2 = np.asarray(params["b2"], np.float32)
    w3 = np.asarray(params["w3"], np.float32)
    b3 = np.asarray(params["b3"], np.float32)
    w4 = np.asarray(params["w4"], np.float32)
    b4 = np.asarray(params["b4"], np.float32)

    # conv1: single matmul matrix.  Input rows = (hi*5+ki)*28 + w_in, output
    # lanes = (hi*2+wi)*128 + wp*10 + co (pool corners in 128-aligned blocks).
    a1 = np.zeros((280, 512), np.float32)
    for hi in range(2):
        for wi in range(2):
            corner = hi * 2 + wi
            for wp in range(12):
                col = corner * 128 + wp * 10
                for ki in range(5):
                    for kj in range(5):
                        row = (hi * 5 + ki) * 28 + (2 * wp + wi + kj)
                        a1[row, col:col + 10] = w1[:, 0, ki, kj]
    b1t = np.tile(b1, 12)[None, :]                              # (1, 120)

    # conv2 banded matrices: rows = w*10 + cin, cols = ji*128 + jp*20 + co2.
    a2 = np.zeros((5, 120, 256), np.float32)
    for ki in range(5):
        for jp in range(4):
            for ji in range(2):
                col = ji * 128 + jp * 20
                for kj in range(5):
                    w = 2 * jp + ji + kj
                    for ci in range(10):
                        a2[ki, w * 10 + ci, col:col + 20] = w2[:, ci, ki, kj]
    b2t = np.tile(b2, 4)[None, :]                               # (1, 80)

    # fc3 with the PyTorch NCHW flatten folded in:
    # w3r[hp, jp*20 + co2, n] = w3[co2*16 + hp*4 + jp, n]
    w3r = np.zeros((4, 80, 256), np.float32)
    for hp in range(4):
        for jp in range(4):
            for co2 in range(20):
                w3r[hp, jp * 20 + co2, :] = w3[co2 * 16 + hp * 4 + jp, :]

    # fc4 zero-padded to 128 lanes; pad lanes pinned to -3e4 through the bias
    # so the in-kernel CE / max is unaffected and the output stays lane-dense.
    w4p = np.zeros((256, 128), np.float32)
    w4p[:, :10] = w4
    b4p = np.full((1, 128), -30000.0, np.float32)
    b4p[0, :10] = b4

    return {
        "a1": jnp.asarray(a1, jnp.bfloat16),
        "b1t": jnp.asarray(b1t, jnp.float32),
        "a2": jnp.asarray(a2, jnp.bfloat16),
        "b2t": jnp.asarray(b2t, jnp.float32),
        "w3r": jnp.asarray(w3r, jnp.bfloat16),
        "b3r": jnp.asarray(b3[None, :], jnp.float32),
        "w4p": jnp.asarray(w4p, jnp.bfloat16),
        "b4p": jnp.asarray(b4p, jnp.float32),
    }


def _pool_gather_selectors(tb):
    """0/1 selectors that max-pool conv2 rows over H AND gather them into
    (h2p, sample)-major order for fc3.  Built once per trace (host numpy)."""
    l2 = tb * 16 - 8
    ge = np.zeros((4 * tb, l2), np.float32)
    go = np.zeros((4 * tb, l2), np.float32)
    for hp in range(4):
        for s in range(tb):
            ge[hp * tb + s, s * 16 + 2 * hp] = 1.0
            go[hp * tb + s, s * 16 + 2 * hp + 1] = 1.0
    return ge, go


# ------------------------------- wrapper ---------------------------------

def training_model_forward(x_nchw, prep, labels=None):
    """TrainingModelWithLoss.forward: returns logits, or (logits, loss)."""
    B = x_nchw.shape[0]
    tb = _TB
    Bp = ((B + tb - 1) // tb) * tb
    with_loss = labels is not None

    x2 = x_nchw.reshape(B, 28, 28).astype(jnp.float32)
    if Bp != B:
        x2 = jnp.pad(x2, ((0, Bp - B), (0, 0), (0, 0)))

    # conv1 band/corner expansion (plain XLA, once per batch): lane index is
    # (hi*5+ki)*28 + w, row index is (sample, pooled-H) padded 12 -> 16 rows.
    slabs = [x2[:, (hi + ki):(hi + ki) + 23:2, :]               # (Bp, 12, 28)
             for hi in range(2) for ki in range(5)]
    xb = jnp.stack(slabs, axis=2).reshape(Bp, 12, 280)
    xb = jnp.pad(xb, ((0, 0), (0, 4), (0, 0)))
    xb = xb.reshape(Bp * 16, 280).astype(jnp.bfloat16)

    if with_loss:
        lab = labels.astype(jnp.int32)
        if Bp != B:
            lab = jnp.pad(lab, (0, Bp - B))
        oh = (lab[:, None] ==
              jnp.arange(128, dtype=jnp.int32)[None, :]).astype(jnp.float32)
    else:
        oh = jnp.zeros((Bp, 128), jnp.float32)

    ge_np, go_np = _pool_gather_selectors(tb)
    ge = jnp.asarray(ge_np, jnp.bfloat16)
    go = jnp.asarray(go_np, jnp.bfloat16)
    lm_np = np.zeros((1, 128), np.float32)
    lm_np[0, 10] = 1.0
    lm = jnp.asarray(lm_np)

    l2 = tb * 16 - 8
    grid = (Bp // tb,)
    kernel = functools.partial(_fused_kernel, tb=tb, with_loss=with_loss)

    out = pl.pallas_call(
        kernel,
        out_shape=jax.ShapeDtypeStruct((Bp, 128), jnp.float32),
        grid=grid,
        in_specs=[
            pl.BlockSpec((tb * 16, 280), lambda b: (b, 0)),      # xb (bf16)
            pl.BlockSpec((tb, 128), lambda b: (b, 0)),           # label one-hot
            pl.BlockSpec((280, 512), lambda b: (0, 0)),          # a1
            pl.BlockSpec((1, 120), lambda b: (0, 0)),            # b1t
            pl.BlockSpec((5, 120, 256), lambda b: (0, 0, 0)),    # a2
            pl.BlockSpec((1, 80), lambda b: (0, 0)),             # b2t
            pl.BlockSpec((4 * tb, l2), lambda b: (0, 0)),        # ge selector
            pl.BlockSpec((4 * tb, l2), lambda b: (0, 0)),        # go selector
            pl.BlockSpec((4, 80, 256), lambda b: (0, 0, 0)),     # w3r
            pl.BlockSpec((1, 256), lambda b: (0, 0)),            # b3
            pl.BlockSpec((256, 128), lambda b: (0, 0)),          # w4p
            pl.BlockSpec((1, 128), lambda b: (0, 0)),            # b4p
            pl.BlockSpec((1, 128), lambda b: (0, 0)),            # loss-lane mask
        ],
        out_specs=pl.BlockSpec((tb, 128), lambda b: (b, 0)),
        compiler_params=pltpu.CompilerParams(
            dimension_semantics=("parallel",)),
    )(xb, oh, prep["a1"], prep["b1t"], prep["a2"], prep["b2t"],
      ge, go, prep["w3r"], prep["b3r"], prep["w4p"], prep["b4p"], lm)

    logits = out[:B, :10]
    if not with_loss:
        return logits
    loss = jnp.mean(out[:B, 10])                  # CrossEntropyLoss (mean)
    return logits, loss


# -------------------------------- main ------------------------------------

if __name__ == "__main__":
    key = jax.random.PRNGKey(0)
    k_x, k_l, k_p = jax.random.split(key, 3)
    params = init_params(k_p)
    prep = prepare_params(params)

    x = jax.random.normal(k_x, (2, 1, 28, 28), dtype=jnp.float32)
    labels = jax.random.randint(k_l, (2,), 0, 10, dtype=jnp.int32)

    fwd = jax.jit(training_model_forward)
    logits, loss = fwd(x, prep, labels)
    jax.block_until_ready((logits, loss))

    assert logits.shape == (2, 10)
    assert loss.shape == ()
    assert bool(jnp.all(jnp.isfinite(logits))) and bool(jnp.isfinite(loss))
    print("KERNEL_OK")
</pallas_src>

<mosaic_0001>
module attributes {stable_mosaic.version = 11 : i64} {
  func.func @_fused_kernel(%arg0: i32, %arg1: memref<256x280xbf16, #tpu.memory_space<vmem>>, %arg2: memref<16x128xf32, #tpu.memory_space<vmem>>, %arg3: memref<280x512xbf16, #tpu.memory_space<vmem>>, %arg4: memref<1x120xf32, #tpu.memory_space<vmem>>, %arg5: memref<5x120x256xbf16, #tpu.memory_space<vmem>>, %arg6: memref<1x80xf32, #tpu.memory_space<vmem>>, %arg7: memref<64x248xbf16, #tpu.memory_space<vmem>>, %arg8: memref<64x248xbf16, #tpu.memory_space<vmem>>, %arg9: memref<4x80x256xbf16, #tpu.memory_space<vmem>>, %arg10: memref<1x256xf32, #tpu.memory_space<vmem>>, %arg11: memref<256x128xbf16, #tpu.memory_space<vmem>>, %arg12: memref<1x128xf32, #tpu.memory_space<vmem>>, %arg13: memref<1x128xf32, #tpu.memory_space<vmem>>, %arg14: memref<16x128xf32, #tpu.memory_space<vmem>>) attributes {dimension_semantics = [#tpu.dimension_semantics<parallel>], iteration_bounds = array<i64: 1>, scalar_prefetch = 0 : i64, scratch_operands = 0 : i64, tpu.core_type = #tpu.core_type<tc>, window_params = [{transform_indices = @transform_0, window_bounds = array<i64: 256, 280>}, {transform_indices = @transform_1, window_bounds = array<i64: 16, 128>}, {pipeline_mode = #tpu.pipeline_mode<synchronous>, transform_indices = @transform_2, window_bounds = array<i64: 280, 512>}, {pipeline_mode = #tpu.pipeline_mode<synchronous>, transform_indices = @transform_3, window_bounds = array<i64: 1, 120>}, {pipeline_mode = #tpu.pipeline_mode<synchronous>, transform_indices = @transform_4, window_bounds = array<i64: 5, 120, 256>}, {pipeline_mode = #tpu.pipeline_mode<synchronous>, transform_indices = @transform_5, window_bounds = array<i64: 1, 80>}, {pipeline_mode = #tpu.pipeline_mode<synchronous>, transform_indices = @transform_6, window_bounds = array<i64: 64, 248>}, {pipeline_mode = #tpu.pipeline_mode<synchronous>, transform_indices = @transform_7, window_bounds = array<i64: 64, 248>}, {pipeline_mode = #tpu.pipeline_mode<synchronous>, transform_indices = @transform_8, window_bounds = array<i64: 4, 80, 256>}, {pipeline_mode = #tpu.pipeline_mode<synchronous>, transform_indices = @transform_9, window_bounds = array<i64: 1, 256>}, {pipeline_mode = #tpu.pipeline_mode<synchronous>, transform_indices = @transform_10, window_bounds = array<i64: 256, 128>}, {pipeline_mode = #tpu.pipeline_mode<synchronous>, transform_indices = @transform_11, window_bounds = array<i64: 1, 128>}, {pipeline_mode = #tpu.pipeline_mode<synchronous>, transform_indices = @transform_12, window_bounds = array<i64: 1, 128>}, {transform_indices = @transform_13, window_bounds = array<i64: 16, 128>}]} {
    %c0 = arith.constant 0 : index
    %c0_0 = arith.constant 0 : index
    %0 = vector.load %arg1[%c0, %c0_0] : memref<256x280xbf16, #tpu.memory_space<vmem>>, vector<256x280xbf16>
    %c0_1 = arith.constant 0 : index
    %c0_2 = arith.constant 0 : index
    %1 = vector.load %arg3[%c0_1, %c0_2] : memref<280x512xbf16, #tpu.memory_space<vmem>>, vector<280x512xbf16>
    %cst = arith.constant dense<0.000000e+00> : vector<256x512xf32>
    %2 = tpu.matmul %0, %1, %cst {dimension_numbers = #tpu.dot_dimension_numbers<[1], [0], [0], [1], [0, 0, 1, 1], [], []>} : vector<256x280xbf16>, vector<280x512xbf16>, vector<256x512xf32> -> vector<256x512xf32>
    %3 = vector.extract_strided_slice %2 {offsets = [0, 0], sizes = [256, 120], strides = [1, 1]} : vector<256x512xf32> to vector<256x120xf32>
    %4 = vector.extract_strided_slice %2 {offsets = [0, 128], sizes = [256, 120], strides = [1, 1]} : vector<256x512xf32> to vector<256x120xf32>
    %5 = arith.maximumf %3, %4 : vector<256x120xf32>
    %6 = vector.extract_strided_slice %2 {offsets = [0, 256], sizes = [256, 120], strides = [1, 1]} : vector<256x512xf32> to vector<256x120xf32>
    %7 = vector.extract_strided_slice %2 {offsets = [0, 384], sizes = [256, 120], strides = [1, 1]} : vector<256x512xf32> to vector<256x120xf32>
    %8 = arith.maximumf %6, %7 : vector<256x120xf32>
    %9 = arith.maximumf %5, %8 : vector<256x120xf32>
    %c0_3 = arith.constant 0 : index
    %c0_4 = arith.constant 0 : index
    %10 = vector.load %arg4[%c0_3, %c0_4] : memref<1x120xf32, #tpu.memory_space<vmem>>, vector<1x120xf32>
    %11 = vector.broadcast %10 : vector<1x120xf32> to vector<256x120xf32>
    %12 = arith.addf %9, %11 : vector<256x120xf32>
    %cst_5 = arith.constant 0.000000e+00 : f32
    %13 = vector.broadcast %cst_5 : f32 to vector<256x120xf32>
    %14 = arith.maximumf %12, %13 : vector<256x120xf32>
    %cst_6 = arith.constant 0.000000e+00 : f32
    %15 = vector.broadcast %cst_6 : f32 to vector<248x256xf32>
    %16 = vector.extract_strided_slice %14 {offsets = [0, 0], sizes = [248, 120], strides = [1, 1]} : vector<256x120xf32> to vector<248x120xf32>
    %17 = arith.truncf %16 : vector<248x120xf32> to vector<248x120xbf16>
    %c0_7 = arith.constant 0 : index
    %c0_8 = arith.constant 0 : index
    %c0_9 = arith.constant 0 : index
    %18 = vector.load %arg5[%c0_7, %c0_8, %c0_9] : memref<5x120x256xbf16, #tpu.memory_space<vmem>>, vector<1x120x256xbf16>
    %19 = vector.shape_cast %18 : vector<1x120x256xbf16> to vector<120x256xbf16>
    %cst_10 = arith.constant dense<0.000000e+00> : vector<248x256xf32>
    %20 = tpu.matmul %17, %19, %cst_10 {dimension_numbers = #tpu.dot_dimension_numbers<[1], [0], [0], [1], [0, 0, 1, 1], [], []>} : vector<248x120xbf16>, vector<120x256xbf16>, vector<248x256xf32> -> vector<248x256xf32>
    %21 = arith.addf %15, %20 : vector<248x256xf32>
    %22 = vector.extract_strided_slice %14 {offsets = [1, 0], sizes = [248, 120], strides = [1, 1]} : vector<256x120xf32> to vector<248x120xf32>
    %23 = arith.truncf %22 : vector<248x120xf32> to vector<248x120xbf16>
    %c1 = arith.constant 1 : index
    %c0_11 = arith.constant 0 : index
    %c0_12 = arith.constant 0 : index
    %24 = vector.load %arg5[%c1, %c0_11, %c0_12] : memref<5x120x256xbf16, #tpu.memory_space<vmem>>, vector<1x120x256xbf16>
    %25 = vector.shape_cast %24 : vector<1x120x256xbf16> to vector<120x256xbf16>
    %cst_13 = arith.constant dense<0.000000e+00> : vector<248x256xf32>
    %26 = tpu.matmul %23, %25, %cst_13 {dimension_numbers = #tpu.dot_dimension_numbers<[1], [0], [0], [1], [0, 0, 1, 1], [], []>} : vector<248x120xbf16>, vector<120x256xbf16>, vector<248x256xf32> -> vector<248x256xf32>
    %27 = arith.addf %21, %26 : vector<248x256xf32>
    %28 = vector.extract_strided_slice %14 {offsets = [2, 0], sizes = [248, 120], strides = [1, 1]} : vector<256x120xf32> to vector<248x120xf32>
    %29 = arith.truncf %28 : vector<248x120xf32> to vector<248x120xbf16>
    %c2 = arith.constant 2 : index
    %c0_14 = arith.constant 0 : index
    %c0_15 = arith.constant 0 : index
    %30 = vector.load %arg5[%c2, %c0_14, %c0_15] : memref<5x120x256xbf16, #tpu.memory_space<vmem>>, vector<1x120x256xbf16>
    %31 = vector.shape_cast %30 : vector<1x120x256xbf16> to vector<120x256xbf16>
    %cst_16 = arith.constant dense<0.000000e+00> : vector<248x256xf32>
    %32 = tpu.matmul %29, %31, %cst_16 {dimension_numbers = #tpu.dot_dimension_numbers<[1], [0], [0], [1], [0, 0, 1, 1], [], []>} : vector<248x120xbf16>, vector<120x256xbf16>, vector<248x256xf32> -> vector<248x256xf32>
    %33 = arith.addf %27, %32 : vector<248x256xf32>
    %34 = vector.extract_strided_slice %14 {offsets = [3, 0], sizes = [248, 120], strides = [1, 1]} : vector<256x120xf32> to vector<248x120xf32>
    %35 = arith.truncf %34 : vector<248x120xf32> to vector<248x120xbf16>
    %c3 = arith.constant 3 : index
    %c0_17 = arith.constant 0 : index
    %c0_18 = arith.constant 0 : index
    %36 = vector.load %arg5[%c3, %c0_17, %c0_18] : memref<5x120x256xbf16, #tpu.memory_space<vmem>>, vector<1x120x256xbf16>
    %37 = vector.shape_cast %36 : vector<1x120x256xbf16> to vector<120x256xbf16>
    %cst_19 = arith.constant dense<0.000000e+00> : vector<248x256xf32>
    %38 = tpu.matmul %35, %37, %cst_19 {dimension_numbers = #tpu.dot_dimension_numbers<[1], [0], [0], [1], [0, 0, 1, 1], [], []>} : vector<248x120xbf16>, vector<120x256xbf16>, vector<248x256xf32> -> vector<248x256xf32>
    %39 = arith.addf %33, %38 : vector<248x256xf32>
    %40 = vector.extract_strided_slice %14 {offsets = [4, 0], sizes = [248, 120], strides = [1, 1]} : vector<256x120xf32> to vector<248x120xf32>
    %41 = arith.truncf %40 : vector<248x120xf32> to vector<248x120xbf16>
    %c4 = arith.constant 4 : index
    %c0_20 = arith.constant 0 : index
    %c0_21 = arith.constant 0 : index
    %42 = vector.load %arg5[%c4, %c0_20, %c0_21] : memref<5x120x256xbf16, #tpu.memory_space<vmem>>, vector<1x120x256xbf16>
    %43 = vector.shape_cast %42 : vector<1x120x256xbf16> to vector<120x256xbf16>
    %cst_22 = arith.constant dense<0.000000e+00> : vector<248x256xf32>
    %44 = tpu.matmul %41, %43, %cst_22 {dimension_numbers = #tpu.dot_dimension_numbers<[1], [0], [0], [1], [0, 0, 1, 1], [], []>} : vector<248x120xbf16>, vector<120x256xbf16>, vector<248x256xf32> -> vector<248x256xf32>
    %45 = arith.addf %39, %44 : vector<248x256xf32>
    %46 = vector.extract_strided_slice %45 {offsets = [0, 0], sizes = [248, 80], strides = [1, 1]} : vector<248x256xf32> to vector<248x80xf32>
    %47 = vector.extract_strided_slice %45 {offsets = [0, 128], sizes = [248, 80], strides = [1, 1]} : vector<248x256xf32> to vector<248x80xf32>
    %48 = arith.maximumf %46, %47 : vector<248x80xf32>
    %49 = arith.truncf %48 : vector<248x80xf32> to vector<248x80xbf16>
    %c0_23 = arith.constant 0 : index
    %c0_24 = arith.constant 0 : index
    %50 = vector.load %arg7[%c0_23, %c0_24] : memref<64x248xbf16, #tpu.memory_space<vmem>>, vector<64x248xbf16>
    %cst_25 = arith.constant dense<0.000000e+00> : vector<64x80xf32>
    %51 = tpu.matmul %50, %49, %cst_25 {dimension_numbers = #tpu.dot_dimension_numbers<[1], [0], [0], [1], [0, 0, 1, 1], [], []>} : vector<64x248xbf16>, vector<248x80xbf16>, vector<64x80xf32> -> vector<64x80xf32>
    %c0_26 = arith.constant 0 : index
    %c0_27 = arith.constant 0 : index
    %52 = vector.load %arg8[%c0_26, %c0_27] : memref<64x248xbf16, #tpu.memory_space<vmem>>, vector<64x248xbf16>
    %cst_28 = arith.constant dense<0.000000e+00> : vector<64x80xf32>
    %53 = tpu.matmul %52, %49, %cst_28 {dimension_numbers = #tpu.dot_dimension_numbers<[1], [0], [0], [1], [0, 0, 1, 1], [], []>} : vector<64x248xbf16>, vector<248x80xbf16>, vector<64x80xf32> -> vector<64x80xf32>
    %54 = arith.maximumf %51, %53 : vector<64x80xf32>
    %c0_29 = arith.constant 0 : index
    %c0_30 = arith.constant 0 : index
    %55 = vector.load %arg6[%c0_29, %c0_30] : memref<1x80xf32, #tpu.memory_space<vmem>>, vector<1x80xf32>
    %56 = vector.broadcast %55 : vector<1x80xf32> to vector<64x80xf32>
    %57 = arith.addf %54, %56 : vector<64x80xf32>
    %cst_31 = arith.constant 0.000000e+00 : f32
    %58 = vector.broadcast %cst_31 : f32 to vector<64x80xf32>
    %59 = arith.maximumf %57, %58 : vector<64x80xf32>
    %60 = arith.truncf %59 : vector<64x80xf32> to vector<64x80xbf16>
    %cst_32 = arith.constant 0.000000e+00 : f32
    %61 = vector.broadcast %cst_32 : f32 to vector<16x256xf32>
    %62 = vector.extract_strided_slice %60 {offsets = [0, 0], sizes = [16, 80], strides = [1, 1]} : vector<64x80xbf16> to vector<16x80xbf16>
    %c0_33 = arith.constant 0 : index
    %c0_34 = arith.constant 0 : index
    %c0_35 = arith.constant 0 : index
    %63 = vector.load %arg9[%c0_33, %c0_34, %c0_35] : memref<4x80x256xbf16, #tpu.memory_space<vmem>>, vector<1x80x256xbf16>
    %64 = vector.shape_cast %63 : vector<1x80x256xbf16> to vector<80x256xbf16>
    %cst_36 = arith.constant dense<0.000000e+00> : vector<16x256xf32>
    %65 = tpu.matmul %62, %64, %cst_36 {dimension_numbers = #tpu.dot_dimension_numbers<[1], [0], [0], [1], [0, 0, 1, 1], [], []>} : vector<16x80xbf16>, vector<80x256xbf16>, vector<16x256xf32> -> vector<16x256xf32>
    %66 = arith.addf %61, %65 : vector<16x256xf32>
    %67 = vector.extract_strided_slice %60 {offsets = [16, 0], sizes = [16, 80], strides = [1, 1]} : vector<64x80xbf16> to vector<16x80xbf16>
    %c1_37 = arith.constant 1 : index
    %c0_38 = arith.constant 0 : index
    %c0_39 = arith.constant 0 : index
    %68 = vector.load %arg9[%c1_37, %c0_38, %c0_39] : memref<4x80x256xbf16, #tpu.memory_space<vmem>>, vector<1x80x256xbf16>
    %69 = vector.shape_cast %68 : vector<1x80x256xbf16> to vector<80x256xbf16>
    %cst_40 = arith.constant dense<0.000000e+00> : vector<16x256xf32>
    %70 = tpu.matmul %67, %69, %cst_40 {dimension_numbers = #tpu.dot_dimension_numbers<[1], [0], [0], [1], [0, 0, 1, 1], [], []>} : vector<16x80xbf16>, vector<80x256xbf16>, vector<16x256xf32> -> vector<16x256xf32>
    %71 = arith.addf %66, %70 : vector<16x256xf32>
    %72 = vector.extract_strided_slice %60 {offsets = [32, 0], sizes = [16, 80], strides = [1, 1]} : vector<64x80xbf16> to vector<16x80xbf16>
    %c2_41 = arith.constant 2 : index
    %c0_42 = arith.constant 0 : index
    %c0_43 = arith.constant 0 : index
    %73 = vector.load %arg9[%c2_41, %c0_42, %c0_43] : memref<4x80x256xbf16, #tpu.memory_space<vmem>>, vector<1x80x256xbf16>
    %74 = vector.shape_cast %73 : vector<1x80x256xbf16> to vector<80x256xbf16>
    %cst_44 = arith.constant dense<0.000000e+00> : vector<16x256xf32>
    %75 = tpu.matmul %72, %74, %cst_44 {dimension_numbers = #tpu.dot_dimension_numbers<[1], [0], [0], [1], [0, 0, 1, 1], [], []>} : vector<16x80xbf16>, vector<80x256xbf16>, vector<16x256xf32> -> vector<16x256xf32>
    %76 = arith.addf %71, %75 : vector<16x256xf32>
    %77 = vector.extract_strided_slice %60 {offsets = [48, 0], sizes = [16, 80], strides = [1, 1]} : vector<64x80xbf16> to vector<16x80xbf16>
    %c3_45 = arith.constant 3 : index
    %c0_46 = arith.constant 0 : index
    %c0_47 = arith.constant 0 : index
    %78 = vector.load %arg9[%c3_45, %c0_46, %c0_47] : memref<4x80x256xbf16, #tpu.memory_space<vmem>>, vector<1x80x256xbf16>
    %79 = vector.shape_cast %78 : vector<1x80x256xbf16> to vector<80x256xbf16>
    %cst_48 = arith.constant dense<0.000000e+00> : vector<16x256xf32>
    %80 = tpu.matmul %77, %79, %cst_48 {dimension_numbers = #tpu.dot_dimension_numbers<[1], [0], [0], [1], [0, 0, 1, 1], [], []>} : vector<16x80xbf16>, vector<80x256xbf16>, vector<16x256xf32> -> vector<16x256xf32>
    %81 = arith.addf %76, %80 : vector<16x256xf32>
    %c0_49 = arith.constant 0 : index
    %c0_50 = arith.constant 0 : index
    %82 = vector.load %arg10[%c0_49, %c0_50] : memref<1x256xf32, #tpu.memory_space<vmem>>, vector<1x256xf32>
    %83 = vector.broadcast %82 : vector<1x256xf32> to vector<16x256xf32>
    %84 = arith.addf %81, %83 : vector<16x256xf32>
    %cst_51 = arith.constant 0.000000e+00 : f32
    %85 = vector.broadcast %cst_51 : f32 to vector<16x256xf32>
    %86 = arith.maximumf %84, %85 : vector<16x256xf32>
    %87 = arith.truncf %86 : vector<16x256xf32> to vector<16x256xbf16>
    %c0_52 = arith.constant 0 : index
    %c0_53 = arith.constant 0 : index
    %88 = vector.load %arg11[%c0_52, %c0_53] : memref<256x128xbf16, #tpu.memory_space<vmem>>, vector<256x128xbf16>
    %cst_54 = arith.constant dense<0.000000e+00> : vector<16x128xf32>
    %89 = tpu.matmul %87, %88, %cst_54 {dimension_numbers = #tpu.dot_dimension_numbers<[1], [0], [0], [1], [0, 0, 1, 1], [], []>} : vector<16x256xbf16>, vector<256x128xbf16>, vector<16x128xf32> -> vector<16x128xf32>
    %c0_55 = arith.constant 0 : index
    %c0_56 = arith.constant 0 : index
    %90 = vector.load %arg12[%c0_55, %c0_56] : memref<1x128xf32, #tpu.memory_space<vmem>>, vector<1x128xf32>
    %91 = vector.broadcast %90 : vector<1x128xf32> to vector<16x128xf32>
    %92 = arith.addf %89, %91 : vector<16x128xf32>
    %cst_57 = arith.constant dense<0xFF800000> : vector<16xf32>
    %93 = vector.multi_reduction <maximumf>, %92, %cst_57 [1] : vector<16x128xf32> to vector<16xf32>
    %94 = vector.shape_cast %93 : vector<16xf32> to vector<16x1xf32>
    %95 = vector.broadcast %94 : vector<16x1xf32> to vector<16x128xf32>
    %96 = arith.subf %92, %95 : vector<16x128xf32>
    %97 = math.exp %96 : vector<16x128xf32>
    %cst_58 = arith.constant dense<0.000000e+00> : vector<16xf32>
    %98 = vector.multi_reduction <add>, %97, %cst_58 [1] : vector<16x128xf32> to vector<16xf32>
    %99 = vector.shape_cast %98 : vector<16xf32> to vector<16x1xf32>
    %100 = math.log %99 : vector<16x1xf32>
    %101 = arith.addf %94, %100 : vector<16x1xf32>
    %c0_59 = arith.constant 0 : index
    %c0_60 = arith.constant 0 : index
    %102 = vector.load %arg2[%c0_59, %c0_60] : memref<16x128xf32, #tpu.memory_space<vmem>>, vector<16x128xf32>
    %103 = arith.mulf %92, %102 : vector<16x128xf32>
    %cst_61 = arith.constant dense<0.000000e+00> : vector<16xf32>
    %104 = vector.multi_reduction <add>, %103, %cst_61 [1] : vector<16x128xf32> to vector<16xf32>
    %105 = vector.shape_cast %104 : vector<16xf32> to vector<16x1xf32>
    %106 = arith.subf %101, %105 : vector<16x1xf32>
    %c0_62 = arith.constant 0 : index
    %c0_63 = arith.constant 0 : index
    %107 = vector.load %arg13[%c0_62, %c0_63] : memref<1x128xf32, #tpu.memory_space<vmem>>, vector<1x128xf32>
    %cst_64 = arith.constant 1.000000e+00 : f32
    %108 = vector.broadcast %cst_64 : f32 to vector<1x128xf32>
    %109 = arith.subf %108, %107 : vector<1x128xf32>
    %110 = vector.broadcast %109 : vector<1x128xf32> to vector<16x128xf32>
    %111 = arith.mulf %92, %110 : vector<16x128xf32>
    %112 = vector.broadcast %106 : vector<16x1xf32> to vector<16x128xf32>
    %113 = vector.broadcast %107 : vector<1x128xf32> to vector<16x128xf32>
    %114 = arith.mulf %112, %113 : vector<16x128xf32>
    %115 = arith.addf %111, %114 : vector<16x128xf32>
    %c0_65 = arith.constant 0 : index
    %c0_66 = arith.constant 0 : index
    %116 = vector.load %arg14[%c0_65, %c0_66] : memref<16x128xf32, #tpu.memory_space<vmem>>, vector<16x128xf32>
    tpu.vector_store %arg14[%c0_65, %c0_66], %115 {strides = array<i32>} : memref<16x128xf32, #tpu.memory_space<vmem>>, vector<16x128xf32>,
    return
  }
  func.func @transform_0(%arg0: i32) -> (i32, i32) {
    %c0_i32 = arith.constant 0 : i32
    %c0_i32_0 = arith.constant 0 : i32
    return %arg0, %c0_i32 : i32, i32
  }
  func.func @transform_1(%arg0: i32) -> (i32, i32) {
    %c0_i32 = arith.constant 0 : i32
    %c0_i32_0 = arith.constant 0 : i32
    return %arg0, %c0_i32 : i32, i32
  }
  func.func @transform_2(%arg0: i32) -> (i32, i32) {
    %c0_i32 = arith.constant 0 : i32
    %c0_i32_0 = arith.constant 0 : i32
    %c0_i32_1 = arith.constant 0 : i32
    return %c0_i32, %c0_i32_0 : i32, i32
  }
  func.func @transform_3(%arg0: i32) -> (i32, i32) {
    %c0_i32 = arith.constant 0 : i32
    %c0_i32_0 = arith.constant 0 : i32
    %c0_i32_1 = arith.constant 0 : i32
    return %c0_i32, %c0_i32_0 : i32, i32
  }
  func.func @transform_4(%arg0: i32) -> (i32, i32, i32) {
    %c0_i32 = arith.constant 0 : i32
    %c0_i32_0 = arith.constant 0 : i32
    %c0_i32_1 = arith.constant 0 : i32
    %c0_i32_2 = arith.constant 0 : i32
    return %c0_i32, %c0_i32_0, %c0_i32_1 : i32, i32, i32
  }
  func.func @transform_5(%arg0: i32) -> (i32, i32) {
    %c0_i32 = arith.constant 0 : i32
    %c0_i32_0 = arith.constant 0 : i32
    %c0_i32_1 = arith.constant 0 : i32
    return %c0_i32, %c0_i32_0 : i32, i32
  }
  func.func @transform_6(%arg0: i32) -> (i32, i32) {
    %c0_i32 = arith.constant 0 : i32
    %c0_i32_0 = arith.constant 0 : i32
    %c0_i32_1 = arith.constant 0 : i32
    return %c0_i32, %c0_i32_0 : i32, i32
  }
  func.func @transform_7(%arg0: i32) -> (i32, i32) {
    %c0_i32 = arith.constant 0 : i32
    %c0_i32_0 = arith.constant 0 : i32
    %c0_i32_1 = arith.constant 0 : i32
    return %c0_i32, %c0_i32_0 : i32, i32
  }
  func.func @transform_8(%arg0: i32) -> (i32, i32, i32) {
    %c0_i32 = arith.constant 0 : i32
    %c0_i32_0 = arith.constant 0 : i32
    %c0_i32_1 = arith.constant 0 : i32
    %c0_i32_2 = arith.constant 0 : i32
    return %c0_i32, %c0_i32_0, %c0_i32_1 : i32, i32, i32
  }
  func.func @transform_9(%arg0: i32) -> (i32, i32) {
    %c0_i32 = arith.constant 0 : i32
    %c0_i32_0 = arith.constant 0 : i32
    %c0_i32_1 = arith.constant 0 : i32
    return %c0_i32, %c0_i32_0 : i32, i32
  }
  func.func @transform_10(%arg0: i32) -> (i32, i32) {
    %c0_i32 = arith.constant 0 : i32
    %c0_i32_0 = arith.constant 0 : i32
    %c0_i32_1 = arith.constant 0 : i32
    return %c0_i32, %c0_i32_0 : i32, i32
  }
  func.func @transform_11(%arg0: i32) -> (i32, i32) {
    %c0_i32 = arith.constant 0 : i32
    %c0_i32_0 = arith.constant 0 : i32
    %c0_i32_1 = arith.constant 0 : i32
    return %c0_i32, %c0_i32_0 : i32, i32
  }
  func.func @transform_12(%arg0: i32) -> (i32, i32) {
    %c0_i32 = arith.constant 0 : i32
    %c0_i32_0 = arith.constant 0 : i32
    %c0_i32_1 = arith.constant 0 : i32
    return %c0_i32, %c0_i32_0 : i32, i32
  }
  func.func @transform_13(%arg0: i32) -> (i32, i32) {
    %c0_i32 = arith.constant 0 : i32
    %c0_i32_0 = arith.constant 0 : i32
    return %arg0, %c0_i32 : i32, i32
  }
}

</mosaic_0001>

<bundles_post_ra>
// kernel: training_model_forward.1
= control target key start
LH: loop header
LB: loop body
LE: loop exit
PB: predicated region body
PF: predicated region fallthrough
CT: control target
= control target key end

     0   :  { %v8303_v1 = vmov 0   ;;  %vm818_vm0 = vcmask 1043456   ;;  %vm769_vm1 = vcmask 195584   ;;  %vm1818_vm2 = vsmask.f32 7424  ;;  %s8288_s2 = inlined_call_operand.vmem [shape: bf16[280,512], index: 2, kind: input, shape index: {}]   ;;  %s8289_s0 = inlined_call_operand.vmem [shape: bf16[256,280], index: 0, kind: input, shape index: {}]   ;;  %s8290_s4 = inlined_call_operand.vmem [shape: bf16[5,120,256], index: 4, kind: input, shape index: {}]   ;;  %s8291_s3 = inlined_call_operand.vmem [shape: f32[1,120], index: 3, kind: input, shape index: {}]   ;;  %s8292_s6 = inlined_call_operand.vmem [shape: bf16[64,248], index: 6, kind: input, shape index: {}]   ;;  %s8293_s7 = inlined_call_operand.vmem [shape: bf16[64,248], index: 7, kind: input, shape index: {}]   ;;  %s8294_s8 = inlined_call_operand.vmem [shape: bf16[4,80,256], index: 8, kind: input, shape index: {}]   ;;  %s8295_s10 = inlined_call_operand.vmem [shape: bf16[256,128], index: 10, kind: input, shape index: {}]   ;;  %s8296_s5 = inlined_call_operand.vmem [shape: f32[1,80], index: 5, kind: input, shape index: {}]   ;;  %s8297_s9 = inlined_call_operand.vmem [shape: f32[1,256], index: 9, kind: input, shape index: {}]   ;;  %s8298_s11 = inlined_call_operand.vmem [shape: f32[1,128], index: 11, kind: input, shape index: {}]   ;;  %s8299_s1 = inlined_call_operand.vmem [shape: f32[16,128], index: 1, kind: input, shape index: {}]   ;;  %s8300_s12 = inlined_call_operand.vmem [shape: f32[1,128], index: 12, kind: input, shape index: {}]   ;;  %s8301_s13 = inlined_call_operand.vmem [shape: f32[16,128], index: 13, kind: output, shape index: {}]  }
   0x1   :  { %v5928_v0 = vld [vmem:[%s8288_s2 + $0x4] ss:$16 sps:$4 sm:$0xff]   ;;  %1056 = vmatprep.mubr.bf16.mxu0 %v8303_v1  ;;  %v5930_v2 = vld [vmem:[%s8288_s2] ss:$16 sps:$4 sm:$0xff]   ;;  %v6563_v46 = vld [vmem:[%s8289_s0 + $0x1c] ss:$12 sps:$4 sm:$0xff]  }
   0x2   :  { %831 = vmatprep.subr.bf16.mxu1 %v5928_v0  ;;  %v5931_v3 = vld [vmem:[%s8288_s2 + $0x24] ss:$16 sps:$4 sm:$0xff]   ;;  %v5933_v4 = vld [vmem:[%s8288_s2 + $0x20] ss:$16 sps:$4 sm:$0xff]   ;;  %v6603_v51 = vld [vmem:[%s8289_s0 + $0x4c] ss:$12 sps:$4 sm:$0xff]  }
   0x3   :  { %832 = vmatpush1.bf16.msra.mxu1 %v5930_v2  ;;  %v5934_v5 = vld [vmem:[%s8288_s2 + $0x44] ss:$16 sps:$4 sm:$0xff]   ;;  %v5936_v6 = vld [vmem:[%s8288_s2 + $0x40] ss:$16 sps:$4 sm:$0xff]   ;;  %v6040_v52 = vld [vmem:[%s8288_s2 + $0xc] ss:$16 sps:$4 sm:$0xff]  }
   0x4   :  { %833 = vmatprep.subr.bf16.mxu1 %v5931_v3  ;;  %v5937_v7 = vld [vmem:[%s8288_s2 + $0x64] ss:$16 sps:$4 sm:$0xff]   ;;  %v5939_v8 = vld [vmem:[%s8288_s2 + $0x60] ss:$16 sps:$4 sm:$0xff]   ;;  %v6630_v56 = vld [vmem:[%s8289_s0 + $0x7c] ss:$12 sps:$4 sm:$0xff]  }
   0x5   :  { %v5940_v9 = vld [vmem:[%s8288_s2 + $0x84] ss:$16 sps:$4 sm:$0xff]   ;;  %v5942_v10 = vld [vmem:[%s8288_s2 + $0x80] ss:$16 sps:$4 sm:$0xff]   ;;  %v6654_v60 = vld [vmem:[%s8289_s0 + $0xac] ss:$12 sps:$4 sm:$0xff]  }
   0x6   :  { %v5943_v11 = vld [vmem:[%s8288_s2 + $0xa4] ss:$16 sps:$4 sm:$0xff]   ;;  %v5945_v12 = vld [vmem:[%s8288_s2 + $0xa0] ss:$16 sps:$4 sm:$0xff]   ;;  %v6678_v0 = vld [vmem:[%s8289_s0 + $0xdc] ss:$12 sps:$4 sm:$0xff]  }
   0x7   :  { %834 = vmatpush1.bf16.msra.mxu1 %v5933_v4  ;;  %v5946_v13 = vld [vmem:[%s8288_s2 + $0xc4] ss:$16 sps:$4 sm:$0xff]   ;;  %v6440_v15 = vld [vmem:[%s8288_s2 + $0x200] ss:$16 sps:$4 sm:$0xff]   ;;  %vm2021_vm3 = vcmask 982016   ;;  %vm2604_vm5 = vcmask 1046528  }
   0x8   :  { %835 = vmatprep.subr.bf16.mxu1 %v5934_v5  ;;  %v6435_v14 = vld [vmem:[%s8288_s2 + $0x204] ss:$16 sps:$4 sm:$0xff]   ;;  %v5948_v16 = vld [vmem:[%s8288_s2 + $0xc0] ss:$16 sps:$4 sm:$0xff]   ;;  %v6702_v5 = vld [vmem:[%s8289_s0 + $0x10c] ss:$12 sps:$4 sm:$0xff]  }
   0x9   :  { %1024 = vmatprep.subr.bf16.mxu0 %v6435_v14  ;;  %v177_v17 = vld [vmem:[%s8288_s2 + $0x220] sm:$0xff]  ;;  %v6469_v23 = vld [vmem:[%s8289_s0 + $0x8] ss:$12 sps:$4 sm:$0xff]   ;;  %v6533_v39 = vld [vmem:[%s8289_s0 + $0x50] ss:$12 sps:$4 sm:$0xff]   ;;  %vm3496_vm6 = vcmask 1045504  }
   0xa   :  { %v5949_v18 = vld [vmem:[%s8288_s2 + $0xe4] ss:$16 sps:$4 sm:$0xff]   ;;  %1025 = vmatpush1.bf16.msra.mxu0 %v6440_v15  ;;  %v6453_v19 = vcombine.high %v177_v17, %v177_v17  ;;  %v5043_v20 = vcombine.low %v177_v17, %v177_v17  ;;  %v5951_v24 = vld [vmem:[%s8288_s2 + $0xe0] ss:$16 sps:$4 sm:$0xff]   ;;  %8339 = vst [vmem:[#allocation3_spill] sm:$0xff] %v6533_v39  ;;  %vm4308_vm7 = vcmask 654336  }
   0xb   :  { %836 = vmatpush1.bf16.msra.mxu1 %v5936_v6  ;;  %v6458_v21 = vld [vmem:[%s8289_s0 + $0x4] ss:$12 sps:$4 sm:$0xff]   ;;  %v6490_v28 = vld [vmem:[%s8289_s0 + $0x20] ss:$12 sps:$4 sm:$0xff]   ;;  %v6550_v43 = vld [vmem:[%s8289_s0 + $0x68] ss:$12 sps:$4 sm:$0xff]  }
   0xc   :  { %837 = vmatprep.subr.bf16.mxu1 %v5937_v7  ;;  %5047 = vmatprep.subr.msk.bf16.mxu0 %vm818_vm0, %v6453_v19  ;;  %v6463_v22 = vsel %vm818_vm0, %v5043_v20, 0  ;;  %v5952_v25 = vld [vmem:[%s8288_s2 + $0x104] ss:$16 sps:$4 sm:$0xff]   ;;  %v5954_v26 = vld [vmem:[%s8288_s2 + $0x100] ss:$16 sps:$4 sm:$0xff]   ;;  %8340 = vst [vmem:[#allocation4_spill] sm:$0xff] %v6550_v43 }
   0xd   :  { %863 = vmatprep.mubr.bf16.mxu1 %v6458_v21  ;;  %v5955_v27 = vld [vmem:[%s8288_s2 + $0x124] ss:$16 sps:$4 sm:$0xff]   ;;  %v5957_v29 = vld [vmem:[%s8288_s2 + $0x120] ss:$16 sps:$4 sm:$0xff]   ;;  %v6043_v17 = vld [vmem:[%s8288_s2 + $0x2c] ss:$16 sps:$4 sm:$0xff]  }
   0xe   :  { %1027 = vmatpush1.bf16.msra.mxu0 %v6463_v22  ;;  %v5958_v30 = vld [vmem:[%s8288_s2 + $0x144] ss:$16 sps:$4 sm:$0xff]   ;;  %v5960_v31 = vld [vmem:[%s8288_s2 + $0x140] ss:$16 sps:$4 sm:$0xff]   ;;  %vm3034_vm4 = vsmask.f32 6400 }
   0xf   :  { %838 = vmatpush1.bf16.msra.mxu1 %v5939_v8  ;;  %v5961_v32 = vld [vmem:[%s8288_s2 + $0x164] ss:$16 sps:$4 sm:$0xff]   ;;  %v5963_v34 = vld [vmem:[%s8288_s2 + $0x160] ss:$16 sps:$4 sm:$0xff]  }
  0x10   :  { %839 = vmatprep.subr.bf16.mxu1 %v5940_v9  ;;  %v6510_v33 = vld [vmem:[%s8289_s0 + $0x38] ss:$12 sps:$4 sm:$0xff]   ;;  %v5966_v36 = vld [vmem:[%s8288_s2 + $0x180] ss:$16 sps:$4 sm:$0xff]   ;;  %v6613_v53 = vld [vmem:[%s8289_s0 + $0x48] ss:$12 sps:$4 sm:$0xff]  }
  0x11   :  { %5048 = vmatmul.mubr.msk.bf16.vlgmr.msra.gmra.mrb[0].mxu0 %vm769_vm1, %v6469_v23  ;;  %8338 = vst [vmem:[#allocation2_spill] sm:$0xff] %v6510_v33  ;;  %v5964_v35 = vld [vmem:[%s8288_s2 + $0x184] ss:$16 sps:$4 sm:$0xff]   ;;  %v5969_v38 = vld [vmem:[%s8288_s2 + $0x1a0] ss:$16 sps:$4 sm:$0xff]  }
  0x12   :  { %1066 = vmatprep.mubr.bf16.mxu0 %v8303_v1  ;;  %v5967_v37 = vld [vmem:[%s8288_s2 + $0x1a4] ss:$16 sps:$4 sm:$0xff]   ;;  %v5974_v41 = vld [vmem:[%s8288_s2 + $0x1c0] ss:$16 sps:$4 sm:$0xff]   ;;  %v6726_v9 = vld [vmem:[%s8289_s0 + $0x13c] ss:$12 sps:$4 sm:$0xff]  }
  0x13   :  { %840 = vmatpush1.bf16.msra.mxu1 %v5942_v10  ;;  %v5970_v40 = vld [vmem:[%s8288_s2 + $0x1c4] ss:$16 sps:$4 sm:$0xff]   ;;  %v5979_v44 = vld [vmem:[%s8288_s2 + $0x1e0] ss:$16 sps:$4 sm:$0xff]  }
  0x14   :  { %841 = vmatprep.subr.bf16.mxu1 %v5943_v11  ;;  %v5976_v42 = vld [vmem:[%s8288_s2 + $0x1e4] ss:$16 sps:$4 sm:$0xff]   ;;  %v6558_v45 = vld [vmem:[%s8289_s0] ss:$12 sps:$4 sm:$0xff]   ;;  %v6598_v50 = vld [vmem:[%s8289_s0 + $0x30] ss:$12 sps:$4 sm:$0xff]  }
  0x15   :  { %v6571_v47 = vld [vmem:[%s8289_s0 + $0x80] ss:$12 sps:$4 sm:$0xff]   ;;  %v6582_v48 = vld [vmem:[%s8289_s0 + $0x18] ss:$12 sps:$4 sm:$0xff]   ;;  %v6649_v59 = vld [vmem:[%s8289_s0 + $0x90] ss:$12 sps:$4 sm:$0xff]  }
  0x16   :  { %8341 = vst [vmem:[#allocation5_spill] sm:$0xff] %v6571_v47  ;;  %v6589_v49 = vld [vmem:[%s8289_s0 + $0x34] ss:$12 sps:$4 sm:$0xff]   ;;  %v6618_v54 = vld [vmem:[%s8289_s0 + $0x64] ss:$12 sps:$4 sm:$0xff]  }
  0x17   :  { %842 = vmatpush1.bf16.msra.mxu1 %v5945_v12  ;;  %v6625_v55 = vld [vmem:[%s8289_s0 + $0x60] ss:$12 sps:$4 sm:$0xff]   ;;  %v6637_v57 = vld [vmem:[%s8289_s0 + $0x78] ss:$12 sps:$4 sm:$0xff]   ;;  %v6661_v61 = vld [vmem:[%s8289_s0 + $0xa8] ss:$12 sps:$4 sm:$0xff]  }
  0x18   :  { %843 = vmatprep.subr.bf16.mxu1 %v5946_v13  ;;  %v6642_v58 = vld [vmem:[%s8289_s0 + $0x94] ss:$12 sps:$4 sm:$0xff]   ;;  %v6666_v62 = vld [vmem:[%s8289_s0 + $0xc4] ss:$12 sps:$4 sm:$0xff]   ;;  %v6750_v13 = vld [vmem:[%s8289_s0 + $0x16c] ss:$12 sps:$4 sm:$0xff]  }
  0x19   :  { %5049 = vmatmul.mubr.msk.bf16.gmra.mrb[4].mxu0 %vm769_vm1, %v6490_v28  ;;  %v6673_v63 = vld [vmem:[%s8289_s0 + $0xc0] ss:$12 sps:$4 sm:$0xff]   ;;  %v6685_v2 = vld [vmem:[%s8289_s0 + $0xd8] ss:$12 sps:$4 sm:$0xff]   ;;  %v6697_v4 = vld [vmem:[%s8289_s0 + $0xf0] ss:$12 sps:$4 sm:$0xff]  }
  0x1a   :  { %1076 = vmatprep.mubr.bf16.mxu0 %v8303_v1  ;;  %v6690_v3 = vld [vmem:[%s8289_s0 + $0xf4] ss:$12 sps:$4 sm:$0xff]   ;;  %v6714_v7 = vld [vmem:[%s8289_s0 + $0x124] ss:$12 sps:$4 sm:$0xff]  }
  0x1b   :  { %844 = vmatpush1.bf16.msra.mxu1 %v5948_v16  ;;  %v6709_v6 = vld [vmem:[%s8289_s0 + $0x108] ss:$12 sps:$4 sm:$0xff]   ;;  %v6721_v8 = vld [vmem:[%s8289_s0 + $0x120] ss:$12 sps:$4 sm:$0xff]   ;;  %v6733_v10 = vld [vmem:[%s8289_s0 + $0x138] ss:$12 sps:$4 sm:$0xff]  }
  0x1c   :  { %845 = vmatprep.subr.bf16.mxu1 %v5949_v18  ;;  %v6738_v11 = vld [vmem:[%s8289_s0 + $0x154] ss:$12 sps:$4 sm:$0xff]   ;;  %v6745_v12 = vld [vmem:[%s8289_s0 + $0x150] ss:$12 sps:$4 sm:$0xff]   ;;  %v6038_v16 = vld [vmem:[%s8288_s2 + $0x8] ss:$16 sps:$4 sm:$0xff]  }
  0x1d   :  { %v6041_v18 = vld [vmem:[%s8288_s2 + $0x28] ss:$16 sps:$4 sm:$0xff]   ;;  %v6784_v20 = vld [vmem:[%s8289_s0 + $0xb0] ss:$12 sps:$4 sm:$0xff]  }
  0x1e   :  { %8343 = vst [vmem:[#allocation7_spill] sm:$0xff] %v6784_v20 }
  0x1f   :  { %846 = vmatpush1.bf16.msra.mxu1 %v5951_v24  ;;  %v6050_v24 = vld [vmem:[%s8288_s2 + $0x6c] ss:$16 sps:$4 sm:$0xff]  }
  0x20   :  { %847 = vmatprep.subr.bf16.mxu1 %v5952_v25  ;;  %v6048_v25 = vld [vmem:[%s8288_s2 + $0x68] ss:$16 sps:$4 sm:$0xff]  }
  0x21   :  { %5050 = vmatmul.mubr.msk.bf16.gmra.mrb[8].mxu0 %vm769_vm1, %v6510_v33 }
  0x22   :  { %1086 = vmatprep.mubr.bf16.mxu0 %v8303_v1 }
  0x23   :  { %848 = vmatpush1.bf16.msra.mxu1 %v5954_v26  ;;  %v6054_v26 = vld [vmem:[%s8288_s2 + $0x8c] ss:$16 sps:$4 sm:$0xff]  }
  0x24   :  { %849 = vmatprep.subr.bf16.mxu1 %v5955_v27  ;;  %v6804_v27 = vld [vmem:[%s8289_s0 + $0xc8] ss:$12 sps:$4 sm:$0xff]  }
  0x25   :  { %8344 = vst [vmem:[#allocation8_spill] sm:$0xff] %v6804_v27 }
  0x27   :  { %850 = vmatpush1.bf16.msra.mxu1 %v5957_v29  ;;  %v6052_v29 = vld [vmem:[%s8288_s2 + $0x88] ss:$16 sps:$4 sm:$0xff]  }
  0x28   :  { %851 = vmatprep.subr.bf16.mxu1 %v5958_v30  ;;  %v6057_v30 = vld [vmem:[%s8288_s2 + $0xac] ss:$16 sps:$4 sm:$0xff]  }
  0x29   :  { %5051 = vmatmul.mubr.msk.bf16.gmra.mrb[12].mxu0 %vm769_vm1, %v6533_v39 }
  0x2a   :  { %1096 = vmatprep.mubr.bf16.mxu0 %v8303_v1 }
  0x2b   :  { %852 = vmatpush1.bf16.msra.mxu1 %v5960_v31  ;;  %v6055_v31 = vld [vmem:[%s8288_s2 + $0xa8] ss:$16 sps:$4 sm:$0xff]  }
  0x2c   :  { %853 = vmatprep.subr.bf16.mxu1 %v5961_v32  ;;  %v6061_v32 = vld [vmem:[%s8288_s2 + $0xcc] ss:$16 sps:$4 sm:$0xff]  }
  0x2f   :  { %854 = vmatpush1.bf16.msra.mxu1 %v5963_v34  ;;  %v6824_v34 = vld [vmem:[%s8289_s0 + $0xe0] ss:$12 sps:$4 sm:$0xff]  }
  0x30   :  { %855 = vmatprep.subr.bf16.mxu1 %v5964_v35  ;;  %8345 = vst [vmem:[#allocation9_spill] sm:$0xff] %v6824_v34  ;;  %v6059_v35 = vld [vmem:[%s8288_s2 + $0xc8] ss:$16 sps:$4 sm:$0xff]  }
  0x31   :  { %5052 = vmatmul.mubr.msk.bf16.gmra.mrb[16].mxu0 %vm769_vm1, %v6550_v43 }
  0x32   :  { %1106 = vmatprep.mubr.bf16.mxu0 %v8303_v1 }
  0x33   :  { %856 = vmatpush1.bf16.msra.mxu1 %v5966_v36  ;;  %v6064_v36 = vld [vmem:[%s8288_s2 + $0xec] ss:$16 sps:$4 sm:$0xff]  }
  0x34   :  { %857 = vmatprep.subr.bf16.mxu1 %v5967_v37  ;;  %v6062_v37 = vld [vmem:[%s8288_s2 + $0xe8] ss:$16 sps:$4 sm:$0xff]  }
  0x37   :  { %858 = vmatpush1.bf16.msra.mxu1 %v5969_v38  ;;  %v6068_v38 = vld [vmem:[%s8288_s2 + $0x10c] ss:$16 sps:$4 sm:$0xff]  }
  0x38   :  { %859 = vmatprep.subr.bf16.mxu1 %v5970_v40  ;;  %v6844_v40 = vld [vmem:[%s8289_s0 + $0xf8] ss:$12 sps:$4 sm:$0xff]  }
  0x39   :  { %5053 = vmatmul.mubr.msk.bf16.gmra.mrb[20].mxu0 %vm769_vm1, %v6571_v47  ;;  %8346 = vst [vmem:[#allocation10_spill] sm:$0xff] %v6844_v40 }
  0x3a   :  { %2108 = vmatprep.mubr.bf16.mxu0 %v8303_v1 }
  0x3b   :  { %860 = vmatpush1.bf16.msra.mxu1 %v5974_v41  ;;  %v6066_v41 = vld [vmem:[%s8288_s2 + $0x108] ss:$16 sps:$4 sm:$0xff]  }
  0x3c   :  { %861 = vmatprep.subr.bf16.mxu1 %v5976_v42  ;;  %v6071_v42 = vld [vmem:[%s8288_s2 + $0x12c] ss:$16 sps:$4 sm:$0xff]  }
  0x3f   :  { %862 = vmatpush1.bf16.msra.mxu1 %v5979_v44  ;;  %v6069_v44 = vld [vmem:[%s8288_s2 + $0x128] ss:$16 sps:$4 sm:$0xff]  }
  0x40   :  { %5525 = vmatprep.subr.bf16.mxu1 %v6435_v14  ;;  %v6757_v14 = vld [vmem:[%s8289_s0 + $0x168] ss:$12 sps:$4 sm:$0xff]  }
  0x42   :  { %864 = vmatmul.mubr.bf16.vlgmr.msra.gmra.mrb[0].mxu1 %v6558_v45 }
  0x43   :  { %873 = vmatprep.mubr.bf16.mxu1 %v6563_v46  ;;  %5527 = vmatpush1.bf16.msra.mxu1 %v6440_v15  ;;  %v6764_v15 = vld [vmem:[%s8289_s0 + $0x98] ss:$12 sps:$4 sm:$0xff]  }
  0x44   :  { %5526 = vmatprep.subr.msk.bf16.mxu1 %vm818_vm0, %v6453_v19  ;;  %8342 = vst [vmem:[#allocation6_spill] sm:$0xff] %v6764_v15  ;;  %v6047_v19 = vld [vmem:[%s8288_s2 + $0x4c] ss:$16 sps:$4 sm:$0xff]  }
  0x47   :  { %5528 = vmatpush1.bf16.msra.mxu1 %v6463_v22  ;;  %v6045_v22 = vld [vmem:[%s8288_s2 + $0x48] ss:$16 sps:$4 sm:$0xff]  }
  0x48   :  { %1217 = vmatprep.subr.bf16.mxu1 %v6040_v52  ;;  %v6075_v52 = vld [vmem:[%s8288_s2 + $0x14c] ss:$16 sps:$4 sm:$0xff]  }
  0x4a   :  { %874 = vmatmul.mubr.bf16.gmra.mrb[4].mxu1 %v6582_v48 }
  0x4b   :  { %883 = vmatprep.mubr.bf16.mxu1 %v6589_v49 }
  0x52   :  { %884 = vmatmul.mubr.bf16.gmra.mrb[8].mxu1 %v6598_v50 }
  0x53   :  { %893 = vmatprep.mubr.bf16.mxu1 %v6603_v51 }
  0x5a   :  { %894 = vmatmul.mubr.bf16.gmra.mrb[12].mxu1 %v6613_v53 }
  0x5b   :  { %903 = vmatprep.mubr.bf16.mxu1 %v6618_v54 }
  0x62   :  { %904 = vmatmul.mubr.bf16.gmra.mrb[16].mxu1 %v6625_v55 }
  0x63   :  { %913 = vmatprep.mubr.bf16.mxu1 %v6630_v56 }
  0x6a   :  { %914 = vmatmul.mubr.bf16.gmra.mrb[20].mxu1 %v6637_v57 }
  0x6b   :  { %923 = vmatprep.mubr.bf16.mxu1 %v6642_v58 }
  0x72   :  { %924 = vmatmul.mubr.bf16.gmra.mrb[24].mxu1 %v6649_v59 }
  0x73   :  { %933 = vmatprep.mubr.bf16.mxu1 %v6654_v60 }
  0x7a   :  { %934 = vmatmul.mubr.bf16.gmra.mrb[28].mxu1 %v6661_v61 }
  0x7b   :  { %943 = vmatprep.mubr.bf16.mxu1 %v6666_v62 }
  0x82   :  { %944 = vmatmul.mubr.bf16.gmra.mrb[32].mxu1 %v6673_v63 }
  0x83   :  { %953 = vmatprep.mubr.bf16.mxu1 %v6678_v0 }
  0x8a   :  { %954 = vmatmul.mubr.bf16.gmra.mrb[36].mxu1 %v6685_v2 }
  0x8b   :  { %963 = vmatprep.mubr.bf16.mxu1 %v6690_v3 }
  0x92   :  { %964 = vmatmul.mubr.bf16.gmra.mrb[40].mxu1 %v6697_v4 }
  0x93   :  { %973 = vmatprep.mubr.bf16.mxu1 %v6702_v5 }
  0x9a   :  { %974 = vmatmul.mubr.bf16.gmra.mrb[44].mxu1 %v6709_v6 }
  0x9b   :  { %983 = vmatprep.mubr.bf16.mxu1 %v6714_v7 }
  0xa2   :  { %984 = vmatmul.mubr.bf16.gmra.mrb[48].mxu1 %v6721_v8 }
  0xa3   :  { %993 = vmatprep.mubr.bf16.mxu1 %v6726_v9 }
  0xaa   :  { %994 = vmatmul.mubr.bf16.gmra.mrb[52].mxu1 %v6733_v10 }
  0xab   :  { %1003 = vmatprep.mubr.bf16.mxu1 %v6738_v11 }
  0xb2   :  { %1004 = vmatmul.mubr.bf16.gmra.mrb[56].mxu1 %v6745_v12 }
  0xb3   :  { %1013 = vmatprep.mubr.bf16.mxu1 %v6750_v13 }
  0xba   :  { %1014 = vmatmul.mubr.bf16.gmra.mrb[60].mxu1 %v6757_v14 }
  0xbb   :  { %1116 = vmatprep.mubr.bf16.mxu1 %v8303_v1 }
  0xc2   :  { %5054 = vmatmul.mubr.msk.bf16.vlgmr.msra.gmra.mrb[24].mxu1 %vm769_vm1, %v6764_v15 }
  0xc3   :  { %1126 = vmatprep.mubr.bf16.mxu1 %v8303_v1  ;;  %1218 = vmatpush1.bf16.msra.mxu1 %v6038_v16  ;;  %v6864_v16 = vld [vmem:[%s8289_s0 + $0x110] ss:$12 sps:$4 sm:$0xff]  }
  0xc4   :  { %1219 = vmatprep.subr.bf16.mxu1 %v6043_v17  ;;  %8347 = vst [vmem:[#allocation11_spill] sm:$0xff] %v6864_v16  ;;  %v6073_v17 = vld [vmem:[%s8288_s2 + $0x148] ss:$16 sps:$4 sm:$0xff]  }
  0xc7   :  { %1220 = vmatpush1.bf16.msra.mxu1 %v6041_v18  ;;  %v6078_v18 = vld [vmem:[%s8288_s2 + $0x16c] ss:$16 sps:$4 sm:$0xff]  }
  0xc8   :  { %1221 = vmatprep.subr.bf16.mxu1 %v6047_v19  ;;  %v6076_v19 = vld [vmem:[%s8288_s2 + $0x168] ss:$16 sps:$4 sm:$0xff]  }
  0xca   :  { %5055 = vmatmul.mubr.msk.bf16.gmra.mrb[28].mxu1 %vm769_vm1, %v6784_v20 }
  0xcb   :  { %1136 = vmatprep.mubr.bf16.mxu1 %v8303_v1  ;;  %1222 = vmatpush1.bf16.msra.mxu1 %v6045_v22  ;;  %v6082_v22 = vld [vmem:[%s8288_s2 + $0x18c] ss:$16 sps:$4 sm:$0xff]  }
  0xcc   :  { %1223 = vmatprep.subr.bf16.mxu1 %v6050_v24  ;;  %v6884_v24 = vld [vmem:[%s8289_s0 + $0x128] ss:$12 sps:$4 sm:$0xff]  }
  0xcd   :  { %8348 = vst [vmem:[#allocation12_spill] sm:$0xff] %v6884_v24 }
  0xcf   :  { %1224 = vmatpush1.bf16.msra.mxu1 %v6048_v25  ;;  %v6080_v25 = vld [vmem:[%s8288_s2 + $0x188] ss:$16 sps:$4 sm:$0xff]  }
  0xd0   :  { %1225 = vmatprep.subr.bf16.mxu1 %v6054_v26  ;;  %v6085_v26 = vld [vmem:[%s8288_s2 + $0x1ac] ss:$16 sps:$4 sm:$0xff]  }
  0xd2   :  { %5056 = vmatmul.mubr.msk.bf16.gmra.mrb[32].mxu1 %vm769_vm1, %v6804_v27 }
  0xd3   :  { %1146 = vmatprep.mubr.bf16.mxu1 %v8303_v1  ;;  %1226 = vmatpush1.bf16.msra.mxu1 %v6052_v29 }
  0xd4   :  { %1227 = vmatprep.subr.bf16.mxu1 %v6057_v30 }
  0xd7   :  { %1228 = vmatpush1.bf16.msra.mxu1 %v6055_v31  ;;  %v6083_v31 = vld [vmem:[%s8288_s2 + $0x1a8] ss:$16 sps:$4 sm:$0xff]  }
  0xd8   :  { %1229 = vmatprep.subr.bf16.mxu1 %v6061_v32 }
  0xda   :  { %5057 = vmatmul.mubr.msk.bf16.gmra.mrb[36].mxu1 %vm769_vm1, %v6824_v34 }
  0xdb   :  { %1156 = vmatprep.mubr.bf16.mxu1 %v8303_v1  ;;  %1230 = vmatpush1.bf16.msra.mxu1 %v6059_v35  ;;  %v6089_v35 = vld [vmem:[%s8288_s2 + $0x1cc] ss:$16 sps:$4 sm:$0xff]  }
  0xdc   :  { %1231 = vmatprep.subr.bf16.mxu1 %v6064_v36 }
  0xdf   :  { %1232 = vmatpush1.bf16.msra.mxu1 %v6062_v37  ;;  %v6904_v37 = vld [vmem:[%s8289_s0 + $0x140] ss:$12 sps:$4 sm:$0xff]  }
  0xe0   :  { %1233 = vmatprep.subr.bf16.mxu1 %v6068_v38  ;;  %8349 = vst [vmem:[#allocation13_spill] sm:$0xff] %v6904_v37  ;;  %v6087_v38 = vld [vmem:[%s8288_s2 + $0x1c8] ss:$16 sps:$4 sm:$0xff]  }
  0xe2   :  { %5058 = vmatmul.mubr.msk.bf16.gmra.mrb[40].mxu1 %vm769_vm1, %v6844_v40 }
  0xe3   :  { %1166 = vmatprep.mubr.bf16.mxu1 %v8303_v1  ;;  %1234 = vmatpush1.bf16.msra.mxu1 %v6066_v41  ;;  %v6092_v41 = vld [vmem:[%s8288_s2 + $0x1ec] ss:$16 sps:$4 sm:$0xff]  }
  0xe4   :  { %1235 = vmatprep.subr.bf16.mxu1 %v6071_v42  ;;  %v1058_v29 = vpop.f32.mrb[0].mxu0 }
  0xe5   :  { %v1060_v30 = vpop.f32.mrb[1].mxu0 }
  0xe6   :  { %v1062_v32 = vpop.f32.mrb[2].mxu0 }
  0xe7   :  { %1236 = vmatpush1.bf16.msra.mxu1 %v6069_v44  ;;  %v1064_v36 = vpop.f32.mrb[3].mxu0 }
  0xe8   :  { %1237 = vmatprep.subr.bf16.mxu1 %v6075_v52  ;;  %v6090_v52 = vld [vmem:[%s8288_s2 + $0x1e8] ss:$16 sps:$4 sm:$0xff]  }
  0xea   :  { %5059 = vmatmul.mubr.msk.bf16.gmra.mrb[44].mxu1 %vm769_vm1, %v6864_v16 }
  0xeb   :  { %1176 = vmatprep.mubr.bf16.mxu1 %v8303_v1  ;;  %1238 = vmatpush1.bf16.msra.mxu1 %v6073_v17 }
  0xec   :  { %1239 = vmatprep.subr.bf16.mxu1 %v6078_v18  ;;  %v1068_v42 = vpop.f32.mrb[4].mxu0 }
  0xed   :  { %v1070_v44 = vpop.f32.mrb[5].mxu0 }
  0xee   :  { %v1072_v17 = vpop.f32.mrb[6].mxu0 }
  0xef   :  { %1240 = vmatpush1.bf16.msra.mxu1 %v6076_v19  ;;  %v1074_v18 = vpop.f32.mrb[7].mxu0  ;;  %v6095_v19 = vld [vmem:[%s8288_s2 + $0x20c] ss:$16 sps:$4 sm:$0xff]  }
  0xf0   :  { %1241 = vmatprep.subr.bf16.mxu1 %v6082_v22  ;;  %v6924_v22 = vld [vmem:[%s8289_s0 + $0x158] ss:$12 sps:$4 sm:$0xff]  }
  0xf1   :  { %8350 = vst [vmem:[#allocation14_spill] sm:$0xff] %v6924_v22 }
  0xf2   :  { %5060 = vmatmul.mubr.msk.bf16.gmra.mrb[48].mxu1 %vm769_vm1, %v6884_v24 }
  0xf3   :  { %1186 = vmatprep.mubr.bf16.mxu1 %v8303_v1  ;;  %1242 = vmatpush1.bf16.msra.mxu1 %v6080_v25 }
  0xf4   :  { %1243 = vmatprep.subr.bf16.mxu1 %v6085_v26  ;;  %v1078_v25 = vpop.f32.mrb[8].mxu0 }
  0xf5   :  { %v1080_v26 = vpop.f32.mrb[9].mxu0 }
  0xf7   :  { %1244 = vmatpush1.bf16.msra.mxu1 %v6083_v31  ;;  %v1082_v31 = vpop.f32.mrb[10].mxu0 }
  0xf8   :  { %1245 = vmatprep.subr.bf16.mxu1 %v6089_v35  ;;  %v1084_v35 = vpop.f32.mrb[11].mxu0 }
  0xfa   :  { %5061 = vmatmul.mubr.msk.bf16.gmra.mrb[52].mxu1 %vm769_vm1, %v6904_v37 }
  0xfb   :  { %1196 = vmatprep.mubr.bf16.mxu1 %v8303_v1  ;;  %1246 = vmatpush1.bf16.msra.mxu1 %v6087_v38  ;;  %v6932_v38 = vld [vmem:[%s8289_s0 + $0x170] ss:$12 sps:$4 sm:$0xff]  }
  0xfc   :  { %1247 = vmatprep.subr.bf16.mxu1 %v6092_v41  ;;  %8351 = vst [vmem:[#allocation15_spill] sm:$0xff] %v6932_v38  ;;  %v1088_v41 = vpop.f32.mrb[12].mxu0 }
  0xff   :  { %1248 = vmatpush1.bf16.msra.mxu1 %v6090_v52  ;;  %v1090_v52 = vpop.f32.mrb[13].mxu0 }
 0x100   :  { %1410 = vmatprep.subr.bf16.mxu1 %v6095_v19  ;;  %v1092_v19 = vpop.f32.mrb[14].mxu0 }
 0x101   :  { %v6937_v37 = vpop.f32.mrb[15].mxu0 }
 0x102   :  { %5062 = vmatmul.mubr.msk.bf16.gmra.mrb[56].mxu1 %vm769_vm1, %v6924_v22  ;;  %v6093_v22 = vld [vmem:[%s8288_s2 + $0x208] ss:$16 sps:$4 sm:$0xff]  }
 0x103   :  { %1206 = vmatprep.mubr.bf16.mxu1 %v8303_v1  ;;  %v178_v1 = vld [vmem:[%s8288_s2 + $0x228] sm:$0xff] }
 0x104   :  { %v5046_v24 = vcombine.high %v178_v1, %v178_v1  ;;  %v5045_v16 = vcombine.low %v178_v1, %v178_v1  ;;  %v6945_v40 = vpop.f32.mrb[16].mxu0 }
 0x106   :  { %v826_v27 = vsel %vm818_vm0, %v5045_v16, 0 }
 0x10a   :  { %5063 = vmatmul.mubr.msk.bf16.gmra.mrb[60].mxu1 %vm769_vm1, %v6932_v38  ;;  %v6948_v38 = vpop.f32.mrb[17].mxu0 }
 0x10b   :  { %1249 = vmatprep.mubr.bf16.mxu1 %v6458_v21  ;;  %v6951_v21 = vpop.f32.mrb[18].mxu0 }
 0x10c   :  { %v6953_v34 = vpop.f32.mrb[19].mxu0 }
 0x10d   :  { %v1108_v33 = vpop.f32.mrb[20].mxu0 }
 0x10e   :  { %v1110_v16 = vpop.f32.mrb[21].mxu0 }
 0x112   :  { %1250 = vmatmul.mubr.bf16.vlgmr.msra.gmra.mrb[64].mxu1 %v6558_v45 }
 0x113   :  { %1259 = vmatprep.mubr.bf16.mxu1 %v6563_v46  ;;  %1411 = vmatpush1.bf16.msra.mxu1 %v6093_v22 }
 0x114   :  { %5064 = vmatprep.subr.msk.bf16.mxu1 %vm818_vm0, %v5046_v24  ;;  %v1112_v24 = vpop.f32.mrb[22].mxu0 }
 0x115   :  { %v865_v20 = vpop.f32.mrb[0].mxu1 }
 0x116   :  { %v6957_v15 = vadd.f32 %v1058_v29, %v865_v20  ;;  %v867_v1 = vpop.f32.mrb[1].mxu1  ;;  %v1114_v29 = vpop.f32.mrb[23].mxu0 }
 0x117   :  { %v6959_v47 = vadd.f32 %v1060_v30, %v867_v1  ;;  %v869_v45 = vpop.f32.mrb[2].mxu1  ;;  %1413 = vmatpush1.bf16.msra.mxu1 %v826_v27 }
 0x118   :  { %v6961_v43 = vadd.f32 %v1062_v32, %v869_v45  ;;  %v871_v46 = vpop.f32.mrb[3].mxu1 }
 0x119   :  { %v6965_v39 = vadd.f32 %v1064_v36, %v871_v46 }
 0x11a   :  { %1260 = vmatmul.mubr.bf16.gmra.mrb[68].mxu1 %v6582_v48 }
 0x11b   :  { %1269 = vmatprep.mubr.bf16.mxu1 %v6589_v49 }
 0x11d   :  { %v875_v27 = vpop.f32.mrb[4].mxu1 }
 0x11e   :  { %v6971_v30 = vadd.f32 %v1068_v42, %v875_v27  ;;  %v877_v32 = vpop.f32.mrb[5].mxu1 }
 0x11f   :  { %v6973_v1 = vadd.f32 %v1070_v44, %v877_v32  ;;  %v879_v45 = vpop.f32.mrb[6].mxu1 }
 0x120   :  { %v6975_v36 = vadd.f32 %v1072_v17, %v879_v45  ;;  %v881_v46 = vpop.f32.mrb[7].mxu1 }
 0x121   :  { %v6979_v22 = vadd.f32 %v1074_v18, %v881_v46 }
 0x122   :  { %1270 = vmatmul.mubr.bf16.gmra.mrb[72].mxu1 %v6598_v50  ;;  %v8376_v50 = vld [vmem:[#allocation9_spill] sm:$0xff] }
 0x123   :  { %1279 = vmatprep.mubr.bf16.mxu1 %v6603_v51 }
 0x125   :  { %v885_v42 = vpop.f32.mrb[8].mxu1 }
 0x126   :  { %v6985_v27 = vadd.f32 %v1078_v25, %v885_v42  ;;  %v887_v44 = vpop.f32.mrb[9].mxu1 }
 0x127   :  { %v6987_v32 = vadd.f32 %v1080_v26, %v887_v44  ;;  %v889_v17 = vpop.f32.mrb[10].mxu1 }
 0x128   :  { %v6989_v45 = vadd.f32 %v1082_v31, %v889_v17  ;;  %v891_v20 = vpop.f32.mrb[11].mxu1 }
 0x129   :  { %v6993_v46 = vadd.f32 %v1084_v35, %v891_v20 }
 0x12a   :  { %1280 = vmatmul.mubr.bf16.gmra.mrb[76].mxu1 %v6613_v53 }
 0x12b   :  { %1289 = vmatprep.mubr.bf16.mxu1 %v6618_v54 }
 0x12d   :  { %v895_v51 = vpop.f32.mrb[12].mxu1 }
 0x12e   :  { %v6999_v25 = vadd.f32 %v1088_v41, %v895_v51  ;;  %v897_v26 = vpop.f32.mrb[13].mxu1 }
 0x12f   :  { %v7001_v42 = vadd.f32 %v1090_v52, %v897_v26  ;;  %v899_v31 = vpop.f32.mrb[14].mxu1 }
 0x130   :  { %v7003_v44 = vadd.f32 %v1092_v19, %v899_v31  ;;  %v901_v17 = vpop.f32.mrb[15].mxu1 }
 0x131   :  { %v7008_v53 = vadd.f32 %v6937_v37, %v901_v17 }
 0x132   :  { %1290 = vmatmul.mubr.bf16.gmra.mrb[80].mxu1 %v6625_v55 }
 0x133   :  { %1299 = vmatprep.mubr.bf16.mxu1 %v6630_v56  ;;  %v8371_v56 = vld [vmem:[#allocation8_spill] sm:$0xff] }
 0x135   :  { %v905_v41 = vpop.f32.mrb[16].mxu1 }
 0x136   :  { %v7015_v52 = vadd.f32 %v6945_v40, %v905_v41  ;;  %v907_v19 = vpop.f32.mrb[17].mxu1 }
 0x137   :  { %v7018_v20 = vadd.f32 %v6948_v38, %v907_v19  ;;  %v909_v51 = vpop.f32.mrb[18].mxu1 }
 0x138   :  { %v7021_v26 = vadd.f32 %v6951_v21, %v909_v51  ;;  %v911_v37 = vpop.f32.mrb[19].mxu1 }
 0x139   :  { %v7026_v31 = vadd.f32 %v6953_v34, %v911_v37 }
 0x13a   :  { %1300 = vmatmul.mubr.bf16.gmra.mrb[84].mxu1 %v6637_v57 }
 0x13b   :  { %1309 = vmatprep.mubr.bf16.mxu1 %v6642_v58  ;;  %v6098_v58 = vld [vmem:[%s8290_s4 + $0x78] ss:$8 sps:$4 sm:$0xff]  }
 0x13d   :  { %v915_v40 = vpop.f32.mrb[20].mxu1 }
 0x13e   :  { %v7032_v38 = vadd.f32 %v1108_v33, %v915_v40  ;;  %v917_v17 = vpop.f32.mrb[21].mxu1  ;;  %v8352_v33 = vmov 0  }
 0x13f   :  { %v7034_v21 = vadd.f32 %v1110_v16, %v917_v17  ;;  %v919_v41 = vpop.f32.mrb[22].mxu1  ;;  %v8361_v16 = vld [vmem:[#allocation6_spill] sm:$0xff] }
 0x140   :  { %v7036_v19 = vadd.f32 %v1112_v24, %v919_v41  ;;  %v921_v51 = vpop.f32.mrb[23].mxu1  ;;  %v8354_v24 = vld [vmem:[#allocation3_spill] sm:$0xff] }
 0x141   :  { %v7040_v37 = vadd.f32 %v1114_v29, %v921_v51 }
 0x142   :  { %1310 = vmatmul.mubr.bf16.gmra.mrb[88].mxu1 %v6649_v59  ;;  %v6100_v59 = vld [vmem:[%s8290_s4 + $0x7c] ss:$8 sps:$4 sm:$0xff]  }
 0x143   :  { %1319 = vmatprep.mubr.bf16.mxu1 %v6654_v60  ;;  %v6101_v60 = vld [vmem:[%s8290_s4 + $0x88] ss:$8 sps:$4 sm:$0xff]   ;;  %2076 = vmatprep.subr.bf16.mxu0 %v6100_v59 }
 0x144   :  { %2077 = vmatpush1.bf16.msra.mxu0 %v6098_v58  ;;  %v8355_v59 = vld [vmem:[#allocation4_spill] sm:$0xff]  ;;  %v8356_v58 = vld [vmem:[#allocation5_spill] sm:$0xff] }
 0x14a   :  { %1320 = vmatmul.mubr.bf16.gmra.mrb[92].mxu1 %v6661_v61  ;;  %v6103_v61 = vld [vmem:[%s8290_s4 + $0x8c] ss:$8 sps:$4 sm:$0xff]  }
 0x14b   :  { %1329 = vmatprep.mubr.bf16.mxu1 %v6666_v62  ;;  %2078 = vmatprep.subr.bf16.mxu0 %v6103_v61 }
 0x14c   :  { %2079 = vmatpush1.bf16.msra.mxu0 %v6101_v60 }
 0x152   :  { %1330 = vmatmul.mubr.bf16.gmra.mrb[96].mxu1 %v6673_v63 }
 0x153   :  { %1339 = vmatprep.mubr.bf16.mxu1 %v6678_v0 }
 0x15a   :  { %1340 = vmatmul.mubr.bf16.gmra.mrb[100].mxu1 %v6685_v2 }
 0x15b   :  { %1349 = vmatprep.mubr.bf16.mxu1 %v6690_v3 }
 0x162   :  { %1350 = vmatmul.mubr.bf16.gmra.mrb[104].mxu1 %v6697_v4  ;;  %v8366_v4 = vld [vmem:[#allocation7_spill] sm:$0xff] }
 0x163   :  { %1359 = vmatprep.mubr.bf16.mxu1 %v6702_v5 }
 0x16a   :  { %1360 = vmatmul.mubr.bf16.gmra.mrb[108].mxu1 %v6709_v6 }
 0x16b   :  { %1369 = vmatprep.mubr.bf16.mxu1 %v6714_v7 }
 0x172   :  { %1370 = vmatmul.mubr.bf16.gmra.mrb[112].mxu1 %v6721_v8 }
 0x173   :  { %1379 = vmatprep.mubr.bf16.mxu1 %v6726_v9 }
 0x17a   :  { %1380 = vmatmul.mubr.bf16.gmra.mrb[116].mxu1 %v6733_v10  ;;  %v8353_v10 = vld [vmem:[#allocation2_spill] sm:$0xff] }
 0x17b   :  { %1389 = vmatprep.mubr.bf16.mxu1 %v6738_v11 }
 0x182   :  { %1390 = vmatmul.mubr.bf16.gmra.mrb[120].mxu1 %v6745_v12 }
 0x183   :  { %1399 = vmatprep.mubr.bf16.mxu1 %v6750_v13 }
 0x18a   :  { %1400 = vmatmul.mubr.bf16.gmra.mrb[124].mxu1 %v6757_v14 }
 0x18b   :  { %1442 = vmatprep.mubr.bf16.mxu1 %v8352_v33 }
 0x192   :  { %5065 = vmatmul.mubr.msk.bf16.vlgmr.msra.gmra.mrb[64].mxu1 %vm769_vm1, %v6469_v23 }
 0x193   :  { %1452 = vmatprep.mubr.bf16.mxu1 %v8352_v33 }
 0x195   :  { %v7079_v62 = vpop.f32.mrb[24].mxu1 }
 0x196   :  { %v7081_v63 = vpop.f32.mrb[25].mxu1 }
 0x197   :  { %v7085_v2 = vpop.f32.mrb[26].mxu1 }
 0x198   :  { %v7087_v3 = vpop.f32.mrb[27].mxu1 }
 0x19a   :  { %5066 = vmatmul.mubr.msk.bf16.gmra.mrb[68].mxu1 %vm769_vm1, %v6490_v28 }
 0x19b   :  { %1462 = vmatprep.mubr.bf16.mxu1 %v8352_v33 }
 0x19d   :  { %v7094_v23 = vpop.f32.mrb[28].mxu1 }
 0x19e   :  { %v7096_v5 = vpop.f32.mrb[29].mxu1 }
 0x19f   :  { %v7100_v7 = vpop.f32.mrb[30].mxu1 }
 0x1a0   :  { %v7102_v8 = vpop.f32.mrb[31].mxu1 }
 0x1a2   :  { %5067 = vmatmul.mubr.msk.bf16.gmra.mrb[72].mxu1 %vm769_vm1, %v8353_v10 }
 0x1a3   :  { %1472 = vmatprep.mubr.bf16.mxu1 %v8352_v33 }
 0x1a5   :  { %v7109_v28 = vpop.f32.mrb[32].mxu1 }
 0x1a6   :  { %v7111_v11 = vpop.f32.mrb[33].mxu1 }
 0x1a7   :  { %v7115_v13 = vpop.f32.mrb[34].mxu1 }
 0x1a8   :  { %v7117_v14 = vpop.f32.mrb[35].mxu1 }
 0x1aa   :  { %5068 = vmatmul.mubr.msk.bf16.gmra.mrb[76].mxu1 %vm769_vm1, %v8354_v24 }
 0x1ab   :  { %1482 = vmatprep.mubr.bf16.mxu1 %v8352_v33 }
 0x1ad   :  { %v7124_v29 = vpop.f32.mrb[36].mxu1 }
 0x1ae   :  { %v7126_v40 = vpop.f32.mrb[37].mxu1 }
 0x1af   :  { %v7130_v41 = vpop.f32.mrb[38].mxu1 }
 0x1b0   :  { %v7132_v51 = vpop.f32.mrb[39].mxu1 }
 0x1b2   :  { %5069 = vmatmul.mubr.msk.bf16.gmra.mrb[80].mxu1 %vm769_vm1, %v8355_v59 }
 0x1b3   :  { %1492 = vmatprep.mubr.bf16.mxu1 %v8352_v33 }
 0x1b5   :  { %v7139_v60 = vpop.f32.mrb[40].mxu1 }
 0x1b6   :  { %v7141_v61 = vpop.f32.mrb[41].mxu1 }
 0x1b7   :  { %v7145_v24 = vpop.f32.mrb[42].mxu1 }
 0x1b8   :  { %v7147_v17 = vpop.f32.mrb[43].mxu1 }
 0x1ba   :  { %5070 = vmatmul.mubr.msk.bf16.gmra.mrb[84].mxu1 %vm769_vm1, %v8356_v58 }
 0x1bb   :  { %1502 = vmatprep.mubr.bf16.mxu1 %v8352_v33 }
 0x1bd   :  { %v7154_v59 = vpop.f32.mrb[44].mxu1 }
 0x1be   :  { %8357 = vst [vmem:[#allocation2_spill] sm:$0xff] %v7154_v59  ;;  %v7156_v12 = vpop.f32.mrb[45].mxu1 }
 0x1bf   :  { %8358 = vst [vmem:[#allocation3_spill] sm:$0xff] %v7156_v12  ;;  %v7160_v10 = vpop.f32.mrb[46].mxu1 }
 0x1c0   :  { %8359 = vst [vmem:[#allocation4_spill] sm:$0xff] %v7160_v10  ;;  %v7162_v6 = vpop.f32.mrb[47].mxu1 }
 0x1c1   :  { %8360 = vst [vmem:[#allocation5_spill] sm:$0xff] %v7162_v6 }
 0x1c2   :  { %5071 = vmatmul.mubr.msk.bf16.gmra.mrb[88].mxu1 %vm769_vm1, %v8361_v16 }
 0x1c3   :  { %1512 = vmatprep.mubr.bf16.mxu1 %v8352_v33 }
 0x1c5   :  { %v7169_v58 = vpop.f32.mrb[48].mxu1 }
 0x1c6   :  { %8362 = vst [vmem:[#allocation6_spill] sm:$0xff] %v7169_v58  ;;  %v7171_v0 = vpop.f32.mrb[49].mxu1 }
 0x1c7   :  { %8363 = vst [vmem:[#allocation16_spill] sm:$0xff] %v7171_v0  ;;  %v7175_v9 = vpop.f32.mrb[50].mxu1 }
 0x1c8   :  { %8364 = vst [vmem:[#allocation17_spill] sm:$0xff] %v7175_v9  ;;  %v7177_v34 = vpop.f32.mrb[51].mxu1 }
 0x1c9   :  { %8365 = vst [vmem:[#allocation18_spill] sm:$0xff] %v7177_v34 }
 0x1ca   :  { %5072 = vmatmul.mubr.msk.bf16.gmra.mrb[92].mxu1 %vm769_vm1, %v8366_v4 }
 0x1cb   :  { %1522 = vmatprep.mubr.bf16.mxu1 %v8352_v33 }
 0x1cd   :  { %v7184_v16 = vpop.f32.mrb[52].mxu1 }
 0x1ce   :  { %8367 = vst [vmem:[#allocation7_spill] sm:$0xff] %v7184_v16  ;;  %v7186_v55 = vpop.f32.mrb[53].mxu1 }
 0x1cf   :  { %8368 = vst [vmem:[#allocation19_spill] sm:$0xff] %v7186_v55  ;;  %v7190_v57 = vpop.f32.mrb[54].mxu1  ;;  %v8381_v55 = vld [vmem:[#allocation10_spill] sm:$0xff] }
 0x1d0   :  { %8369 = vst [vmem:[#allocation20_spill] sm:$0xff] %v7190_v57  ;;  %v7192_v35 = vpop.f32.mrb[55].mxu1  ;;  %v6104_v57 = vld [vmem:[%s8290_s4 + $0x98] ss:$8 sps:$4 sm:$0xff]  }
 0x1d1   :  { %8370 = vst [vmem:[#allocation21_spill] sm:$0xff] %v7192_v35 }
 0x1d2   :  { %5073 = vmatmul.mubr.msk.bf16.gmra.mrb[96].mxu1 %vm769_vm1, %v8371_v56 }
 0x1d3   :  { %1532 = vmatprep.mubr.bf16.mxu1 %v8352_v33 }
 0x1d5   :  { %v7199_v4 = vpop.f32.mrb[56].mxu1 }
 0x1d6   :  { %8372 = vst [vmem:[#allocation8_spill] sm:$0xff] %v7199_v4  ;;  %v7201_v18 = vpop.f32.mrb[57].mxu1  ;;  %v6109_v4 = vld [vmem:[%s8290_s4 + $0xac] ss:$8 sps:$4 sm:$0xff]  }
 0x1d7   :  { %8373 = vst [vmem:[#allocation22_spill] sm:$0xff] %v7201_v18  ;;  %v7205_v54 = vpop.f32.mrb[58].mxu1 }
 0x1d8   :  { %8374 = vst [vmem:[#allocation23_spill] sm:$0xff] %v7205_v54  ;;  %v7207_v48 = vpop.f32.mrb[59].mxu1 }
 0x1d9   :  { %8375 = vst [vmem:[#allocation24_spill] sm:$0xff] %v7207_v48 }
 0x1da   :  { %5074 = vmatmul.mubr.msk.bf16.gmra.mrb[100].mxu1 %vm769_vm1, %v8376_v50  ;;  %v6106_v50 = vld [vmem:[%s8290_s4 + $0x9c] ss:$8 sps:$4 sm:$0xff]  }
 0x1db   :  { %1542 = vmatprep.mubr.bf16.mxu1 %v8352_v33  ;;  %2080 = vmatprep.subr.bf16.mxu0 %v6106_v50  ;;  %v6112_v50 = vld [vmem:[%s8290_s4 + $0xbc] ss:$8 sps:$4 sm:$0xff]  }
 0x1dc   :  { %2081 = vmatpush1.bf16.msra.mxu0 %v6104_v57  ;;  %v8383_v57 = vld [vmem:[#allocation12_spill] sm:$0xff] }
 0x1dd   :  { %v7214_v56 = vpop.f32.mrb[60].mxu1  ;;  %2082 = vmatprep.subr.bf16.mxu0 %v6109_v4  ;;  %v6113_v4 = vld [vmem:[%s8290_s4 + $0xc8] ss:$8 sps:$4 sm:$0xff]  }
 0x1de   :  { %8377 = vst [vmem:[#allocation9_spill] sm:$0xff] %v7214_v56  ;;  %v7216_v35 = vpop.f32.mrb[61].mxu1  ;;  %v8385_v56 = vld [vmem:[#allocation14_spill] sm:$0xff] }
 0x1df   :  { %8378 = vst [vmem:[#allocation25_spill] sm:$0xff] %v7216_v35  ;;  %v7220_v49 = vpop.f32.mrb[62].mxu1  ;;  %v8382_v35 = vld [vmem:[#allocation11_spill] sm:$0xff] }
 0x1e0   :  { %8379 = vst [vmem:[#allocation26_spill] sm:$0xff] %v7220_v49  ;;  %v7222_v18 = vpop.f32.mrb[63].mxu1 }
 0x1e1   :  { %8380 = vst [vmem:[#allocation27_spill] sm:$0xff] %v7222_v18  ;;  %v6115_v18 = vld [vmem:[%s8290_s4 + $0xcc] ss:$8 sps:$4 sm:$0xff]  }
 0x1e2   :  { %5075 = vmatmul.mubr.msk.bf16.gmra.mrb[104].mxu1 %vm769_vm1, %v8381_v55  ;;  %v6107_v55 = vld [vmem:[%s8290_s4 + $0xa8] ss:$8 sps:$4 sm:$0xff]  }
 0x1e3   :  { %1552 = vmatprep.mubr.bf16.mxu1 %v8352_v33  ;;  %2083 = vmatpush1.bf16.msra.mxu0 %v6107_v55  ;;  %v6118_v55 = vld [vmem:[%s8290_s4 + $0xdc] ss:$8 sps:$4 sm:$0xff]  }
 0x1e4   :  { %2084 = vmatprep.subr.bf16.mxu0 %v6112_v50  ;;  %v6116_v50 = vld [vmem:[%s8290_s4 + $0xd8] ss:$8 sps:$4 sm:$0xff]  }
 0x1ea   :  { %5076 = vmatmul.mubr.msk.bf16.gmra.mrb[108].mxu1 %vm769_vm1, %v8382_v35  ;;  %v6110_v35 = vld [vmem:[%s8290_s4 + $0xb8] ss:$8 sps:$4 sm:$0xff]  }
 0x1eb   :  { %1562 = vmatprep.mubr.bf16.mxu1 %v8352_v33  ;;  %2085 = vmatpush1.bf16.msra.mxu0 %v6110_v35  ;;  %v5096_v35 = vld [vmem:[%s8290_s4 + $0xe8] sm:$0xff] }
 0x1ec   :  { %2086 = vmatprep.subr.bf16.mxu0 %v6115_v18  ;;  %v5112_v49 = vcombine.high %v5096_v35, %v5096_v35  ;;  %v5111_v18 = vcombine.low %v5096_v35, %v5096_v35 }
 0x1ef   :  { %2087 = vmatpush1.bf16.msra.mxu0 %v6113_v4  ;;  %v2071_v4 = vsel %vm818_vm0, %v5111_v18, 0  ;;  %v7284_v18 = vld [vmem:[%s8291_s3] ss:$0 sm:$0xff] }
 0x1f0   :  { %2088 = vmatprep.subr.bf16.mxu0 %v6118_v55  ;;  %v8386_v55 = vld [vmem:[#allocation15_spill] sm:$0xff] }
 0x1f2   :  { %5077 = vmatmul.mubr.msk.bf16.gmra.mrb[112].mxu1 %vm769_vm1, %v8383_v57  ;;  %v8384_v57 = vld [vmem:[#allocation13_spill] sm:$0xff] }
 0x1f3   :  { %1572 = vmatprep.mubr.bf16.mxu1 %v8352_v33  ;;  %2089 = vmatpush1.bf16.msra.mxu0 %v6116_v50  ;;  %v6123_v50 = vld [vmem:[%s8290_s4 + $0x4] ss:$8 sps:$4 sm:$0xff]  }
 0x1f4   :  { %5113 = vmatprep.subr.msk.bf16.mxu0 %vm818_vm0, %v5112_v49 }
 0x1f7   :  { %2091 = vmatpush1.bf16.msra.mxu0 %v2071_v4  ;;  %v8387_v4 = vmax.f32 %v6957_v15, %v6959_v47  ;;  %v8389_v47 = vmax.f32 %v6971_v30, %v6973_v1 }
 0x1f8   :  { %2381 = vmatprep.subr.bf16.mxu0 %v6123_v50  ;;  %v8388_v50 = vmax.f32 %v6961_v43, %v6965_v39  ;;  %v8390_v39 = vmax.f32 %v6975_v36, %v6979_v22  ;;  %v8391_v22 = vmax.f32 %v6985_v27, %v6987_v32 }
 0x1fa   :  { %5078 = vmatmul.mubr.msk.bf16.gmra.mrb[116].mxu1 %vm769_vm1, %v8384_v57 }
 0x1fb   :  { %1582 = vmatprep.mubr.bf16.mxu1 %v8352_v33 }
 0x202   :  { %5079 = vmatmul.mubr.msk.bf16.gmra.mrb[120].mxu1 %vm769_vm1, %v8385_v56 }
 0x203   :  { %1592 = vmatprep.mubr.bf16.mxu1 %v8352_v33 }
 0x20a   :  { %5080 = vmatmul.mubr.msk.bf16.gmra.mrb[124].mxu1 %vm769_vm1, %v8386_v55 }
 0x265   :  { %v1444_v35 = vpop.f32.mrb[64].mxu1 }
 0x266   :  { %v1446_v57 = vpop.f32.mrb[65].mxu1 }
 0x267   :  { %v1635_v48 = vmax.f32 %v1444_v35, %v1446_v57  ;;  %v1448_v49 = vpop.f32.mrb[66].mxu1 }
 0x268   :  { %v1450_v56 = vpop.f32.mrb[67].mxu1 }
 0x269   :  { %v1667_v54 = vmax.f32 %v8387_v4, %v1635_v48  ;;  %v1636_v55 = vmax.f32 %v1448_v49, %v1450_v56 }
 0x26b   :  { %v1706_v16 = vadd.f32 %v7284_v18, %v1667_v54  ;;  %v1668_v34 = vmax.f32 %v8388_v50, %v1636_v55 }
 0x26d   :  { %v1707_v35 = vadd.f32 %v7284_v18, %v1668_v34  ;;  %v1454_v57 = vpop.f32.mrb[68].mxu1  ;;  %v1738_v0 = vmax.f32 %v1706_v16, 0.0 }
 0x26e   :  { %v1456_v9 = vpop.f32.mrb[69].mxu1 }
 0x26f   :  { %v1739_v58 = vmax.f32 %v1707_v35, 0.0  ;;  %v1637_v6 = vmax.f32 %v1454_v57, %v1456_v9  ;;  %v1458_v10 = vpop.f32.mrb[70].mxu1 }
 0x270   :  { %v1460_v12 = vpop.f32.mrb[71].mxu1 }
 0x271   :  { %v7294_v59 = vpack.c.bf16 %v1739_v58, %v1738_v0  ;;  %v1669_v15 = vmax.f32 %v8389_v47, %v1637_v6  ;;  %v1638_v48 = vmax.f32 %v1458_v10, %v1460_v12  ;;  %v8392_v47 = vmax.f32 %v6989_v45, %v6993_v46  ;;  %v6126_v45 = vld [vmem:[%s8290_s4 + $0x14] ss:$8 sps:$4 sm:$0xff]  }
 0x273   :  { %v1708_v54 = vadd.f32 %v7284_v18, %v1669_v15  ;;  %v1670_v43 = vmax.f32 %v8390_v39, %v1638_v48  ;;  %v1820_v34 = vshrl.u32 %v7294_v59, 16  ;;  %v1822_v16 = vshll.u32 %v7294_v59, 16 }
 0x275   :  { %v1709_v9 = vadd.f32 %v7284_v18, %v1670_v43  ;;  %v1464_v49 = vpop.f32.mrb[72].mxu1  ;;  %v3035_v0 = vrot.slane %v1820_v34, 1  ;;  %v3036_v56 = vrot.slane %v1822_v16, 2  ;;  %v1740_v4 = vmax.f32 %v1708_v54, 0.0 }
 0x276   :  { %v1466_v58 = vpop.f32.mrb[73].mxu1  ;;  %v1824_v35 = vrot.slane %v1822_v16, 1  ;;  %v6121_v16 = vld [vmem:[%s8290_s4] ss:$8 sps:$4 sm:$0xff]  }
 0x277   :  { %v1741_v30 = vmax.f32 %v1709_v9, 0.0  ;;  %v1639_v1 = vmax.f32 %v1464_v49, %v1466_v58  ;;  %v1468_v6 = vpop.f32.mrb[74].mxu1  ;;  %v3037_v10 = vor.u32 %v3036_v56, %v3035_v0 }
 0x278   :  { %v1470_v12 = vpop.f32.mrb[75].mxu1  ;;  %v1825_v9 = vor.u32 %v1824_v35, %v1820_v34  ;;  %v6129_v35 = vld [vmem:[%s8290_s4 + $0x24] ss:$8 sps:$4 sm:$0xff]  }
 0x279   :  { %v7306_v55 = vpack.c.bf16 %v1741_v30, %v1740_v4  ;;  %v1671_v36 = vmax.f32 %v8391_v22, %v1639_v1  ;;  %v1640_v50 = vmax.f32 %v1468_v6, %v1470_v12  ;;  %v8393_v12 = vmax.f32 %v6999_v25, %v7001_v42 }
 0x27a   :  { %v8394_v25 = vmax.f32 %v7003_v44, %v7008_v53  ;;  %v6132_v44 = vld [vmem:[%s8290_s4 + $0x34] ss:$8 sps:$4 sm:$0xff]  }
 0x27b   :  { %v1710_v57 = vadd.f32 %v7284_v18, %v1671_v36  ;;  %v1672_v15 = vmax.f32 %v8392_v47, %v1640_v50  ;;  %v1827_v48 = vshll.u32 %v7306_v55, 16  ;;  %v1831_v54 = vshrl.u32 %v7306_v55, 16  ;;  %v6124_v50 = vld [vmem:[%s8290_s4 + $0x10] ss:$8 sps:$4 sm:$0xff]  }
 0x27d   :  { %v1711_v39 = vadd.f32 %v7284_v18, %v1672_v15  ;;  %v1474_v43 = vpop.f32.mrb[76].mxu1  ;;  %v1829_v27 = vrot.slane %v1827_v48, 1  ;;  %v3038_v32 = vrot.slane %v1831_v54, 1  ;;  %v3039_v46 = vrot.slane %v1827_v48, 2 }
 0x27e   :  { %v1476_v49 = vpop.f32.mrb[77].mxu1  ;;  %v1742_v0 = vmax.f32 %v1710_v57, 0.0 }
 0x27f   :  { %v1743_v58 = vmax.f32 %v1711_v39, 0.0  ;;  %v1641_v56 = vmax.f32 %v1474_v43, %v1476_v49  ;;  %v1478_v4 = vpop.f32.mrb[78].mxu1  ;;  %v1830_v30 = vsel %vm1818_vm2, %v1825_v9, %v1829_v27  ;;  %v3040_v1 = vor.u32 %v3039_v46, %v3038_v32 }
 0x280   :  { %v1480_v34 = vpop.f32.mrb[79].mxu1  ;;  %5114 = vmatmul.mubr.msk.bf16.vlgmr.msra.gmra.mrb[24].mxu0 %vm2021_vm3, %v1830_v30  ;;  %v1833_v9 = vor.u32 %v1831_v54, %v1829_v27  ;;  %v8395_v30 = vmax.f32 %v7015_v52, %v7018_v20  ;;  %v8396_v52 = vmax.f32 %v7021_v26, %v7026_v31  ;;  %v6138_v26 = vld [vmem:[%s8290_s4 + $0x54] ss:$8 sps:$4 sm:$0xff]  }
 0x281   :  { %v7326_v6 = vpack.c.bf16 %v1743_v58, %v1742_v0  ;;  %v1673_v22 = vmax.f32 %v8393_v12, %v1641_v56  ;;  %v1642_v36 = vmax.f32 %v1478_v4, %v1480_v34  ;;  %2118 = vmatprep.mubr.bf16.mxu0 %v8352_v33  ;;  %2382 = vmatpush1.bf16.msra.mxu0 %v6121_v16 }
 0x282   :  { %2383 = vmatprep.subr.bf16.mxu0 %v6126_v45  ;;  %v7339_v57 = vsel %vm3034_vm4, %v3037_v10, %v3040_v1  ;;  %v6127_v10 = vld [vmem:[%s8290_s4 + $0x20] ss:$8 sps:$4 sm:$0xff]  }
 0x283   :  { %v1712_v47 = vadd.f32 %v7284_v18, %v1673_v22  ;;  %v1674_v42 = vmax.f32 %v8394_v25, %v1642_v36  ;;  %v1835_v15 = vshll.u32 %v7326_v6, 16  ;;  %v1839_v48 = vshrl.u32 %v7326_v6, 16  ;;  %v6130_v22 = vld [vmem:[%s8290_s4 + $0x30] ss:$8 sps:$4 sm:$0xff]   ;;  %v6135_v36 = vld [vmem:[%s8290_s4 + $0x44] ss:$8 sps:$4 sm:$0xff]  }
 0x285   :  { %v1713_v39 = vadd.f32 %v7284_v18, %v1674_v42  ;;  %v1484_v43 = vpop.f32.mrb[80].mxu1  ;;  %v1837_v32 = vrot.slane %v1835_v15, 1  ;;  %2384 = vmatpush1.bf16.msra.mxu0 %v6124_v50  ;;  %v3042_v16 = vrot.slane %v1839_v48, 1  ;;  %v3043_v53 = vrot.slane %v1835_v15, 2 }
 0x286   :  { %v1486_v49 = vpop.f32.mrb[81].mxu1  ;;  %2385 = vmatprep.subr.bf16.mxu0 %v6129_v35  ;;  %v1744_v45 = vmax.f32 %v1712_v47, 0.0 }
 0x287   :  { %v1745_v46 = vmax.f32 %v1713_v39, 0.0  ;;  %v1643_v0 = vmax.f32 %v1484_v43, %v1486_v49  ;;  %v1488_v58 = vpop.f32.mrb[82].mxu1  ;;  %v1838_v54 = vsel %vm1818_vm2, %v1833_v9, %v1837_v32  ;;  %v3044_v56 = vor.u32 %v3043_v53, %v3042_v16 }
 0x288   :  { %v1490_v27 = vpop.f32.mrb[83].mxu1  ;;  %5115 = vmatmul.mubr.msk.bf16.gmra.mrb[28].mxu0 %vm2021_vm3, %v1838_v54  ;;  %v1841_v39 = vor.u32 %v1839_v48, %v1837_v32 }
 0x289   :  { %v7356_v4 = vpack.c.bf16 %v1745_v46, %v1744_v45  ;;  %v1675_v34 = vmax.f32 %v8395_v30, %v1643_v0  ;;  %v1644_v12 = vmax.f32 %v1488_v58, %v1490_v27  ;;  %2128 = vmatprep.mubr.bf16.mxu0 %v8352_v33  ;;  %2386 = vmatpush1.bf16.msra.mxu0 %v6127_v10  ;;  %v6136_v27 = vld [vmem:[%s8290_s4 + $0x50] ss:$8 sps:$4 sm:$0xff]   ;;  %v6141_v30 = vld [vmem:[%s8290_s4 + $0x64] ss:$8 sps:$4 sm:$0xff]  }
 0x28a   :  { %2387 = vmatprep.subr.bf16.mxu0 %v6132_v44  ;;  %v7369_v50 = vsel %vm3034_vm4, %v3040_v1, %v3044_v56  ;;  %v6133_v1 = vld [vmem:[%s8290_s4 + $0x40] ss:$8 sps:$4 sm:$0xff]   ;;  %v8397_v0 = vmax.f32 %v7032_v38, %v7034_v21  ;;  %v8398_v38 = vmax.f32 %v7036_v19, %v7040_v37 }
 0x28b   :  { %v1714_v35 = vadd.f32 %v7284_v18, %v1675_v34  ;;  %v1676_v20 = vmax.f32 %v8396_v52, %v1644_v12  ;;  %v1843_v47 = vshll.u32 %v7356_v4, 16  ;;  %v1847_v25 = vshrl.u32 %v7356_v4, 16 }
 0x28d   :  { %v1715_v42 = vadd.f32 %v7284_v18, %v1676_v20  ;;  %v1494_v15 = vpop.f32.mrb[84].mxu1  ;;  %v1845_v43 = vrot.slane %v1843_v47, 1  ;;  %2388 = vmatpush1.bf16.msra.mxu0 %v6130_v22  ;;  %v3046_v9 = vrot.slane %v1847_v25, 1  ;;  %v3047_v31 = vrot.slane %v1843_v47, 2 }
 0x28e   :  { %v1496_v10 = vpop.f32.mrb[85].mxu1  ;;  %2389 = vmatprep.subr.bf16.mxu0 %v6135_v36  ;;  %v1746_v16 = vmax.f32 %v1714_v35, 0.0  ;;  %v1800_v35 = vld [vmem:[%s8290_s4 + $0x70] sm:$0xff] }
 0x28f   :  { %v1747_v49 = vmax.f32 %v1715_v42, 0.0  ;;  %v1645_v44 = vmax.f32 %v1494_v15, %v1496_v10  ;;  %v1498_v53 = vpop.f32.mrb[86].mxu1  ;;  %v1846_v48 = vsel %vm1818_vm2, %v1841_v39, %v1845_v43  ;;  %v3048_v45 = vor.u32 %v3047_v31, %v3046_v9  ;;  %v6139_v42 = vld [vmem:[%s8290_s4 + $0x60] ss:$8 sps:$4 sm:$0xff]  }
 0x290   :  { %v1500_v32 = vpop.f32.mrb[87].mxu1  ;;  %5116 = vmatmul.mubr.msk.bf16.gmra.mrb[32].mxu0 %vm2021_vm3, %v1846_v48  ;;  %v1849_v47 = vor.u32 %v1847_v25, %v1845_v43  ;;  %v5145_v15 = vcombine.high %v1800_v35, %v1800_v35  ;;  %v5144_v39 = vcombine.low %v1800_v35, %v1800_v35 }
 0x291   :  { %v7386_v46 = vpack.c.bf16 %v1747_v49, %v1746_v16  ;;  %v1677_v58 = vmax.f32 %v8397_v0, %v1645_v44  ;;  %v1646_v54 = vmax.f32 %v1498_v53, %v1500_v32  ;;  %2138 = vmatprep.mubr.bf16.mxu0 %v8352_v33  ;;  %2390 = vmatpush1.bf16.msra.mxu0 %v6133_v1 }
 0x292   :  { %2391 = vmatprep.subr.bf16.mxu0 %v6138_v26  ;;  %v7399_v34 = vsel %vm3034_vm4, %v3044_v56, %v3048_v45  ;;  %v8399_v44 = vmax.f32 %v7079_v62, %v7081_v63  ;;  %v2376_v32 = vsel %vm818_vm0, %v5144_v39, 0 }
 0x293   :  { %v1716_v12 = vadd.f32 %v7284_v18, %v1677_v58  ;;  %v1678_v21 = vmax.f32 %v8398_v38, %v1646_v54  ;;  %v1851_v22 = vshll.u32 %v7386_v46, 16  ;;  %v1855_v36 = vshrl.u32 %v7386_v46, 16 }
 0x294   :  { %v8400_v54 = vmax.f32 %v7085_v2, %v7087_v3 }
 0x295   :  { %v1717_v52 = vadd.f32 %v7284_v18, %v1678_v21  ;;  %v1504_v20 = vpop.f32.mrb[88].mxu1  ;;  %v1853_v56 = vrot.slane %v1851_v22, 1  ;;  %2392 = vmatpush1.bf16.msra.mxu0 %v6136_v27  ;;  %v3050_v19 = vrot.slane %v1855_v36, 1  ;;  %v3051_v1 = vrot.slane %v1851_v22, 2 }
 0x296   :  { %v1506_v37 = vpop.f32.mrb[89].mxu1  ;;  %2393 = vmatprep.subr.bf16.mxu0 %v6141_v30  ;;  %v1748_v9 = vmax.f32 %v1716_v12, 0.0 }
 0x297   :  { %v1749_v10 = vmax.f32 %v1717_v52, 0.0  ;;  %v1647_v26 = vmax.f32 %v1504_v20, %v1506_v37  ;;  %v1508_v31 = vpop.f32.mrb[90].mxu1  ;;  %v1854_v16 = vsel %vm1818_vm2, %v1849_v47, %v1853_v56  ;;  %v3052_v25 = vor.u32 %v3051_v1, %v3050_v19 }
 0x298   :  { %v1510_v49 = vpop.f32.mrb[91].mxu1  ;;  %5117 = vmatmul.mubr.msk.bf16.gmra.mrb[36].mxu0 %vm2021_vm3, %v1854_v16  ;;  %v1857_v38 = vor.u32 %v1855_v36, %v1853_v56  ;;  %v8401_v36 = vmax.f32 %v7094_v23, %v7096_v5 }
 0x299   :  { %v7416_v43 = vpack.c.bf16 %v1749_v10, %v1748_v9  ;;  %v1679_v53 = vmax.f32 %v8399_v44, %v1647_v26  ;;  %v1648_v48 = vmax.f32 %v1508_v31, %v1510_v49  ;;  %2148 = vmatprep.mubr.bf16.mxu0 %v8352_v33  ;;  %2394 = vmatpush1.bf16.msra.mxu0 %v6139_v42 }
 0x29a   :  { %5146 = vmatprep.subr.msk.bf16.mxu0 %vm818_vm0, %v5145_v15  ;;  %v7425_v0 = vsel %vm3034_vm4, %v3048_v45, %v3052_v25  ;;  %v8402_v9 = vmax.f32 %v7100_v7, %v7102_v8 }
 0x29b   :  { %v1718_v58 = vadd.f32 %v7284_v18, %v1679_v53  ;;  %v1680_v27 = vmax.f32 %v8400_v54, %v1648_v48  ;;  %v1859_v62 = vshll.u32 %v7416_v43, 16  ;;  %v1863_v63 = vshrl.u32 %v7416_v43, 16 }
 0x29d   :  { %v1719_v30 = vadd.f32 %v7284_v18, %v1680_v27  ;;  %v1514_v12 = vpop.f32.mrb[92].mxu1  ;;  %v1861_v21 = vrot.slane %v1859_v62, 1  ;;  %2396 = vmatpush1.bf16.msra.mxu0 %v2376_v32  ;;  %v3054_v22 = vrot.slane %v1863_v63, 1  ;;  %v3055_v45 = vrot.slane %v1859_v62, 2 }
 0x29e   :  { %v1516_v35 = vpop.f32.mrb[93].mxu1  ;;  %v1750_v52 = vmax.f32 %v1718_v58, 0.0 }
 0x29f   :  { %v1751_v20 = vmax.f32 %v1719_v30, 0.0  ;;  %v1649_v47 = vmax.f32 %v1514_v12, %v1516_v35  ;;  %v1518_v42 = vpop.f32.mrb[94].mxu1  ;;  %v1862_v2 = vsel %vm1818_vm2, %v1857_v38, %v1861_v21  ;;  %v3056_v19 = vor.u32 %v3055_v45, %v3054_v22 }
 0x2a0   :  { %v1520_v3 = vpop.f32.mrb[95].mxu1  ;;  %5118 = vmatmul.mubr.msk.bf16.gmra.mrb[40].mxu0 %vm2021_vm3, %v1862_v2  ;;  %v1865_v5 = vor.u32 %v1863_v63, %v1861_v21  ;;  %v8403_v30 = vmax.f32 %v7109_v28, %v7111_v11  ;;  %v8404_v22 = vmax.f32 %v7115_v13, %v7117_v14 }
 0x2a1   :  { %v7436_v37 = vpack.c.bf16 %v1751_v20, %v1750_v52  ;;  %v1681_v56 = vmax.f32 %v8401_v36, %v1649_v47  ;;  %v1650_v15 = vmax.f32 %v1518_v42, %v1520_v3  ;;  %2158 = vmatprep.mubr.bf16.mxu0 %v8352_v33  ;;  %v7443_v39 = vsel %vm3034_vm4, %v3052_v25, %v3056_v19 }
 0x2a3   :  { %v1720_v1 = vadd.f32 %v7284_v18, %v1681_v56  ;;  %v1682_v10 = vmax.f32 %v8402_v9, %v1650_v15  ;;  %v1867_v26 = vshll.u32 %v7436_v37, 16  ;;  %v1871_v31 = vshrl.u32 %v7436_v37, 16 }
 0x2a5   :  { %v1721_v16 = vadd.f32 %v7284_v18, %v1682_v10  ;;  %v1524_v23 = vpop.f32.mrb[96].mxu1  ;;  %v1869_v49 = vrot.slane %v1867_v26, 1  ;;  %v3058_v44 = vrot.slane %v1871_v31, 1  ;;  %v3059_v48 = vrot.slane %v1867_v26, 2 }
 0x2a6   :  { %v1526_v53 = vpop.f32.mrb[97].mxu1  ;;  %v1752_v25 = vmax.f32 %v1720_v1, 0.0  ;;  %v8405_v10 = vmax.f32 %v7124_v29, %v7126_v40 }
 0x2a7   :  { %v1753_v32 = vmax.f32 %v1721_v16, 0.0  ;;  %v1651_v58 = vmax.f32 %v1524_v23, %v1526_v53  ;;  %v1528_v54 = vpop.f32.mrb[98].mxu1  ;;  %v1870_v27 = vsel %vm1818_vm2, %v1865_v5, %v1869_v49  ;;  %v3060_v8 = vor.u32 %v3059_v48, %v3058_v44 }
 0x2a8   :  { %v1530_v7 = vpop.f32.mrb[99].mxu1  ;;  %5119 = vmatmul.mubr.msk.bf16.gmra.mrb[44].mxu0 %vm2021_vm3, %v1870_v27  ;;  %v1873_v11 = vor.u32 %v1871_v31, %v1869_v49  ;;  %v8406_v5 = vmax.f32 %v7130_v41, %v7132_v51 }
 0x2a9   :  { %v7454_v62 = vpack.c.bf16 %v1753_v32, %v1752_v25  ;;  %v1683_v63 = vmax.f32 %v8403_v30, %v1651_v58  ;;  %v1652_v12 = vmax.f32 %v1528_v54, %v1530_v7  ;;  %2168 = vmatprep.mubr.bf16.mxu0 %v8352_v33  ;;  %v7461_v38 = vsel %vm3034_vm4, %v3056_v19, %v3060_v8 }
 0x2ab   :  { %v1722_v21 = vadd.f32 %v7284_v18, %v1683_v63  ;;  %v1684_v35 = vmax.f32 %v8404_v22, %v1652_v12  ;;  %v1875_v45 = vshll.u32 %v7454_v62, 16  ;;  %v1879_v52 = vshrl.u32 %v7454_v62, 16 }
 0x2ad   :  { %v1723_v20 = vadd.f32 %v7284_v18, %v1684_v35  ;;  %v1534_v28 = vpop.f32.mrb[100].mxu1  ;;  %v1877_v47 = vrot.slane %v1875_v45, 1  ;;  %v3062_v42 = vrot.slane %v1879_v52, 1  ;;  %v3063_v3 = vrot.slane %v1875_v45, 2 }
 0x2ae   :  { %v1536_v2 = vpop.f32.mrb[101].mxu1  ;;  %v1754_v19 = vmax.f32 %v1722_v21, 0.0  ;;  %v8407_v21 = vmax.f32 %v7139_v60, %v7141_v61 }
 0x2af   :  { %v1755_v36 = vmax.f32 %v1723_v20, 0.0  ;;  %v1653_v56 = vmax.f32 %v1534_v28, %v1536_v2  ;;  %v1538_v15 = vpop.f32.mrb[102].mxu1  ;;  %v1878_v1 = vsel %vm1818_vm2, %v1873_v11, %v1877_v47  ;;  %v3064_v14 = vor.u32 %v3063_v3, %v3062_v42 }
 0x2b0   :  { %v1540_v13 = vpop.f32.mrb[103].mxu1  ;;  %5120 = vmatmul.mubr.msk.bf16.gmra.mrb[48].mxu0 %vm2021_vm3, %v1878_v1  ;;  %v1881_v40 = vor.u32 %v1879_v52, %v1877_v47  ;;  %v8408_v20 = vmax.f32 %v7145_v24, %v7147_v17  ;;  %v6146_v24 = vld [vmem:[%s8290_s4 + $0xf4] ss:$8 sps:$4 sm:$0xff]  }
 0x2b1   :  { %v7472_v9 = vpack.c.bf16 %v1755_v36, %v1754_v19  ;;  %v1685_v26 = vmax.f32 %v8405_v10, %v1653_v56  ;;  %v1654_v31 = vmax.f32 %v1538_v15, %v1540_v13  ;;  %2178 = vmatprep.mubr.bf16.mxu0 %v8352_v33  ;;  %v7479_v16 = vsel %vm3034_vm4, %v3060_v8, %v3064_v14 }
 0x2b2   :  { %2765 = vmatprep.subr.bf16.mxu0 %v6146_v24 }
 0x2b3   :  { %v1724_v23 = vadd.f32 %v7284_v18, %v1685_v26  ;;  %v1686_v49 = vmax.f32 %v8406_v5, %v1654_v31  ;;  %v1883_v44 = vshll.u32 %v7472_v9, 16  ;;  %v1887_v53 = vshrl.u32 %v7472_v9, 16  ;;  %v8409_v31 = vld [vmem:[#allocation2_spill] sm:$0xff] }
 0x2b5   :  { %v1725_v48 = vadd.f32 %v7284_v18, %v1686_v49  ;;  %v1544_v29 = vpop.f32.mrb[104].mxu1  ;;  %v1885_v25 = vrot.slane %v1883_v44, 1  ;;  %v3066_v32 = vrot.slane %v1887_v53, 1  ;;  %v3067_v54 = vrot.slane %v1883_v44, 2 }
 0x2b6   :  { %v1546_v58 = vpop.f32.mrb[105].mxu1  ;;  %v1756_v27 = vmax.f32 %v1724_v23, 0.0  ;;  %v8410_v23 = vld [vmem:[#allocation3_spill] sm:$0xff] }
 0x2b7   :  { %v1757_v7 = vmax.f32 %v1725_v48, 0.0  ;;  %v1655_v8 = vmax.f32 %v1544_v29, %v1546_v58  ;;  %v1548_v30 = vpop.f32.mrb[106].mxu1  ;;  %v1886_v63 = vsel %vm1818_vm2, %v1881_v40, %v1885_v25  ;;  %v3068_v51 = vor.u32 %v3067_v54, %v3066_v32  ;;  %v8412_v29 = vld [vmem:[#allocation4_spill] sm:$0xff]  ;;  %v8413_v40 = vld [vmem:[#allocation5_spill] sm:$0xff] }
 0x2b8   :  { %v1550_v41 = vpop.f32.mrb[107].mxu1  ;;  %5121 = vmatmul.mubr.msk.bf16.gmra.mrb[52].mxu0 %vm2021_vm3, %v1886_v63  ;;  %v1889_v61 = vor.u32 %v1887_v53, %v1885_v25  ;;  %v8411_v5 = vmax.f32 %v8409_v31, %v8410_v23  ;;  %v8414_v25 = vmax.f32 %v8412_v29, %v8413_v40 }
 0x2b9   :  { %v7490_v12 = vpack.c.bf16 %v1757_v7, %v1756_v27  ;;  %v1687_v22 = vmax.f32 %v8407_v21, %v1655_v8  ;;  %v1656_v35 = vmax.f32 %v1548_v30, %v1550_v41  ;;  %2188 = vmatprep.mubr.bf16.mxu0 %v8352_v33  ;;  %v7497_v45 = vsel %vm3034_vm4, %v3064_v14, %v3068_v51 }
 0x2bb   :  { %v1726_v52 = vadd.f32 %v7284_v18, %v1687_v22  ;;  %v1688_v28 = vmax.f32 %v8408_v20, %v1656_v35  ;;  %v1891_v11 = vshll.u32 %v7490_v12, 16  ;;  %v1895_v47 = vshrl.u32 %v7490_v12, 16 }
 0x2bd   :  { %v1727_v42 = vadd.f32 %v7284_v18, %v1688_v28  ;;  %v1554_v60 = vpop.f32.mrb[108].mxu1  ;;  %v1893_v2 = vrot.slane %v1891_v11, 1  ;;  %v3070_v3 = vrot.slane %v1895_v47, 1  ;;  %v3071_v36 = vrot.slane %v1891_v11, 2 }
 0x2be   :  { %v1556_v19 = vpop.f32.mrb[109].mxu1  ;;  %v1758_v56 = vmax.f32 %v1726_v52, 0.0 }
 0x2bf   :  { %v1759_v15 = vmax.f32 %v1727_v42, 0.0  ;;  %v1657_v1 = vmax.f32 %v1554_v60, %v1556_v19  ;;  %v1558_v13 = vpop.f32.mrb[110].mxu1  ;;  %v1894_v14 = vsel %vm1818_vm2, %v1889_v61, %v1893_v2  ;;  %v3072_v10 = vor.u32 %v3071_v36, %v3070_v3  ;;  %v8415_v60 = vld [vmem:[#allocation6_spill] sm:$0xff]  ;;  %v8416_v61 = vld [vmem:[#allocation16_spill] sm:$0xff] }
 0x2c0   :  { %v1560_v17 = vpop.f32.mrb[111].mxu1  ;;  %5122 = vmatmul.mubr.msk.bf16.gmra.mrb[56].mxu0 %vm2021_vm3, %v1894_v14  ;;  %v1897_v8 = vor.u32 %v1895_v47, %v1893_v2  ;;  %v8417_v3 = vmax.f32 %v8415_v60, %v8416_v61 }
 0x2c1   :  { %v7511_v26 = vpack.c.bf16 %v1759_v15, %v1758_v56  ;;  %v1689_v49 = vmax.f32 %v8411_v5, %v1657_v1  ;;  %v1658_v44 = vmax.f32 %v1558_v13, %v1560_v17  ;;  %2198 = vmatprep.mubr.bf16.mxu0 %v8352_v33  ;;  %v7518_v53 = vsel %vm3034_vm4, %v3068_v51, %v3072_v10  ;;  %v8418_v56 = vld [vmem:[#allocation17_spill] sm:$0xff]  ;;  %v8419_v15 = vld [vmem:[#allocation18_spill] sm:$0xff] }
 0x2c2   :  { %v8420_v1 = vmax.f32 %v8418_v56, %v8419_v15 }
 0x2c3   :  { %v1728_v48 = vadd.f32 %v7284_v18, %v1689_v49  ;;  %v1690_v32 = vmax.f32 %v8414_v25, %v1658_v44  ;;  %v1899_v58 = vshll.u32 %v7511_v26, 16  ;;  %v1903_v54 = vshrl.u32 %v7511_v26, 16 }
 0x2c5   :  { %v1729_v27 = vadd.f32 %v7284_v18, %v1690_v32  ;;  %v1564_v7 = vpop.f32.mrb[112].mxu1  ;;  %v1901_v30 = vrot.slane %v1899_v58, 1  ;;  %v3074_v63 = vrot.slane %v1903_v54, 1  ;;  %v3075_v21 = vrot.slane %v1899_v58, 2 }
 0x2c6   :  { %v1566_v41 = vpop.f32.mrb[113].mxu1  ;;  %v1760_v51 = vmax.f32 %v1728_v48, 0.0 }
 0x2c7   :  { %v1761_v22 = vmax.f32 %v1729_v27, 0.0  ;;  %v1659_v35 = vmax.f32 %v1564_v7, %v1566_v41  ;;  %v1568_v52 = vpop.f32.mrb[114].mxu1  ;;  %v1902_v20 = vsel %vm1818_vm2, %v1897_v8, %v1901_v30  ;;  %v3076_v11 = vor.u32 %v3075_v21, %v3074_v63  ;;  %v8421_v8 = vld [vmem:[#allocation7_spill] sm:$0xff] }
 0x2c8   :  { %v1570_v28 = vpop.f32.mrb[115].mxu1  ;;  %5123 = vmatmul.mubr.msk.bf16.gmra.mrb[60].mxu0 %vm2021_vm3, %v1902_v20  ;;  %v1905_v23 = vor.u32 %v1903_v54, %v1901_v30  ;;  %v8422_v63 = vld [vmem:[#allocation19_spill] sm:$0xff] }
 0x2c9   :  { %v7529_v42 = vpack.c.bf16 %v1761_v22, %v1760_v51  ;;  %v1691_v47 = vmax.f32 %v8417_v3, %v1659_v35  ;;  %v1660_v2 = vmax.f32 %v1568_v52, %v1570_v28  ;;  %2208 = vmatprep.mubr.bf16.mxu0 %v8352_v33  ;;  %v7536_v19 = vsel %vm3034_vm4, %v3072_v10, %v3076_v11  ;;  %v8424_v22 = vld [vmem:[#allocation20_spill] sm:$0xff]  ;;  %v8425_v35 = vld [vmem:[#allocation21_spill] sm:$0xff] }
 0x2ca   :  { %v8423_v41 = vmax.f32 %v8421_v8, %v8422_v63  ;;  %v8426_v52 = vmax.f32 %v8424_v22, %v8425_v35 }
 0x2cb   :  { %v1730_v36 = vadd.f32 %v7284_v18, %v1691_v47  ;;  %v1692_v13 = vmax.f32 %v8420_v1, %v1660_v2  ;;  %v1907_v14 = vshll.u32 %v7529_v42, 16  ;;  %v1911_v17 = vshrl.u32 %v7529_v42, 16 }
 0x2cd   :  { %v1731_v24 = vadd.f32 %v7284_v18, %v1692_v13  ;;  %v1574_v31 = vpop.f32.mrb[116].mxu1  ;;  %v1909_v5 = vrot.slane %v1907_v14, 1  ;;  %v3078_v49 = vrot.slane %v1911_v17, 1  ;;  %v3079_v48 = vrot.slane %v1907_v14, 2 }
 0x2ce   :  { %v1576_v44 = vpop.f32.mrb[117].mxu1  ;;  %v1762_v10 = vmax.f32 %v1730_v36, 0.0 }
 0x2cf   :  { %v1763_v29 = vmax.f32 %v1731_v24, 0.0  ;;  %v1661_v40 = vmax.f32 %v1574_v31, %v1576_v44  ;;  %v1578_v25 = vpop.f32.mrb[118].mxu1  ;;  %v1910_v32 = vsel %vm1818_vm2, %v1905_v23, %v1909_v5  ;;  %v3080_v27 = vor.u32 %v3079_v48, %v3078_v49  ;;  %v8427_v44 = vld [vmem:[#allocation8_spill] sm:$0xff]  ;;  %v8428_v48 = vld [vmem:[#allocation22_spill] sm:$0xff] }
 0x2d0   :  { %v1580_v58 = vpop.f32.mrb[119].mxu1  ;;  %5124 = vmatmul.mubr.msk.bf16.gmra.mrb[64].mxu0 %vm2021_vm3, %v1910_v32  ;;  %v1913_v47 = vor.u32 %v1911_v17, %v1909_v5  ;;  %v8431_v32 = vld [vmem:[#allocation24_spill] sm:$0xff] }
 0x2d1   :  { %v7547_v7 = vpack.c.bf16 %v1763_v29, %v1762_v10  ;;  %v1693_v54 = vmax.f32 %v8423_v41, %v1661_v40  ;;  %v1662_v30 = vmax.f32 %v1578_v25, %v1580_v58  ;;  %2218 = vmatprep.mubr.bf16.mxu0 %v8352_v33  ;;  %v7554_v21 = vsel %vm3034_vm4, %v3076_v11, %v3080_v27  ;;  %v8430_v25 = vld [vmem:[#allocation23_spill] sm:$0xff] }
 0x2d2   :  { %v8429_v10 = vmax.f32 %v8427_v44, %v8428_v48  ;;  %v8432_v58 = vmax.f32 %v8430_v25, %v8431_v32  ;;  %v8437_v44 = vld [vmem:[#allocation27_spill] sm:$0xff] }
 0x2d3   :  { %v1732_v51 = vadd.f32 %v7284_v18, %v1693_v54  ;;  %v1694_v20 = vmax.f32 %v8426_v52, %v1662_v30  ;;  %v1915_v28 = vshll.u32 %v7547_v7, 16  ;;  %v1919_v60 = vshrl.u32 %v7547_v7, 16 }
 0x2d5   :  { %v1733_v61 = vadd.f32 %v7284_v18, %v1694_v20  ;;  %v1584_v3 = vpop.f32.mrb[120].mxu1  ;;  %v1917_v2 = vrot.slane %v1915_v28, 1  ;;  %v3082_v36 = vrot.slane %v1919_v60, 1  ;;  %v3083_v15 = vrot.slane %v1915_v28, 2 }
 0x2d6   :  { %v1586_v56 = vpop.f32.mrb[121].mxu1  ;;  %v1764_v11 = vmax.f32 %v1732_v51, 0.0 }
 0x2d7   :  { %v1765_v1 = vmax.f32 %v1733_v61, 0.0  ;;  %v1663_v13 = vmax.f32 %v1584_v3, %v1586_v56  ;;  %v1588_v14 = vpop.f32.mrb[122].mxu1  ;;  %v1918_v24 = vsel %vm1818_vm2, %v1913_v47, %v1917_v2  ;;  %v3084_v23 = vor.u32 %v3083_v15, %v3082_v36 }
 0x2d8   :  { %v1590_v31 = vpop.f32.mrb[123].mxu1  ;;  %5125 = vmatmul.mubr.msk.bf16.gmra.mrb[68].mxu0 %vm2021_vm3, %v1918_v24  ;;  %v1921_v51 = vor.u32 %v1919_v60, %v1917_v2 }
 0x2d9   :  { %v7565_v49 = vpack.c.bf16 %v1765_v1, %v1764_v11  ;;  %v1695_v17 = vmax.f32 %v8429_v10, %v1663_v13  ;;  %v1664_v5 = vmax.f32 %v1588_v14, %v1590_v31  ;;  %2228 = vmatprep.mubr.bf16.mxu0 %v8352_v33  ;;  %v7572_v29 = vsel %vm3034_vm4, %v3080_v27, %v3084_v23  ;;  %v8433_v11 = vld [vmem:[#allocation9_spill] sm:$0xff]  ;;  %v8436_v31 = vld [vmem:[#allocation26_spill] sm:$0xff] }
 0x2da   :  { %v8434_v1 = vld [vmem:[#allocation25_spill] sm:$0xff]  ;;  %v8438_v48 = vmax.f32 %v8436_v31, %v8437_v44  ;;  %v6161_v44 = vld [vmem:[%s8290_s4 + $0x144] ss:$8 sps:$4 sm:$0xff]  }
 0x2db   :  { %v1734_v40 = vadd.f32 %v7284_v18, %v1695_v17  ;;  %v1696_v8 = vmax.f32 %v8432_v58, %v1664_v5  ;;  %v1923_v63 = vshll.u32 %v7565_v49, 16  ;;  %v1927_v41 = vshrl.u32 %v7565_v49, 16  ;;  %v6156_v31 = vld [vmem:[%s8290_s4 + $0x130] ss:$8 sps:$4 sm:$0xff]  }
 0x2dc   :  { %v8435_v13 = vmax.f32 %v8433_v11, %v8434_v1  ;;  %v6147_v11 = vld [vmem:[%s8290_s4 + $0x100] ss:$8 sps:$4 sm:$0xff]   ;;  %v6152_v1 = vld [vmem:[%s8290_s4 + $0x114] ss:$8 sps:$4 sm:$0xff]  }
 0x2dd   :  { %v1735_v54 = vadd.f32 %v7284_v18, %v1696_v8  ;;  %v1594_v30 = vpop.f32.mrb[124].mxu1  ;;  %v1925_v22 = vrot.slane %v1923_v63, 1  ;;  %v3086_v35 = vrot.slane %v1927_v41, 1  ;;  %v3087_v20 = vrot.slane %v1923_v63, 2 }
 0x2de   :  { %v1596_v52 = vpop.f32.mrb[125].mxu1  ;;  %v1766_v27 = vmax.f32 %v1734_v40, 0.0 }
 0x2df   :  { %v1767_v28 = vmax.f32 %v1735_v54, 0.0  ;;  %v1665_v61 = vmax.f32 %v1594_v30, %v1596_v52  ;;  %v1598_v3 = vpop.f32.mrb[126].mxu1  ;;  %v1926_v47 = vsel %vm1818_vm2, %v1921_v51, %v1925_v22  ;;  %v3088_v56 = vor.u32 %v3087_v20, %v3086_v35 }
 0x2e0   :  { %v1600_v36 = vpop.f32.mrb[127].mxu1  ;;  %5126 = vmatmul.mubr.msk.bf16.gmra.mrb[72].mxu0 %vm2021_vm3, %v1926_v47  ;;  %v1929_v25 = vor.u32 %v1927_v41, %v1925_v22 }
 0x2e1   :  { %v7583_v15 = vpack.c.bf16 %v1767_v28, %v1766_v27  ;;  %v1697_v60 = vmax.f32 %v8435_v13, %v1665_v61  ;;  %v1666_v2 = vmax.f32 %v1598_v3, %v1600_v36  ;;  %2238 = vmatprep.mubr.bf16.mxu0 %v8352_v33  ;;  %v7590_v14 = vsel %vm3034_vm4, %v3084_v23, %v3088_v56  ;;  %v6144_v36 = vld [vmem:[%s8290_s4 + $0xf0] ss:$8 sps:$4 sm:$0xff]  }
 0x2e2   :  { %v6150_v13 = vld [vmem:[%s8290_s4 + $0x110] ss:$8 sps:$4 sm:$0xff]  }
 0x2e3   :  { %v1736_v24 = vadd.f32 %v7284_v18, %v1697_v60  ;;  %v1698_v10 = vmax.f32 %v8438_v48, %v1666_v2  ;;  %v1931_v17 = vshll.u32 %v7583_v15, 16  ;;  %v1935_v5 = vshrl.u32 %v7583_v15, 16  ;;  %v6155_v60 = vld [vmem:[%s8290_s4 + $0x124] ss:$8 sps:$4 sm:$0xff]   ;;  %v6153_v2 = vld [vmem:[%s8290_s4 + $0x120] ss:$8 sps:$4 sm:$0xff]  }
 0x2e4   :  { %v6159_v48 = vld [vmem:[%s8290_s4 + $0x140] ss:$8 sps:$4 sm:$0xff]  }
 0x2e5   :  { %v1737_v40 = vadd.f32 %v7284_v18, %v1698_v10  ;;  %v1933_v32 = vrot.slane %v1931_v17, 1  ;;  %v3090_v58 = vrot.slane %v1935_v5, 1  ;;  %v3091_v8 = vrot.slane %v1931_v17, 2  ;;  %v6164_v10 = vld [vmem:[%s8290_s4 + $0x154] ss:$8 sps:$4 sm:$0xff]   ;;  %v5177_v17 = vld [vmem:[%s8290_s4 + $0x160] sm:$0xff] }
 0x2e6   :  { %v7599_v63 = vmax.f32 %v1736_v24, 0.0  ;;  %v6158_v24 = vld [vmem:[%s8290_s4 + $0x134] ss:$8 sps:$4 sm:$0xff]  }
 0x2e7   :  { %v1769_v23 = vmax.f32 %v1737_v40, 0.0  ;;  %v1934_v54 = vsel %vm1818_vm2, %v1929_v25, %v1933_v32  ;;  %v3092_v30 = vor.u32 %v3091_v8, %v3090_v58  ;;  %v1937_v22 = vor.u32 %v1935_v5, %v1933_v32  ;;  %v6162_v5 = vld [vmem:[%s8290_s4 + $0x150] ss:$8 sps:$4 sm:$0xff]   ;;  %v6169_v58 = vld [vmem:[%s8290_s4 + $0x16c] ss:$8 sps:$4 sm:$0xff]  }
 0x2e8   :  { %5127 = vmatmul.mubr.msk.bf16.gmra.mrb[76].mxu0 %vm2021_vm3, %v1934_v54  ;;  %v5193_v40 = vcombine.high %v5177_v17, %v5177_v17  ;;  %v5192_v25 = vcombine.low %v5177_v17, %v5177_v17  ;;  %v1785_v8 = vpack.c.bf16 %v7599_v63, %v7599_v63  ;;  %v2605_v54 = vrot.slane %v7294_v59, 1 }
 0x2e9   :  { %v7604_v51 = vpack.c.bf16 %v1769_v23, %v7599_v63  ;;  %2248 = vmatprep.mubr.bf16.mxu0 %v8352_v33  ;;  %v7608_v35 = vsel %vm3034_vm4, %v3088_v56, %v3092_v30  ;;  %v6149_v56 = vld [vmem:[%s8290_s4 + $0x104] ss:$8 sps:$4 sm:$0xff]   ;;  %v2606_v23 = vrot.slane %v7306_v55, 1  ;;  %v6170_v63 = vld [vmem:[%s8290_s4 + $0x178] ss:$8 sps:$4 sm:$0xff]  }
 0x2ea   :  { %v2760_v32 = vsel %vm818_vm0, %v5192_v25, 0 }
 0x2eb   :  { %v1939_v18 = vshll.u32 %v7604_v51, 16  ;;  %v1943_v41 = vshrl.u32 %v7604_v51, 16 }
 0x2ed   :  { %v1941_v52 = vrot.slane %v1939_v18, 1  ;;  %v3094_v20 = vrot.slane %v1943_v41, 1  ;;  %v3095_v27 = vrot.slane %v1939_v18, 2  ;;  %v6172_v18 = vld [vmem:[%s8290_s4 + $0x17c] ss:$8 sps:$4 sm:$0xff]  }
 0x2ef   :  { %v1942_v28 = vsel %vm1818_vm2, %v1937_v22, %v1941_v52  ;;  %v7613_v61 = vor.u32 %v3095_v27, %v3094_v20  ;;  %v1945_v47 = vor.u32 %v1943_v41, %v1941_v52  ;;  %v2607_v41 = vsel %vm2604_vm5, %v2605_v54, %v2606_v23  ;;  %v6175_v22 = vld [vmem:[%s8290_s4 + $0x18c] ss:$8 sps:$4 sm:$0xff]   ;;  %v6173_v20 = vld [vmem:[%s8290_s4 + $0x188] ss:$8 sps:$4 sm:$0xff]   ;;  %v6178_v27 = vld [vmem:[%s8290_s4 + $0x19c] ss:$8 sps:$4 sm:$0xff]  }
 0x2f0   :  { %5128 = vmatmul.mubr.msk.bf16.gmra.mrb[80].mxu0 %vm2021_vm3, %v1942_v28  ;;  %v2608_v52 = vrot.slane %v7326_v6, 1  ;;  %v2620_v54 = vrot.slane %v7472_v9, 1 }
 0x2f1   :  { %2258 = vmatprep.mubr.bf16.mxu0 %v8352_v33  ;;  %v7619_v3 = vsel %vm3034_vm4, %v3092_v30, %v7613_v61  ;;  %v6167_v30 = vld [vmem:[%s8290_s4 + $0x168] ss:$8 sps:$4 sm:$0xff]  }
 0x2f2   :  { %v2609_v28 = vsel %vm2604_vm5, %v2606_v23, %v2608_v52 }
 0x2f8   :  { %5129 = vmatmul.mubr.msk.bf16.gmra.mrb[84].mxu0 %vm2021_vm3, %v1945_v47  ;;  %v6176_v47 = vld [vmem:[%s8290_s4 + $0x198] ss:$8 sps:$4 sm:$0xff]  }
 0x2f9   :  { %2413 = vmatprep.mubr.bf16.mxu0 %v8352_v33 }
 0x300   :  { %5147 = vmatmul.mubr.msk.bf16.vlgmr.msra.gmra.mrb[24].mxu0 %vm2021_vm3, %v7294_v59 }
 0x301   :  { %2423 = vmatprep.mubr.bf16.mxu0 %v8352_v33  ;;  %2766 = vmatpush1.bf16.msra.mxu0 %v6144_v36  ;;  %v6181_v36 = vld [vmem:[%s8290_s4 + $0x1ac] ss:$8 sps:$4 sm:$0xff]  }
 0x302   :  { %2767 = vmatprep.subr.bf16.mxu0 %v6149_v56  ;;  %v2610_v56 = vrot.slane %v7356_v4, 1 }
 0x305   :  { %2768 = vmatpush1.bf16.msra.mxu0 %v6147_v11  ;;  %v6179_v11 = vld [vmem:[%s8290_s4 + $0x1a8] ss:$8 sps:$4 sm:$0xff]  }
 0x306   :  { %2769 = vmatprep.subr.bf16.mxu0 %v6152_v1  ;;  %v6184_v1 = vld [vmem:[%s8290_s4 + $0x1bc] ss:$8 sps:$4 sm:$0xff]  }
 0x308   :  { %5148 = vmatmul.mubr.msk.bf16.gmra.mrb[28].mxu0 %vm2021_vm3, %v7306_v55 }
 0x309   :  { %2433 = vmatprep.mubr.bf16.mxu0 %v8352_v33  ;;  %2770 = vmatpush1.bf16.msra.mxu0 %v6150_v13  ;;  %v2611_v13 = vsel %vm2604_vm5, %v2608_v52, %v2610_v56 }
 0x30a   :  { %2771 = vmatprep.subr.bf16.mxu0 %v6155_v60  ;;  %v6182_v60 = vld [vmem:[%s8290_s4 + $0x1b8] ss:$8 sps:$4 sm:$0xff]  }
 0x30d   :  { %2772 = vmatpush1.bf16.msra.mxu0 %v6153_v2  ;;  %v6187_v2 = vld [vmem:[%s8290_s4 + $0x1cc] ss:$8 sps:$4 sm:$0xff]  }
 0x30e   :  { %2773 = vmatprep.subr.bf16.mxu0 %v6158_v24  ;;  %v2612_v24 = vrot.slane %v7386_v46, 1 }
 0x310   :  { %5149 = vmatmul.mubr.msk.bf16.gmra.mrb[32].mxu0 %vm2021_vm3, %v7326_v6  ;;  %v2613_v17 = vsel %vm2604_vm5, %v2610_v56, %v2612_v24 }
 0x311   :  { %2443 = vmatprep.mubr.bf16.mxu0 %v8352_v33  ;;  %2774 = vmatpush1.bf16.msra.mxu0 %v6156_v31  ;;  %v5225_v31 = vld [vmem:[%s8290_s4 + $0x1d8] sm:$0xff] }
 0x312   :  { %2775 = vmatprep.subr.bf16.mxu0 %v6161_v44  ;;  %v6185_v44 = vld [vmem:[%s8290_s4 + $0x1c8] ss:$8 sps:$4 sm:$0xff]  }
 0x315   :  { %2776 = vmatpush1.bf16.msra.mxu0 %v6159_v48  ;;  %v5241_v48 = vcombine.high %v5225_v31, %v5225_v31 }
 0x316   :  { %2777 = vmatprep.subr.bf16.mxu0 %v6164_v10  ;;  %v5240_v10 = vcombine.low %v5225_v31, %v5225_v31  ;;  %v6193_v31 = vld [vmem:[%s8290_s4 + $0x1f0] ss:$8 sps:$4 sm:$0xff]  }
 0x318   :  { %5150 = vmatmul.mubr.msk.bf16.gmra.mrb[36].mxu0 %vm2021_vm3, %v7356_v4 }
 0x319   :  { %2453 = vmatprep.mubr.bf16.mxu0 %v8352_v33  ;;  %2778 = vmatpush1.bf16.msra.mxu0 %v6162_v5  ;;  %v3222_v5 = vsel %vm818_vm0, %v5240_v10, 0  ;;  %v6199_v10 = vld [vmem:[%s8290_s4 + $0x210] ss:$8 sps:$4 sm:$0xff]  }
 0x31a   :  { %5194 = vmatprep.subr.msk.bf16.mxu0 %vm818_vm0, %v5193_v40  ;;  %v2614_v40 = vrot.slane %v7416_v43, 1 }
 0x31c   :  { %v2615_v25 = vsel %vm2604_vm5, %v2612_v24, %v2614_v40  ;;  %v6195_v24 = vld [vmem:[%s8290_s4 + $0x1f4] ss:$8 sps:$4 sm:$0xff]  }
 0x31d   :  { %2780 = vmatpush1.bf16.msra.mxu0 %v2760_v32  ;;  %v2616_v32 = vrot.slane %v7436_v37, 1 }
 0x31e   :  { %3227 = vmatprep.subr.bf16.mxu0 %v6169_v58 }
 0x31f   :  { %v2617_v58 = vsel %vm2604_vm5, %v2614_v40, %v2616_v32  ;;  %v6205_v40 = vld [vmem:[%s8290_s4 + $0x230] ss:$8 sps:$4 sm:$0xff]  }
 0x320   :  { %5151 = vmatmul.mubr.msk.bf16.gmra.mrb[40].mxu0 %vm2021_vm3, %v7386_v46 }
 0x321   :  { %2463 = vmatprep.mubr.bf16.mxu0 %v8352_v33 }
 0x328   :  { %5152 = vmatmul.mubr.msk.bf16.gmra.mrb[44].mxu0 %vm2021_vm3, %v7416_v43 }
 0x329   :  { %2473 = vmatprep.mubr.bf16.mxu0 %v8352_v33 }
 0x330   :  { %5153 = vmatmul.mubr.msk.bf16.gmra.mrb[48].mxu0 %vm2021_vm3, %v7436_v37 }
 0x331   :  { %2483 = vmatprep.mubr.bf16.mxu0 %v8352_v33 }
 0x338   :  { %5154 = vmatmul.mubr.msk.bf16.gmra.mrb[52].mxu0 %vm2021_vm3, %v7454_v62 }
 0x339   :  { %2493 = vmatprep.mubr.bf16.mxu0 %v8352_v33 }
 0x340   :  { %5155 = vmatmul.mubr.msk.bf16.gmra.mrb[56].mxu0 %vm2021_vm3, %v7472_v9 }
 0x341   :  { %2503 = vmatprep.mubr.bf16.mxu0 %v8352_v33 }
 0x348   :  { %5156 = vmatmul.mubr.msk.bf16.gmra.mrb[60].mxu0 %vm2021_vm3, %v7490_v12 }
 0x349   :  { %2513 = vmatprep.mubr.bf16.mxu0 %v8352_v33 }
 0x350   :  { %5157 = vmatmul.mubr.msk.bf16.gmra.mrb[64].mxu0 %vm2021_vm3, %v7511_v26 }
 0x351   :  { %2523 = vmatprep.mubr.bf16.mxu0 %v8352_v33 }
 0x358   :  { %5158 = vmatmul.mubr.msk.bf16.gmra.mrb[68].mxu0 %vm2021_vm3, %v7529_v42 }
 0x359   :  { %2533 = vmatprep.mubr.bf16.mxu0 %v8352_v33 }
 0x360   :  { %5159 = vmatmul.mubr.msk.bf16.gmra.mrb[72].mxu0 %vm2021_vm3, %v7547_v7 }
 0x361   :  { %2543 = vmatprep.mubr.bf16.mxu0 %v8352_v33 }
 0x368   :  { %5160 = vmatmul.mubr.msk.bf16.gmra.mrb[76].mxu0 %vm2021_vm3, %v7565_v49 }
 0x369   :  { %2553 = vmatprep.mubr.bf16.mxu0 %v8352_v33 }
 0x370   :  { %5161 = vmatmul.mubr.msk.bf16.gmra.mrb[80].mxu0 %vm2021_vm3, %v7583_v15 }
 0x371   :  { %2563 = vmatprep.mubr.bf16.mxu0 %v8352_v33 }
 0x378   :  { %5162 = vmatmul.mubr.msk.bf16.gmra.mrb[84].mxu0 %vm2021_vm3, %v1785_v8  ;;  %v2618_v8 = vrot.slane %v7454_v62, 1 }
 0x379   :  { %2797 = vmatprep.mubr.bf16.mxu0 %v8352_v33 }
 0x37a   :  { %v2619_v23 = vsel %vm2604_vm5, %v2616_v32, %v2618_v8  ;;  %v5273_v32 = vld [vmem:[%s8290_s4 + $0x250] sm:$0xff] }
 0x380   :  { %5195 = vmatmul.mubr.msk.bf16.vlgmr.msra.gmra.mrb[24].mxu0 %vm2021_vm3, %v2607_v41 }
 0x381   :  { %2807 = vmatprep.mubr.bf16.mxu0 %v8352_v33  ;;  %3228 = vmatpush1.bf16.msra.mxu0 %v6167_v30  ;;  %v2621_v30 = vsel %vm2604_vm5, %v2618_v8, %v2620_v54  ;;  %v5288_v8 = vcombine.low %v5273_v32, %v5273_v32 }
 0x382   :  { %3229 = vmatprep.subr.bf16.mxu0 %v6172_v18  ;;  %v2622_v18 = vrot.slane %v7490_v12, 1 }
 0x384   :  { %v2623_v41 = vsel %vm2604_vm5, %v2620_v54, %v2622_v18 }
 0x385   :  { %3230 = vmatpush1.bf16.msra.mxu0 %v6170_v63  ;;  %v6192_v63 = vld [vmem:[%s8290_s4 + $0x1e4] ss:$8 sps:$4 sm:$0xff]  }
 0x386   :  { %3231 = vmatprep.subr.bf16.mxu0 %v6175_v22  ;;  %v2624_v22 = vrot.slane %v7511_v26, 1 }
 0x388   :  { %5196 = vmatmul.mubr.msk.bf16.gmra.mrb[28].mxu0 %vm2021_vm3, %v2609_v28  ;;  %v2625_v52 = vsel %vm2604_vm5, %v2622_v18, %v2624_v22  ;;  %v2628_v28 = vrot.slane %v7547_v7, 1 }
 0x389   :  { %2817 = vmatprep.mubr.bf16.mxu0 %v8352_v33  ;;  %3232 = vmatpush1.bf16.msra.mxu0 %v6173_v20  ;;  %v2626_v20 = vrot.slane %v7529_v42, 1 }
 0x38a   :  { %3233 = vmatprep.subr.bf16.mxu0 %v6178_v27 }
 0x38b   :  { %v2627_v27 = vsel %vm2604_vm5, %v2624_v22, %v2626_v20 }
 0x38d   :  { %3234 = vmatpush1.bf16.msra.mxu0 %v6176_v47  ;;  %v2629_v47 = vsel %vm2604_vm5, %v2626_v20, %v2628_v28 }
 0x38e   :  { %3235 = vmatprep.subr.bf16.mxu0 %v6181_v36  ;;  %v2630_v36 = vrot.slane %v7565_v49, 1 }
 0x390   :  { %5197 = vmatmul.mubr.msk.bf16.gmra.mrb[32].mxu0 %vm2021_vm3, %v2611_v13  ;;  %v2631_v56 = vsel %vm2604_vm5, %v2628_v28, %v2630_v36  ;;  %v2634_v13 = vrot.slane %v7604_v51, 1 }
 0x391   :  { %2827 = vmatprep.mubr.bf16.mxu0 %v8352_v33  ;;  %3236 = vmatpush1.bf16.msra.mxu0 %v6179_v11  ;;  %v2632_v11 = vrot.slane %v7583_v15, 1 }
 0x392   :  { %3237 = vmatprep.subr.bf16.mxu0 %v6184_v1 }
 0x393   :  { %v2633_v1 = vsel %vm2604_vm5, %v2630_v36, %v2632_v11 }
 0x395   :  { %3238 = vmatpush1.bf16.msra.mxu0 %v6182_v60  ;;  %v2635_v60 = vsel %vm2604_vm5, %v2632_v11, %v2634_v13 }
 0x396   :  { %3239 = vmatprep.subr.bf16.mxu0 %v6187_v2  ;;  %v6190_v2 = vld [vmem:[%s8290_s4 + $0x1e0] ss:$8 sps:$4 sm:$0xff]  }
 0x398   :  { %5198 = vmatmul.mubr.msk.bf16.gmra.mrb[36].mxu0 %vm2021_vm3, %v2613_v17  ;;  %v6204_v17 = vld [vmem:[%s8290_s4 + $0x224] ss:$8 sps:$4 sm:$0xff]  }
 0x399   :  { %2837 = vmatprep.mubr.bf16.mxu0 %v8352_v33  ;;  %3240 = vmatpush1.bf16.msra.mxu0 %v6185_v44  ;;  %v6198_v44 = vld [vmem:[%s8290_s4 + $0x204] ss:$8 sps:$4 sm:$0xff]  }
 0x39a   :  { %5242 = vmatprep.subr.msk.bf16.mxu0 %vm818_vm0, %v5241_v48  ;;  %v6196_v48 = vld [vmem:[%s8290_s4 + $0x200] ss:$8 sps:$4 sm:$0xff]  }
 0x39d   :  { %3242 = vmatpush1.bf16.msra.mxu0 %v3222_v5  ;;  %v6202_v5 = vld [vmem:[%s8290_s4 + $0x220] ss:$8 sps:$4 sm:$0xff]  }
 0x39e   :  { %3657 = vmatprep.subr.bf16.mxu0 %v6192_v63 }
 0x3a0   :  { %5199 = vmatmul.mubr.msk.bf16.gmra.mrb[40].mxu0 %vm2021_vm3, %v2615_v25  ;;  %v6210_v25 = vld [vmem:[%s8290_s4 + $0x244] ss:$8 sps:$4 sm:$0xff]  }
 0x3a1   :  { %2847 = vmatprep.mubr.bf16.mxu0 %v8352_v33 }
 0x3a8   :  { %5200 = vmatmul.mubr.msk.bf16.gmra.mrb[44].mxu0 %vm2021_vm3, %v2617_v58  ;;  %v5289_v58 = vcombine.high %v5273_v32, %v5273_v32 }
 0x3a9   :  { %2857 = vmatprep.mubr.bf16.mxu0 %v8352_v33 }
 0x3b0   :  { %5201 = vmatmul.mubr.msk.bf16.gmra.mrb[48].mxu0 %vm2021_vm3, %v2619_v23  ;;  %v3652_v23 = vsel %vm818_vm0, %v5288_v8, 0 }
 0x3b1   :  { %2867 = vmatprep.mubr.bf16.mxu0 %v8352_v33 }
 0x3b8   :  { %5202 = vmatmul.mubr.msk.bf16.gmra.mrb[52].mxu0 %vm2021_vm3, %v2621_v30 }
 0x3b9   :  { %2877 = vmatprep.mubr.bf16.mxu0 %v8352_v33 }
 0x3c0   :  { %5203 = vmatmul.mubr.msk.bf16.gmra.mrb[56].mxu0 %vm2021_vm3, %v2623_v41 }
 0x3c1   :  { %2887 = vmatprep.mubr.bf16.mxu0 %v8352_v33 }
 0x3c8   :  { %5204 = vmatmul.mubr.msk.bf16.gmra.mrb[60].mxu0 %vm2021_vm3, %v2625_v52 }
 0x3c9   :  { %2897 = vmatprep.mubr.bf16.mxu0 %v8352_v33 }
 0x3d0   :  { %5205 = vmatmul.mubr.msk.bf16.gmra.mrb[64].mxu0 %vm2021_vm3, %v2627_v27 }
 0x3d1   :  { %2907 = vmatprep.mubr.bf16.mxu0 %v8352_v33 }
 0x3d8   :  { %5206 = vmatmul.mubr.msk.bf16.gmra.mrb[68].mxu0 %vm2021_vm3, %v2629_v47 }
 0x3d9   :  { %2917 = vmatprep.mubr.bf16.mxu0 %v8352_v33 }
 0x3e0   :  { %5207 = vmatmul.mubr.msk.bf16.gmra.mrb[72].mxu0 %vm2021_vm3, %v2631_v56 }
 0x3e1   :  { %2927 = vmatprep.mubr.bf16.mxu0 %v8352_v33 }
 0x3e8   :  { %5208 = vmatmul.mubr.msk.bf16.gmra.mrb[76].mxu0 %vm2021_vm3, %v2633_v1 }
 0x3e9   :  { %2937 = vmatprep.mubr.bf16.mxu0 %v8352_v33 }
 0x3f0   :  { %5209 = vmatmul.mubr.msk.bf16.gmra.mrb[80].mxu0 %vm2021_vm3, %v2635_v60 }
 0x3f1   :  { %2947 = vmatprep.mubr.bf16.mxu0 %v8352_v33 }
 0x3f8   :  { %5210 = vmatmul.mubr.msk.bf16.gmra.mrb[84].mxu0 %vm2021_vm3, %v2634_v13 }
 0x3f9   :  { %3259 = vmatprep.mubr.bf16.mxu0 %v8352_v33 }
 0x400   :  { %5243 = vmatmul.mubr.msk.bf16.vlgmr.msra.gmra.mrb[24].mxu0 %vm2021_vm3, %v7339_v57  ;;  %v6201_v57 = vld [vmem:[%s8290_s4 + $0x214] ss:$8 sps:$4 sm:$0xff]  }
 0x401   :  { %3269 = vmatprep.mubr.bf16.mxu0 %v8352_v33  ;;  %3658 = vmatpush1.bf16.msra.mxu0 %v6190_v2 }
 0x402   :  { %3659 = vmatprep.subr.bf16.mxu0 %v6195_v24 }
 0x405   :  { %3660 = vmatpush1.bf16.msra.mxu0 %v6193_v31 }
 0x406   :  { %3661 = vmatprep.subr.bf16.mxu0 %v6198_v44 }
 0x408   :  { %5244 = vmatmul.mubr.msk.bf16.gmra.mrb[28].mxu0 %vm2021_vm3, %v7369_v50  ;;  %v6207_v50 = vld [vmem:[%s8290_s4 + $0x234] ss:$8 sps:$4 sm:$0xff]  }
 0x409   :  { %3279 = vmatprep.mubr.bf16.mxu0 %v8352_v33  ;;  %3662 = vmatpush1.bf16.msra.mxu0 %v6196_v48 }
 0x40a   :  { %3663 = vmatprep.subr.bf16.mxu0 %v6201_v57 }
 0x40d   :  { %3664 = vmatpush1.bf16.msra.mxu0 %v6199_v10 }
 0x40e   :  { %3665 = vmatprep.subr.bf16.mxu0 %v6204_v17 }
 0x410   :  { %5245 = vmatmul.mubr.msk.bf16.gmra.mrb[32].mxu0 %vm2021_vm3, %v7399_v34  ;;  %v6208_v34 = vld [vmem:[%s8290_s4 + $0x240] ss:$8 sps:$4 sm:$0xff]  }
 0x411   :  { %3289 = vmatprep.mubr.bf16.mxu0 %v8352_v33  ;;  %3666 = vmatpush1.bf16.msra.mxu0 %v6202_v5 }
 0x412   :  { %3667 = vmatprep.subr.bf16.mxu0 %v6207_v50 }
 0x415   :  { %3668 = vmatpush1.bf16.msra.mxu0 %v6205_v40 }
 0x416   :  { %3669 = vmatprep.subr.bf16.mxu0 %v6210_v25 }
 0x418   :  { %5246 = vmatmul.mubr.msk.bf16.gmra.mrb[36].mxu0 %vm2021_vm3, %v7425_v0  ;;  %v3498_v0 = vrot.slane %v7306_v55, 2 }
 0x419   :  { %3299 = vmatprep.mubr.bf16.mxu0 %v8352_v33  ;;  %3670 = vmatpush1.bf16.msra.mxu0 %v6208_v34 }
 0x41a   :  { %5290 = vmatprep.subr.msk.bf16.mxu0 %vm818_vm0, %v5289_v58 }
 0x41d   :  { %3672 = vmatpush1.bf16.msra.mxu0 %v3652_v23 }
 0x420   :  { %5247 = vmatmul.mubr.msk.bf16.gmra.mrb[40].mxu0 %vm2021_vm3, %v7443_v39  ;;  %v3497_v39 = vrot.slane %v7294_v59, 2  ;;  %v3504_v59 = vrot.slane %v7386_v46, 2  ;;  %v3510_v46 = vrot.slane %v7454_v62, 2  ;;  %v3516_v62 = vrot.slane %v7511_v26, 2 }
 0x421   :  { %3309 = vmatprep.mubr.bf16.mxu0 %v8352_v33  ;;  %v3522_v26 = vrot.slane %v7565_v49, 2 }
 0x428   :  { %5248 = vmatmul.mubr.msk.bf16.gmra.mrb[44].mxu0 %vm2021_vm3, %v7461_v38  ;;  %v3499_v38 = vsel %vm3496_vm6, %v3497_v39, %v3498_v0 }
 0x429   :  { %3319 = vmatprep.mubr.bf16.mxu0 %v8352_v33 }
 0x430   :  { %5249 = vmatmul.mubr.msk.bf16.gmra.mrb[48].mxu0 %vm2021_vm3, %v7479_v16  ;;  %v3500_v16 = vrot.slane %v7326_v6, 2  ;;  %v3506_v6 = vrot.slane %v7416_v43, 2  ;;  %v3512_v43 = vrot.slane %v7472_v9, 2  ;;  %v3518_v9 = vrot.slane %v7529_v42, 2 }
 0x431   :  { %3329 = vmatprep.mubr.bf16.mxu0 %v8352_v33  ;;  %v3524_v42 = vrot.slane %v7583_v15, 2  ;;  %v6215_v15 = vld [vmem:[%s8292_s6 + $0x4] ss:$8 sps:$4 sm:$0xff]  }
 0x432   :  { %v3519_v54 = vsel %vm3496_vm6, %v3516_v62, %v3518_v9  ;;  %5315 = vmatprep.mubr.msk.bf16.mxu1 %vm2021_vm3, %v6215_v15 }
 0x433   :  { %v3525_v41 = vsel %vm3496_vm6, %v3522_v26, %v3524_v42 }
 0x438   :  { %5250 = vmatmul.mubr.msk.bf16.gmra.mrb[52].mxu0 %vm2021_vm3, %v7497_v45  ;;  %v3501_v45 = vsel %vm3496_vm6, %v3498_v0, %v3500_v16 }
 0x439   :  { %3339 = vmatprep.mubr.bf16.mxu0 %v8352_v33 }
 0x440   :  { %5251 = vmatmul.mubr.msk.bf16.gmra.mrb[56].mxu0 %vm2021_vm3, %v7518_v53  ;;  %v3502_v53 = vrot.slane %v7356_v4, 2  ;;  %v3508_v4 = vrot.slane %v7436_v37, 2  ;;  %v3514_v37 = vrot.slane %v7490_v12, 2  ;;  %v3520_v12 = vrot.slane %v7547_v7, 2 }
 0x441   :  { %3349 = vmatprep.mubr.bf16.mxu0 %v8352_v33  ;;  %v3526_v7 = vrot.slane %v7604_v51, 2 }
 0x442   :  { %v3503_v55 = vsel %vm3496_vm6, %v3500_v16, %v3502_v53  ;;  %v3521_v30 = vsel %vm3496_vm6, %v3518_v9, %v3520_v12  ;;  %v3523_v18 = vsel %vm3496_vm6, %v3520_v12, %v3522_v26 }
 0x443   :  { %v3527_v63 = vsel %vm3496_vm6, %v3524_v42, %v3526_v7 }
 0x448   :  { %5252 = vmatmul.mubr.msk.bf16.gmra.mrb[60].mxu0 %vm2021_vm3, %v7536_v19  ;;  %v3505_v19 = vsel %vm3496_vm6, %v3502_v53, %v3504_v59 }
 0x449   :  { %3359 = vmatprep.mubr.bf16.mxu0 %v8352_v33 }
 0x450   :  { %5253 = vmatmul.mubr.msk.bf16.gmra.mrb[64].mxu0 %vm2021_vm3, %v7554_v21  ;;  %v3507_v21 = vsel %vm3496_vm6, %v3504_v59, %v3506_v6 }
 0x451   :  { %3369 = vmatprep.mubr.bf16.mxu0 %v8352_v33 }
 0x458   :  { %5254 = vmatmul.mubr.msk.bf16.gmra.mrb[68].mxu0 %vm2021_vm3, %v7572_v29  ;;  %v3509_v29 = vsel %vm3496_vm6, %v3506_v6, %v3508_v4 }
 0x459   :  { %3379 = vmatprep.mubr.bf16.mxu0 %v8352_v33 }
 0x460   :  { %5255 = vmatmul.mubr.msk.bf16.gmra.mrb[72].mxu0 %vm2021_vm3, %v7590_v14  ;;  %v3511_v14 = vsel %vm3496_vm6, %v3508_v4, %v3510_v46 }
 0x461   :  { %3389 = vmatprep.mubr.bf16.mxu0 %v8352_v33 }
 0x468   :  { %5256 = vmatmul.mubr.msk.bf16.gmra.mrb[76].mxu0 %vm2021_vm3, %v7608_v35  ;;  %v3513_v35 = vsel %vm3496_vm6, %v3510_v46, %v3512_v43 }
 0x469   :  { %3399 = vmatprep.mubr.bf16.mxu0 %v8352_v33 }
 0x470   :  { %5257 = vmatmul.mubr.msk.bf16.gmra.mrb[80].mxu0 %vm2021_vm3, %v7619_v3  ;;  %v3517_v3 = vsel %vm3496_vm6, %v3514_v37, %v3516_v62 }
 0x471   :  { %3409 = vmatprep.mubr.bf16.mxu0 %v8352_v33 }
 0x478   :  { %5258 = vmatmul.mubr.msk.bf16.gmra.mrb[84].mxu0 %vm2021_vm3, %v7613_v61  ;;  %v3515_v61 = vsel %vm3496_vm6, %v3512_v43, %v3514_v37 }
 0x479   :  { %3689 = vmatprep.mubr.bf16.mxu0 %v8352_v33 }
 0x480   :  { %5291 = vmatmul.mubr.msk.bf16.vlgmr.msra.gmra.mrb[24].mxu0 %vm2021_vm3, %v3499_v38 }
 0x481   :  { %3699 = vmatprep.mubr.bf16.mxu0 %v8352_v33 }
 0x488   :  { %5292 = vmatmul.mubr.msk.bf16.gmra.mrb[28].mxu0 %vm2021_vm3, %v3501_v45 }
 0x489   :  { %3709 = vmatprep.mubr.bf16.mxu0 %v8352_v33 }
 0x490   :  { %5293 = vmatmul.mubr.msk.bf16.gmra.mrb[32].mxu0 %vm2021_vm3, %v3503_v55 }
 0x491   :  { %3719 = vmatprep.mubr.bf16.mxu0 %v8352_v33 }
 0x498   :  { %5294 = vmatmul.mubr.msk.bf16.gmra.mrb[36].mxu0 %vm2021_vm3, %v3505_v19 }
 0x499   :  { %3729 = vmatprep.mubr.bf16.mxu0 %v8352_v33 }
 0x4a0   :  { %5295 = vmatmul.mubr.msk.bf16.gmra.mrb[40].mxu0 %vm2021_vm3, %v3507_v21 }
 0x4a1   :  { %3739 = vmatprep.mubr.bf16.mxu0 %v8352_v33 }
 0x4a8   :  { %5296 = vmatmul.mubr.msk.bf16.gmra.mrb[44].mxu0 %vm2021_vm3, %v3509_v29 }
 0x4a9   :  { %3749 = vmatprep.mubr.bf16.mxu0 %v8352_v33 }
 0x4b0   :  { %5297 = vmatmul.mubr.msk.bf16.gmra.mrb[48].mxu0 %vm2021_vm3, %v3511_v14 }
 0x4b1   :  { %3759 = vmatprep.mubr.bf16.mxu0 %v8352_v33 }
 0x4b8   :  { %5298 = vmatmul.mubr.msk.bf16.gmra.mrb[52].mxu0 %vm2021_vm3, %v3513_v35 }
 0x4b9   :  { %3769 = vmatprep.mubr.bf16.mxu0 %v8352_v33 }
 0x4c0   :  { %5299 = vmatmul.mubr.msk.bf16.gmra.mrb[56].mxu0 %vm2021_vm3, %v3515_v61 }
 0x4c1   :  { %3779 = vmatprep.mubr.bf16.mxu0 %v8352_v33 }
 0x4c8   :  { %5300 = vmatmul.mubr.msk.bf16.gmra.mrb[60].mxu0 %vm2021_vm3, %v3517_v3 }
 0x4c9   :  { %3789 = vmatprep.mubr.bf16.mxu0 %v8352_v33 }
 0x4d0   :  { %5301 = vmatmul.mubr.msk.bf16.gmra.mrb[64].mxu0 %vm2021_vm3, %v3519_v54 }
 0x4d1   :  { %3799 = vmatprep.mubr.bf16.mxu0 %v8352_v33 }
 0x4d8   :  { %5302 = vmatmul.mubr.msk.bf16.gmra.mrb[68].mxu0 %vm2021_vm3, %v3521_v30 }
 0x4d9   :  { %3809 = vmatprep.mubr.bf16.mxu0 %v8352_v33 }
 0x4e0   :  { %5303 = vmatmul.mubr.msk.bf16.gmra.mrb[72].mxu0 %vm2021_vm3, %v3523_v18 }
 0x4e1   :  { %3819 = vmatprep.mubr.bf16.mxu0 %v8352_v33 }
 0x4e8   :  { %5304 = vmatmul.mubr.msk.bf16.gmra.mrb[76].mxu0 %vm2021_vm3, %v3525_v41 }
 0x4e9   :  { %3829 = vmatprep.mubr.bf16.mxu0 %v8352_v33 }
 0x4f0   :  { %5305 = vmatmul.mubr.msk.bf16.gmra.mrb[80].mxu0 %vm2021_vm3, %v3527_v63 }
 0x4f1   :  { %3839 = vmatprep.mubr.bf16.mxu0 %v8352_v33 }
 0x4f8   :  { %5306 = vmatmul.mubr.msk.bf16.gmra.mrb[84].mxu0 %vm2021_vm3, %v3526_v7 }
 0x553   :  { %v3691_v49 = vpop.f32.mrb[24].mxu0 }
 0x554   :  { %v3693_v22 = vpop.f32.mrb[25].mxu0 }
 0x555   :  { %v3910_v52 = vmax.f32 %v3691_v49, %v3693_v22  ;;  %v3695_v20 = vpop.f32.mrb[26].mxu0 }
 0x556   :  { %v3697_v27 = vpop.f32.mrb[27].mxu0 }
 0x557   :  { %v3911_v51 = vmax.f32 %v3695_v20, %v3697_v27 }
 0x559   :  { %v7987_v28 = vpack.c.bf16 %v3911_v51, %v3910_v52 }
 0x55b   :  { %v3701_v47 = vpop.f32.mrb[28].mxu0 }
 0x55c   :  { %v3703_v36 = vpop.f32.mrb[29].mxu0 }
 0x55d   :  { %v3912_v56 = vmax.f32 %v3701_v47, %v3703_v36  ;;  %v3705_v11 = vpop.f32.mrb[30].mxu0 }
 0x55e   :  { %v3707_v1 = vpop.f32.mrb[31].mxu0 }
 0x55f   :  { %v3913_v13 = vmax.f32 %v3705_v11, %v3707_v1 }
 0x561   :  { %v7989_v60 = vpack.c.bf16 %v3913_v13, %v3912_v56 }
 0x563   :  { %v3711_v2 = vpop.f32.mrb[32].mxu0 }
 0x564   :  { %v3713_v24 = vpop.f32.mrb[33].mxu0 }
 0x565   :  { %v3914_v31 = vmax.f32 %v3711_v2, %v3713_v24  ;;  %v3715_v44 = vpop.f32.mrb[34].mxu0 }
 0x566   :  { %v3717_v48 = vpop.f32.mrb[35].mxu0 }
 0x567   :  { %v3915_v57 = vmax.f32 %v3715_v44, %v3717_v48 }
 0x569   :  { %v7991_v10 = vpack.c.bf16 %v3915_v57, %v3914_v31 }
 0x56b   :  { %v3721_v17 = vpop.f32.mrb[36].mxu0 }
 0x56c   :  { %v3723_v5 = vpop.f32.mrb[37].mxu0 }
 0x56d   :  { %v3916_v50 = vmax.f32 %v3721_v17, %v3723_v5  ;;  %v3725_v40 = vpop.f32.mrb[38].mxu0 }
 0x56e   :  { %v3727_v25 = vpop.f32.mrb[39].mxu0 }
 0x56f   :  { %v3917_v32 = vmax.f32 %v3725_v40, %v3727_v25 }
 0x571   :  { %v7993_v34 = vpack.c.bf16 %v3917_v32, %v3916_v50 }
 0x573   :  { %v3731_v58 = vpop.f32.mrb[40].mxu0 }
 0x574   :  { %v3733_v8 = vpop.f32.mrb[41].mxu0 }
 0x575   :  { %v3918_v23 = vmax.f32 %v3731_v58, %v3733_v8  ;;  %v3735_v0 = vpop.f32.mrb[42].mxu0 }
 0x576   :  { %v3737_v39 = vpop.f32.mrb[43].mxu0 }
 0x577   :  { %v3919_v38 = vmax.f32 %v3735_v0, %v3737_v39 }
 0x579   :  { %v7995_v16 = vpack.c.bf16 %v3919_v38, %v3918_v23 }
 0x57b   :  { %v3741_v45 = vpop.f32.mrb[44].mxu0 }
 0x57c   :  { %v3743_v53 = vpop.f32.mrb[45].mxu0 }
 0x57d   :  { %v3920_v55 = vmax.f32 %v3741_v45, %v3743_v53  ;;  %v3745_v59 = vpop.f32.mrb[46].mxu0 }
 0x57e   :  { %v3747_v19 = vpop.f32.mrb[47].mxu0 }
 0x57f   :  { %v3921_v6 = vmax.f32 %v3745_v59, %v3747_v19 }
 0x581   :  { %v7997_v21 = vpack.c.bf16 %v3921_v6, %v3920_v55 }
 0x583   :  { %v3751_v4 = vpop.f32.mrb[48].mxu0 }
 0x584   :  { %v3753_v29 = vpop.f32.mrb[49].mxu0 }
 0x585   :  { %v3922_v46 = vmax.f32 %v3751_v4, %v3753_v29  ;;  %v3755_v14 = vpop.f32.mrb[50].mxu0 }
 0x586   :  { %v3757_v43 = vpop.f32.mrb[51].mxu0 }
 0x587   :  { %v3923_v35 = vmax.f32 %v3755_v14, %v3757_v43 }
 0x589   :  { %v7999_v37 = vpack.c.bf16 %v3923_v35, %v3922_v46 }
 0x58b   :  { %v3761_v61 = vpop.f32.mrb[52].mxu0 }
 0x58c   :  { %v3763_v62 = vpop.f32.mrb[53].mxu0 }
 0x58d   :  { %v3924_v3 = vmax.f32 %v3761_v61, %v3763_v62  ;;  %v3765_v9 = vpop.f32.mrb[54].mxu0 }
 0x58e   :  { %v3767_v54 = vpop.f32.mrb[55].mxu0 }
 0x58f   :  { %v3925_v12 = vmax.f32 %v3765_v9, %v3767_v54 }
 0x591   :  { %v8001_v30 = vpack.c.bf16 %v3925_v12, %v3924_v3 }
 0x593   :  { %v3771_v26 = vpop.f32.mrb[56].mxu0 }
 0x594   :  { %v3773_v18 = vpop.f32.mrb[57].mxu0 }
 0x595   :  { %v3926_v42 = vmax.f32 %v3771_v26, %v3773_v18  ;;  %v3775_v41 = vpop.f32.mrb[58].mxu0  ;;  %v6213_v26 = vld [vmem:[%s8292_s6] ss:$8 sps:$4 sm:$0xff]   ;;  %v6216_v18 = vld [vmem:[%s8292_s6 + $0x14] ss:$8 sps:$4 sm:$0xff]  }
 0x596   :  { %v3777_v7 = vpop.f32.mrb[59].mxu0 }
 0x597   :  { %v3927_v63 = vmax.f32 %v3775_v41, %v3777_v7  ;;  %v6219_v41 = vld [vmem:[%s8292_s6 + $0x24] ss:$8 sps:$4 sm:$0xff]  }
 0x598   :  { %v6231_v7 = vld [vmem:[%s8293_s7 + $0x24] ss:$8 sps:$4 sm:$0xff]  }
 0x599   :  { %v8003_v49 = vpack.c.bf16 %v3927_v63, %v3926_v42  ;;  %v6218_v42 = vld [vmem:[%s8292_s6 + $0x10] ss:$8 sps:$4 sm:$0xff]   ;;  %v6234_v63 = vld [vmem:[%s8293_s7 + $0x34] ss:$8 sps:$4 sm:$0xff]  }
 0x59b   :  { %v3781_v22 = vpop.f32.mrb[60].mxu0  ;;  %5423 = vmatprep.subr.bf16.mxu1 %v8003_v49 }
 0x59c   :  { %v3783_v15 = vpop.f32.mrb[61].mxu0  ;;  %5424 = vmatpush3.bf16.msra.mxu1 %v7987_v28 }
 0x59d   :  { %v3928_v52 = vmax.f32 %v3781_v22, %v3783_v15  ;;  %v3785_v20 = vpop.f32.mrb[62].mxu0  ;;  %v6237_v22 = vld [vmem:[%s8294_s8 + $0x50] ss:$8 sps:$4 sm:$0xff]   ;;  %v6239_v15 = vld [vmem:[%s8294_s8 + $0x54] ss:$8 sps:$4 sm:$0xff]  }
 0x59e   :  { %v3787_v27 = vpop.f32.mrb[63].mxu0 }
 0x59f   :  { %v3929_v51 = vmax.f32 %v3785_v20, %v3787_v27  ;;  %v6240_v20 = vld [vmem:[%s8294_s8 + $0x60] ss:$8 sps:$4 sm:$0xff]   ;;  %v6245_v27 = vld [vmem:[%s8294_s8 + $0x74] ss:$8 sps:$4 sm:$0xff]  }
 0x5a1   :  { %v3950_v47 = vpack.c.bf16 %v3929_v51, %v3928_v52  ;;  %v6242_v52 = vld [vmem:[%s8294_s8 + $0x64] ss:$8 sps:$4 sm:$0xff]   ;;  %v6243_v51 = vld [vmem:[%s8294_s8 + $0x70] ss:$8 sps:$4 sm:$0xff]  }
 0x5a3   :  { %v3791_v36 = vpop.f32.mrb[64].mxu0  ;;  %5425 = vmatprep.subr.bf16.mxu1 %v3950_v47 }
 0x5a4   :  { %v3793_v56 = vpop.f32.mrb[65].mxu0  ;;  %5426 = vmatpush3.bf16.msra.mxu1 %v7989_v60 }
 0x5a5   :  { %v3930_v11 = vmax.f32 %v3791_v36, %v3793_v56  ;;  %v3795_v1 = vpop.f32.mrb[66].mxu0  ;;  %v6246_v36 = vld [vmem:[%s8294_s8 + $0x80] ss:$8 sps:$4 sm:$0xff]   ;;  %v6251_v56 = vld [vmem:[%s8294_s8 + $0x94] ss:$8 sps:$4 sm:$0xff]  }
 0x5a6   :  { %v3797_v13 = vpop.f32.mrb[67].mxu0 }
 0x5a7   :  { %v3931_v2 = vmax.f32 %v3795_v1, %v3797_v13  ;;  %v6254_v1 = vld [vmem:[%s8294_s8 + $0x4] ss:$8 sps:$4 sm:$0xff]  }
 0x5a9   :  { %v3951_v24 = vpack.c.bf16 %v3931_v2, %v3930_v11  ;;  %v6249_v11 = vld [vmem:[%s8294_s8 + $0x90] ss:$8 sps:$4 sm:$0xff]  }
 0x5ab   :  { %v3801_v31 = vpop.f32.mrb[68].mxu0  ;;  %5427 = vmatprep.subr.bf16.mxu1 %v3951_v24 }
 0x5ac   :  { %v3803_v44 = vpop.f32.mrb[69].mxu0  ;;  %5428 = vmatpush3.bf16.msra.mxu1 %v7991_v10 }
 0x5ad   :  { %v3932_v48 = vmax.f32 %v3801_v31, %v3803_v44  ;;  %v3805_v57 = vpop.f32.mrb[70].mxu0 }
 0x5ae   :  { %v3807_v17 = vpop.f32.mrb[71].mxu0 }
 0x5af   :  { %v3933_v5 = vmax.f32 %v3805_v57, %v3807_v17 }
 0x5b1   :  { %v3952_v50 = vpack.c.bf16 %v3933_v5, %v3932_v48 }
 0x5b3   :  { %v3811_v40 = vpop.f32.mrb[72].mxu0  ;;  %5429 = vmatprep.subr.bf16.mxu1 %v3952_v50 }
 0x5b4   :  { %v3813_v25 = vpop.f32.mrb[73].mxu0  ;;  %5430 = vmatpush3.bf16.msra.mxu1 %v7993_v34 }
 0x5b5   :  { %v3934_v32 = vmax.f32 %v3811_v40, %v3813_v25  ;;  %v3815_v58 = vpop.f32.mrb[74].mxu0 }
 0x5b6   :  { %v3817_v8 = vpop.f32.mrb[75].mxu0 }
 0x5b7   :  { %v3935_v23 = vmax.f32 %v3815_v58, %v3817_v8 }
 0x5b9   :  { %v3953_v0 = vpack.c.bf16 %v3935_v23, %v3934_v32 }
 0x5bb   :  { %v3821_v39 = vpop.f32.mrb[76].mxu0  ;;  %5431 = vmatprep.subr.bf16.mxu1 %v3953_v0 }
 0x5bc   :  { %v3823_v38 = vpop.f32.mrb[77].mxu0  ;;  %5432 = vmatpush3.bf16.msra.mxu1 %v7995_v16 }
 0x5bd   :  { %v3936_v45 = vmax.f32 %v3821_v39, %v3823_v38  ;;  %v3825_v53 = vpop.f32.mrb[78].mxu0 }
 0x5be   :  { %v3827_v55 = vpop.f32.mrb[79].mxu0 }
 0x5bf   :  { %v3937_v59 = vmax.f32 %v3825_v53, %v3827_v55 }
 0x5c1   :  { %v3954_v19 = vpack.c.bf16 %v3937_v59, %v3936_v45 }
 0x5c3   :  { %v3831_v6 = vpop.f32.mrb[80].mxu0  ;;  %5433 = vmatprep.subr.bf16.mxu1 %v3954_v19 }
 0x5c4   :  { %v3833_v4 = vpop.f32.mrb[81].mxu0  ;;  %5434 = vmatpush3.bf16.msra.mxu1 %v7997_v21 }
 0x5c5   :  { %v3938_v29 = vmax.f32 %v3831_v6, %v3833_v4  ;;  %v3835_v46 = vpop.f32.mrb[82].mxu0 }
 0x5c6   :  { %v3837_v14 = vpop.f32.mrb[83].mxu0 }
 0x5c7   :  { %v3939_v43 = vmax.f32 %v3835_v46, %v3837_v14  ;;  %v5331_v14 = vld [vmem:[%s8296_s5] ss:$0 sm:$0xff] }
 0x5c9   :  { %v3955_v35 = vpack.c.bf16 %v3939_v43, %v3938_v29 }
 0x5cb   :  { %v3841_v61 = vpop.f32.mrb[84].mxu0  ;;  %5435 = vmatprep.subr.bf16.mxu1 %v3955_v35 }
 0x5cc   :  { %v3843_v62 = vpop.f32.mrb[85].mxu0  ;;  %5436 = vmatpush3.bf16.msra.mxu1 %v7999_v37 }
 0x5cd   :  { %v3940_v3 = vmax.f32 %v3841_v61, %v3843_v62  ;;  %v3845_v9 = vpop.f32.mrb[86].mxu0 }
 0x5ce   :  { %v3846_v54 = vpop.f32.mrb[87].mxu0 }
 0x5cf   :  { %v3956_v12 = vpack.c.bf16 %v3940_v3, %v3940_v3 }
 0x5d1   :  { %5925 = vmatprep.subr.msk.bf16.mxu1 %vm818_vm0, %v3956_v12 }
 0x5d2   :  { %5438 = vmatpush3.bf16.msra.mxu1 %v8001_v30 }
 0x5d3   :  { %5463 = vmatprep.subr.bf16.mxu1 %v8003_v49  ;;  %v6236_v49 = vld [vmem:[%s8293_s7 + $0x30] ss:$8 sps:$4 sm:$0xff]  }
 0x5d5   :  { %4049 = vmatmul.mubr.bf16.vlgmr.msra.gmra.mrb[128].mxu1 %v6213_v26 }
 0x5d6   :  { %5464 = vmatpush3.bf16.msra.mxu1 %v7987_v28  ;;  %5316 = vmatprep.mubr.msk.bf16.mxu1 %vm2021_vm3, %v6216_v18  ;;  %v6221_v28 = vld [vmem:[%s8292_s6 + $0x20] ss:$8 sps:$4 sm:$0xff]  }
 0x5d7   :  { %5465 = vmatprep.subr.bf16.mxu1 %v3950_v47  ;;  %v6248_v47 = vld [vmem:[%s8294_s8 + $0x84] ss:$8 sps:$4 sm:$0xff]  }
 0x5da   :  { %5466 = vmatpush3.bf16.msra.mxu1 %v7989_v60  ;;  %v6222_v60 = vld [vmem:[%s8292_s6 + $0x34] ss:$8 sps:$4 sm:$0xff]  }
 0x5db   :  { %5467 = vmatprep.subr.bf16.mxu1 %v3951_v24 }
 0x5dd   :  { %4057 = vmatmul.mubr.bf16.gmra.mrb[132].mxu1 %v6218_v42 }
 0x5de   :  { %5468 = vmatpush3.bf16.msra.mxu1 %v7991_v10  ;;  %5317 = vmatprep.mubr.msk.bf16.mxu1 %vm2021_vm3, %v6219_v41  ;;  %v6224_v10 = vld [vmem:[%s8292_s6 + $0x30] ss:$8 sps:$4 sm:$0xff]  }
 0x5df   :  { %5469 = vmatprep.subr.bf16.mxu1 %v3952_v50 }
 0x5e2   :  { %5470 = vmatpush3.bf16.msra.mxu1 %v7993_v34  ;;  %v6227_v34 = vld [vmem:[%s8293_s7 + $0x4] ss:$8 sps:$4 sm:$0xff]  }
 0x5e3   :  { %5471 = vmatprep.subr.bf16.mxu1 %v3953_v0 }
 0x5e5   :  { %4065 = vmatmul.mubr.bf16.gmra.mrb[136].mxu1 %v6221_v28 }
 0x5e6   :  { %5472 = vmatpush3.bf16.msra.mxu1 %v7995_v16  ;;  %5318 = vmatprep.mubr.msk.bf16.mxu1 %vm2021_vm3, %v6222_v60  ;;  %v6225_v16 = vld [vmem:[%s8293_s7] ss:$8 sps:$4 sm:$0xff]  }
 0x5e7   :  { %5473 = vmatprep.subr.bf16.mxu1 %v3954_v19 }
 0x5ea   :  { %5474 = vmatpush3.bf16.msra.mxu1 %v7997_v21  ;;  %v6228_v21 = vld [vmem:[%s8293_s7 + $0x14] ss:$8 sps:$4 sm:$0xff]  }
 0x5eb   :  { %5475 = vmatprep.subr.bf16.mxu1 %v3955_v35 }
 0x5ed   :  { %4073 = vmatmul.mubr.bf16.gmra.mrb[140].mxu1 %v6224_v10 }
 0x5ee   :  { %5476 = vmatpush3.bf16.msra.mxu1 %v7999_v37  ;;  %5327 = vmatprep.mubr.msk.bf16.mxu1 %vm2021_vm3, %v6227_v34  ;;  %v6230_v37 = vld [vmem:[%s8293_s7 + $0x10] ss:$8 sps:$4 sm:$0xff]  }
 0x5ef   :  { %5926 = vmatprep.subr.msk.bf16.mxu1 %vm818_vm0, %v3956_v12 }
 0x5f2   :  { %5478 = vmatpush3.bf16.msra.mxu1 %v8001_v30  ;;  %v6233_v30 = vld [vmem:[%s8293_s7 + $0x20] ss:$8 sps:$4 sm:$0xff]  }
 0x5f3   :  { %4312 = vmatprep.subr.bf16.mxu1 %v6239_v15 }
 0x5f5   :  { %4170 = vmatmul.mubr.bf16.vlgmr.msra.gmra.mrb[144].mxu1 %v6225_v16 }
 0x5f6   :  { %5328 = vmatprep.mubr.msk.bf16.mxu1 %vm2021_vm3, %v6228_v21  ;;  %4313 = vmatpush1.bf16.msra.mxu1 %v6237_v22 }
 0x5f7   :  { %4314 = vmatprep.subr.bf16.mxu1 %v6242_v52  ;;  %v6252_v52 = vld [vmem:[%s8294_s8] ss:$8 sps:$4 sm:$0xff]  }
 0x5fa   :  { %4315 = vmatpush1.bf16.msra.mxu1 %v6240_v20 }
 0x5fb   :  { %4316 = vmatprep.subr.bf16.mxu1 %v6245_v27 }
 0x5fd   :  { %4178 = vmatmul.mubr.bf16.gmra.mrb[148].mxu1 %v6230_v37 }
 0x5fe   :  { %5329 = vmatprep.mubr.msk.bf16.mxu1 %vm2021_vm3, %v6231_v7  ;;  %4317 = vmatpush1.bf16.msra.mxu1 %v6243_v51  ;;  %v6257_v51 = vld [vmem:[%s8294_s8 + $0x14] ss:$8 sps:$4 sm:$0xff]  }
 0x5ff   :  { %4318 = vmatprep.subr.bf16.mxu1 %v6248_v47 }
 0x602   :  { %4319 = vmatpush1.bf16.msra.mxu1 %v6246_v36 }
 0x603   :  { %4320 = vmatprep.subr.bf16.mxu1 %v6251_v56 }
 0x605   :  { %4186 = vmatmul.mubr.bf16.gmra.mrb[152].mxu1 %v6233_v30 }
 0x606   :  { %5330 = vmatprep.mubr.msk.bf16.mxu1 %vm2021_vm3, %v6234_v63  ;;  %4321 = vmatpush1.bf16.msra.mxu1 %v6249_v11 }
 0x607   :  { %4408 = vmatprep.subr.bf16.mxu1 %v6254_v1  ;;  %v6255_v1 = vld [vmem:[%s8294_s8 + $0x10] ss:$8 sps:$4 sm:$0xff]  }
 0x60d   :  { %4194 = vmatmul.mubr.bf16.gmra.mrb[156].mxu1 %v6236_v49 }
 0x60e   :  { %4344 = vmatprep.mubr.bf16.mxu1 %v8352_v33 }
 0x6a8   :  { %v5439_v13 = vpop.f32.mrb[128].mxu1 }
 0x6a9   :  { %v5440_v2 = vpop.f32.mrb[129].mxu1 }
 0x6aa   :  { %v5441_v24 = vadd.f32 %v5440_v2, %v5439_v13  ;;  %v5442_v31 = vpop.f32.mrb[130].mxu1  ;;  %v6260_v13 = vld [vmem:[%s8294_s8 + $0x24] ss:$8 sps:$4 sm:$0xff]  }
 0x6ab   :  { %v5443_v44 = vpop.f32.mrb[131].mxu1 }
 0x6ac   :  { %v5444_v48 = vadd.f32 %v5443_v44, %v5442_v31 }
 0x6b0   :  { %v5445_v57 = vpop.f32.mrb[132].mxu1 }
 0x6b1   :  { %v5446_v17 = vpop.f32.mrb[133].mxu1 }
 0x6b2   :  { %v5447_v5 = vadd.f32 %v5446_v17, %v5445_v57  ;;  %v5448_v50 = vpop.f32.mrb[134].mxu1 }
 0x6b3   :  { %v5449_v40 = vpop.f32.mrb[135].mxu1 }
 0x6b4   :  { %v5450_v25 = vadd.f32 %v5449_v40, %v5448_v50  ;;  %v6263_v40 = vld [vmem:[%s8294_s8 + $0x34] ss:$8 sps:$4 sm:$0xff]  }
 0x6b8   :  { %v5451_v32 = vpop.f32.mrb[136].mxu1 }
 0x6b9   :  { %v5452_v58 = vpop.f32.mrb[137].mxu1 }
 0x6ba   :  { %v5453_v8 = vadd.f32 %v5452_v58, %v5451_v32  ;;  %v5454_v23 = vpop.f32.mrb[138].mxu1 }
 0x6bb   :  { %v5455_v0 = vpop.f32.mrb[139].mxu1 }
 0x6bc   :  { %v5456_v39 = vadd.f32 %v5455_v0, %v5454_v23  ;;  %v6261_v0 = vld [vmem:[%s8294_s8 + $0x30] ss:$8 sps:$4 sm:$0xff]  }
 0x6c0   :  { %v5457_v38 = vpop.f32.mrb[140].mxu1 }
 0x6c1   :  { %v5458_v45 = vpop.f32.mrb[141].mxu1 }
 0x6c2   :  { %v8111_v53 = vadd.f32 %v5458_v45, %v5457_v38  ;;  %v5460_v55 = vpop.f32.mrb[142].mxu1 }
 0x6c3   :  { %v5461_v59 = vpop.f32.mrb[143].mxu1 }
 0x6c4   :  { %v8113_v19 = vadd.f32 %v5461_v59, %v5460_v55  ;;  %v6269_v59 = vld [vmem:[%s8294_s8 + $0xa4] ss:$8 sps:$4 sm:$0xff]  }
 0x6c8   :  { %v5479_v6 = vpop.f32.mrb[144].mxu1 }
 0x6c9   :  { %v5480_v4 = vpop.f32.mrb[145].mxu1 }
 0x6ca   :  { %v5481_v29 = vadd.f32 %v5480_v4, %v5479_v6  ;;  %v5482_v46 = vpop.f32.mrb[146].mxu1  ;;  %v6267_v6 = vld [vmem:[%s8294_s8 + $0xa0] ss:$8 sps:$4 sm:$0xff]   ;;  %v6272_v4 = vld [vmem:[%s8294_s8 + $0xb4] ss:$8 sps:$4 sm:$0xff]  }
 0x6cb   :  { %v5483_v43 = vpop.f32.mrb[147].mxu1 }
 0x6cc   :  { %v4202_v35 = vmax.f32 %v5441_v24, %v5481_v29  ;;  %v5484_v61 = vadd.f32 %v5483_v43, %v5482_v46  ;;  %v6270_v29 = vld [vmem:[%s8294_s8 + $0xb0] ss:$8 sps:$4 sm:$0xff]   ;;  %v6275_v46 = vld [vmem:[%s8294_s8 + $0xc4] ss:$8 sps:$4 sm:$0xff]   ;;  %v6278_v43 = vld [vmem:[%s8294_s8 + $0xd4] ss:$8 sps:$4 sm:$0xff]  }
 0x6ce   :  { %v4217_v62 = vadd.f32 %v5331_v14, %v4202_v35  ;;  %v4203_v3 = vmax.f32 %v5444_v48, %v5484_v61  ;;  %v6276_v35 = vld [vmem:[%s8294_s8 + $0xd0] ss:$8 sps:$4 sm:$0xff]   ;;  %v6281_v61 = vld [vmem:[%s8294_s8 + $0xe4] ss:$8 sps:$4 sm:$0xff]  }
 0x6d0   :  { %v4218_v9 = vadd.f32 %v5331_v14, %v4203_v3  ;;  %v5485_v54 = vpop.f32.mrb[148].mxu1  ;;  %v4225_v26 = vmax.f32 %v4217_v62, 0.0  ;;  %v6279_v62 = vld [vmem:[%s8294_s8 + $0xe0] ss:$8 sps:$4 sm:$0xff]   ;;  %v6284_v3 = vld [vmem:[%s8294_s8 + $0xf4] ss:$8 sps:$4 sm:$0xff]  }
 0x6d1   :  { %v5486_v12 = vpop.f32.mrb[149].mxu1 }
 0x6d2   :  { %v4226_v18 = vmax.f32 %v4218_v9, 0.0  ;;  %v5487_v42 = vadd.f32 %v5486_v12, %v5485_v54  ;;  %v5488_v41 = vpop.f32.mrb[150].mxu1  ;;  %v6282_v9 = vld [vmem:[%s8294_s8 + $0xf0] ss:$8 sps:$4 sm:$0xff]   ;;  %v6287_v54 = vld [vmem:[%s8294_s8 + $0x104] ss:$8 sps:$4 sm:$0xff]  }
 0x6d3   :  { %v5489_v28 = vpop.f32.mrb[151].mxu1  ;;  %v6285_v12 = vld [vmem:[%s8294_s8 + $0x100] ss:$8 sps:$4 sm:$0xff]  }
 0x6d4   :  { %v4233_v60 = vpack.c.bf16 %v4226_v18, %v4225_v26  ;;  %v4204_v10 = vmax.f32 %v5447_v5, %v5487_v42  ;;  %v5490_v34 = vadd.f32 %v5489_v28, %v5488_v41  ;;  %v6258_v5 = vld [vmem:[%s8294_s8 + $0x20] ss:$8 sps:$4 sm:$0xff]   ;;  %v6290_v26 = vld [vmem:[%s8294_s8 + $0x114] ss:$8 sps:$4 sm:$0xff]   ;;  %v6288_v18 = vld [vmem:[%s8294_s8 + $0x110] ss:$8 sps:$4 sm:$0xff]  }
 0x6d5   :  { %v6293_v42 = vld [vmem:[%s8294_s8 + $0x124] ss:$8 sps:$4 sm:$0xff]   ;;  %v6296_v41 = vld [vmem:[%s8294_s8 + $0x134] ss:$8 sps:$4 sm:$0xff]   ;;  %v6294_v28 = vld [vmem:[%s8294_s8 + $0x130] ss:$8 sps:$4 sm:$0xff]  }
 0x6d6   :  { %v4219_v16 = vadd.f32 %v5331_v14, %v4204_v10  ;;  %v4205_v21 = vmax.f32 %v5450_v25, %v5490_v34  ;;  %v6298_v10 = vld [vmem:[%s8295_s10] sm:$0xff]   ;;  %v6299_v34 = vld [vmem:[%s8295_s10 + $0x48] sm:$0xff]  }
 0x6d8   :  { %v4220_v37 = vadd.f32 %v5331_v14, %v4205_v21  ;;  %v5491_v7 = vpop.f32.mrb[152].mxu1  ;;  %v4227_v63 = vmax.f32 %v4219_v16, 0.0  ;;  %v6300_v16 = vld [vmem:[%s8295_s10 + $0x8] sm:$0xff]   ;;  %v6301_v21 = vld [vmem:[%s8295_s10 + $0x50] sm:$0xff]  }
 0x6d9   :  { %v5492_v30 = vpop.f32.mrb[153].mxu1 }
 0x6da   :  { %v4228_v49 = vmax.f32 %v4220_v37, 0.0  ;;  %v5493_v22 = vadd.f32 %v5492_v30, %v5491_v7  ;;  %v5494_v15 = vpop.f32.mrb[154].mxu1  ;;  %v6302_v37 = vld [vmem:[%s8295_s10 + $0x10] sm:$0xff]   ;;  %v6303_v7 = vld [vmem:[%s8295_s10 + $0x58] sm:$0xff]  }
 0x6db   :  { %v5495_v20 = vpop.f32.mrb[155].mxu1  ;;  %v6304_v30 = vld [vmem:[%s8295_s10 + $0x18] sm:$0xff]  }
 0x6dc   :  { %v4234_v27 = vpack.c.bf16 %v4228_v49, %v4227_v63  ;;  %v4206_v47 = vmax.f32 %v5453_v8, %v5493_v22  ;;  %v5496_v36 = vadd.f32 %v5495_v20, %v5494_v15  ;;  %v6305_v63 = vld [vmem:[%s8295_s10 + $0x60] sm:$0xff]   ;;  %v6307_v22 = vld [vmem:[%s8295_s10 + $0x68] sm:$0xff]   ;;  %v6310_v20 = vld [vmem:[%s8295_s10 + $0x30] sm:$0xff]  }
 0x6dd   :  { %v6306_v49 = vld [vmem:[%s8295_s10 + $0x20] sm:$0xff]   ;;  %v6308_v15 = vld [vmem:[%s8295_s10 + $0x28] sm:$0xff]  }
 0x6de   :  { %5352 = vmatmul.mubr.msk.bf16.vlgmr.msra.gmra.mrb[160].mxu1 %vm4308_vm7, %v4234_v27  ;;  %v4221_v56 = vadd.f32 %v5331_v14, %v4206_v47  ;;  %v4207_v11 = vmax.f32 %v5456_v39, %v5496_v36  ;;  %v6266_v39 = vld [vmem:[%s8294_s8 + $0x44] ss:$8 sps:$4 sm:$0xff]   ;;  %v6311_v27 = vld [vmem:[%s8295_s10 + $0x78] sm:$0xff]   ;;  %v4675_v47 = vlaneseq }
 0x6df   :  { %4409 = vmatpush1.bf16.msra.mxu1 %v6252_v52  ;;  %4440 = vmatprep.mubr.bf16.mxu1 %v8352_v33  ;;  %v6309_v52 = vld [vmem:[%s8295_s10 + $0x70] sm:$0xff]  }
 0x6e0   :  { %4410 = vmatprep.subr.bf16.mxu1 %v6257_v51  ;;  %v4222_v2 = vadd.f32 %v5331_v14, %v4207_v11  ;;  %v5497_v24 = vpop.f32.mrb[156].mxu1  ;;  %v4229_v44 = vmax.f32 %v4221_v56, 0.0  ;;  %v6312_v51 = vld [vmem:[%s8295_s10 + $0x38] sm:$0xff]   ;;  %v4676_v36 = vshrl.u32 %v4675_v47, 7  ;;  %v4673_v11 = vld [vmem:[%s8297_s9] sm:$0x3] }
 0x6e1   :  { %v5498_v31 = vpop.f32.mrb[157].mxu1 }
 0x6e2   :  { %v4230_v48 = vmax.f32 %v4222_v2, 0.0  ;;  %v5499_v57 = vadd.f32 %v5498_v31, %v5497_v24  ;;  %v5500_v17 = vpop.f32.mrb[158].mxu1  ;;  %v8262_v56 = vsub.s32 0, %v4676_v36 }
 0x6e3   :  { %4411 = vmatpush1.bf16.msra.mxu1 %v6255_v1  ;;  %v5501_v50 = vpop.f32.mrb[159].mxu1  ;;  %v4681_v1 = vsub.s32 1, %v4676_v36 }
 0x6e4   :  { %4412 = vmatprep.subr.bf16.mxu1 %v6260_v13  ;;  %v4235_v25 = vpack.c.bf16 %v4230_v48, %v4229_v44  ;;  %v4208_v32 = vmax.f32 %v8111_v53, %v5499_v57  ;;  %v5502_v58 = vadd.f32 %v5501_v50, %v5500_v17  ;;  %v6264_v53 = vld [vmem:[%s8294_s8 + $0x40] ss:$8 sps:$4 sm:$0xff]   ;;  %v4678_v13 = vrot.slane %v4673_v11, %v8262_v56 }
 0x6e5   :  { %v4682_v2 = vrot.slane %v4673_v11, %v4681_v1 }
 0x6e6   :  { %v4223_v8 = vadd.f32 %v5331_v14, %v4208_v32  ;;  %v4209_v23 = vmax.f32 %v8113_v19, %v5502_v58 }
 0x6e7   :  { %4413 = vmatpush1.bf16.msra.mxu1 %v6258_v5 }
 0x6e8   :  { %4414 = vmatprep.subr.bf16.mxu1 %v6263_v40  ;;  %v4224_v38 = vadd.f32 %v5331_v14, %v4209_v23  ;;  %v4231_v45 = vmax.f32 %v4223_v8, 0.0  ;;  %v6273_v14 = vld [vmem:[%s8294_s8 + $0xc0] ss:$8 sps:$4 sm:$0xff]  }
 0x6ea   :  { %v4232_v55 = vmax.f32 %v4224_v38, 0.0 }
 0x6eb   :  { %4415 = vmatpush1.bf16.msra.mxu1 %v6261_v0 }
 0x6ec   :  { %4416 = vmatprep.subr.bf16.mxu1 %v6266_v39  ;;  %v4236_v19 = vpack.c.bf16 %v4232_v55, %v4231_v45  ;;  %v5406_v39 = vld [vmem:[%s8298_s11] ss:$0 sm:$0xff] }
 0x6ef   :  { %4417 = vmatpush1.bf16.msra.mxu1 %v6264_v53 }
 0x6f0   :  { %4515 = vmatprep.subr.bf16.mxu1 %v6269_v59 }
 0x6f2   :  { %5363 = vmatmul.mubr.msk.bf16.vlgmr.msra.gmra.mrb[160].mxu1 %vm4308_vm7, %v4233_v60  ;;  %v6297_v60 = vld [vmem:[%s8295_s10 + $0x40] sm:$0xff]  }
 0x6f3   :  { %4516 = vmatpush1.bf16.msra.mxu1 %v6267_v6  ;;  %4547 = vmatprep.mubr.bf16.mxu1 %v8352_v33 }
 0x6f4   :  { %4517 = vmatprep.subr.bf16.mxu1 %v6272_v4  ;;  %v4891_v4 = vld [vmem:[%s8299_s1] sm:$0xff] }
 0x6f7   :  { %4518 = vmatpush1.bf16.msra.mxu1 %v6270_v29 }
 0x6f8   :  { %4519 = vmatprep.subr.bf16.mxu1 %v6275_v46 }
 0x6fb   :  { %4520 = vmatpush1.bf16.msra.mxu1 %v6273_v14 }
 0x6fc   :  { %4521 = vmatprep.subr.bf16.mxu1 %v6278_v43 }
 0x6ff   :  { %4522 = vmatpush1.bf16.msra.mxu1 %v6276_v35 }
 0x700   :  { %4523 = vmatprep.subr.bf16.mxu1 %v6281_v61 }
 0x703   :  { %4524 = vmatpush1.bf16.msra.mxu1 %v6279_v62 }
 0x704   :  { %4626 = vmatprep.subr.bf16.mxu1 %v6284_v3 }
 0x706   :  { %5384 = vmatmul.mubr.msk.bf16.vlgmr.msra.gmra.mrb[160].mxu1 %vm4308_vm7, %v4235_v25 }
 0x707   :  { %4627 = vmatpush1.bf16.msra.mxu1 %v6282_v9  ;;  %4658 = vmatprep.mubr.bf16.mxu1 %v8352_v33  ;;  %v6291_v33 = vld [vmem:[%s8294_s8 + $0x120] ss:$8 sps:$4 sm:$0xff]  }
 0x708   :  { %4628 = vmatprep.subr.bf16.mxu1 %v6287_v54  ;;  %v4892_v54 = vld [vmem:[%s8299_s1 + $0x8] sm:$0xff] }
 0x70b   :  { %4629 = vmatpush1.bf16.msra.mxu1 %v6285_v12 }
 0x70c   :  { %4630 = vmatprep.subr.bf16.mxu1 %v6290_v26 }
 0x70f   :  { %4631 = vmatpush1.bf16.msra.mxu1 %v6288_v18 }
 0x710   :  { %4632 = vmatprep.subr.bf16.mxu1 %v6293_v42  ;;  %v4901_v42 = vld [vmem:[%s8300_s12] sm:$0x1] }
 0x713   :  { %4633 = vmatpush1.bf16.msra.mxu1 %v6291_v33  ;;  %v4902_v33 = vsub.f32 1.0, %v4901_v42 }
 0x714   :  { %4634 = vmatprep.subr.bf16.mxu1 %v6296_v41 }
 0x717   :  { %4635 = vmatpush1.bf16.msra.mxu1 %v6294_v28 }
 0x718   :  { %5503 = vmatprep.subr.bf16.mxu1 %v6297_v60 }
 0x71a   :  { %5405 = vmatmul.mubr.msk.bf16.vlgmr.msra.gmra.mrb[160].mxu1 %vm4308_vm7, %v4236_v19 }
 0x71b   :  { %5504 = vmatpush3.bf16.msra.mxu1 %v6298_v10  ;;  %v4907_v10 = vrot.slane %v4902_v33, %v8262_v56 }
 0x71c   :  { %5505 = vmatprep.subr.bf16.mxu1 %v6299_v34  ;;  %v4915_v34 = vrot.slane %v4901_v42, %v8262_v56 }
 0x71f   :  { %5506 = vmatpush3.bf16.msra.mxu1 %v6300_v16 }
 0x720   :  { %5507 = vmatprep.subr.bf16.mxu1 %v6301_v21 }
 0x723   :  { %5508 = vmatpush3.bf16.msra.mxu1 %v6302_v37 }
 0x724   :  { %5509 = vmatprep.subr.bf16.mxu1 %v6303_v7 }
 0x727   :  { %5510 = vmatpush3.bf16.msra.mxu1 %v6304_v30 }
 0x728   :  { %5511 = vmatprep.subr.bf16.mxu1 %v6305_v63 }
 0x72b   :  { %5512 = vmatpush3.bf16.msra.mxu1 %v6306_v49 }
 0x72c   :  { %5513 = vmatprep.subr.bf16.mxu1 %v6307_v22 }
 0x72f   :  { %5514 = vmatpush3.bf16.msra.mxu1 %v6308_v15 }
 0x730   :  { %5515 = vmatprep.subr.bf16.mxu1 %v6309_v52 }
 0x733   :  { %5516 = vmatpush3.bf16.msra.mxu1 %v6310_v20 }
 0x734   :  { %5517 = vmatprep.subr.bf16.mxu1 %v6311_v27 }
 0x737   :  { %5518 = vmatpush3.bf16.msra.mxu1 %v6312_v51 }
 0x7ed   :  { %v4660_v24 = vpop.f32.mrb[160].mxu1 }
 0x7ee   :  { %v4685_v31 = vadd.f32 %v4678_v13, %v4660_v24  ;;  %v4662_v44 = vpop.f32.mrb[161].mxu1 }
 0x7ef   :  { %v4686_v48 = vadd.f32 %v4682_v2, %v4662_v44  ;;  %v4664_v57 = vpop.f32.mrb[162].mxu1 }
 0x7f0   :  { %v4687_v17 = vadd.f32 %v4678_v13, %v4664_v57  ;;  %v4666_v5 = vpop.f32.mrb[163].mxu1  ;;  %v4689_v40 = vmax.f32 %v4685_v31, 0.0 }
 0x7f1   :  { %v4688_v50 = vadd.f32 %v4682_v2, %v4666_v5  ;;  %v4690_v32 = vmax.f32 %v4686_v48, 0.0 }
 0x7f2   :  { %v4691_v25 = vmax.f32 %v4687_v17, 0.0 }
 0x7f3   :  { %v4692_v58 = vmax.f32 %v4688_v50, 0.0 }
 0x7f4   :  { %v4693_v8 = vpack.c.bf16 %v4691_v25, %v4689_v40 }
 0x7f5   :  { %v4694_v23 = vpack.c.bf16 %v4692_v58, %v4690_v32 }
 0x7f7   :  { %4862 = vmatprep.mubr.bf16.mxu1 %v4694_v23 }
 0x7f8   :  { %4863 = vmatmul.mubr.bf16.vlgmr.msra.gmra.mrb[164].mxu1 %v4693_v8 }
 0x8cb   :  { %v5519_v0 = vpop.f32.mrb[164].mxu1 }
 0x8cc   :  { %v5520_v38 = vpop.f32.mrb[165].mxu1 }
 0x8cd   :  { %v5521_v45 = vadd.f32 %v5520_v38, %v5519_v0  ;;  %v5522_v55 = vpop.f32.mrb[166].mxu1 }
 0x8ce   :  { %v5523_v53 = vpop.f32.mrb[167].mxu1 }
 0x8cf   :  { %v4865_v59 = vadd.f32 %v5521_v45, %v5406_v39  ;;  %v5524_v19 = vadd.f32 %v5523_v53, %v5522_v55 }
 0x8d1   :  { %4871 = vmax.xlane.f32.xlu0 %v4865_v59  ;;  %v4868_v6 = vadd.f32 %v5524_v19, %v5406_v39  ;;  %v4893_v29 = vmul.f32 %v4891_v4, %v4865_v59  ;;  %v4909_v63 = vmul.f32 %v4907_v10, %v4865_v59 }
 0x8d3   :  { %v4894_v12 = vmul.f32 %v4892_v54, %v4868_v6  ;;  %v4910_v20 = vmul.f32 %v4907_v10, %v4868_v6 }
 0x8d5   :  { %4873 = vmax.xlane.f32.xlu0 %v4868_v6 }
 0x8d9   :  { %4895 = vadd.xlane.f32.xlu0 %v4893_v29 }
 0x95e   :  { %v4872_v46 = vpop.xlane.xlu0 %4871 }
 0x95f   :  { %v4875_v14 = vsub.f32 %v4865_v59, %v4872_v46 }
 0x961   :  { %v4877_v43 = vmul.f32 1.442695, %v4875_v14 }
 0x962   :  { %v4874_v35 = vpop.xlane.xlu0 %4873 }
 0x963   :  { %v4876_v61 = vsub.f32 %v4868_v6, %v4874_v35  ;;  %6313 = vpow2.f32 %v4877_v43 }
 0x965   :  { %v4879_v62 = vmul.f32 1.442695, %v4876_v61 }
 0x966   :  { %v4896_v21 = vpop.xlane.xlu0 %4895 }
 0x967   :  { %6315 = vpow2.f32 %v4879_v62 }
 0x96d   :  { %v6314_v3 = vpop.eup %6313 }
 0x96e   :  { %4881 = vadd.xlane.f32.xlu1 %v6314_v3 }
 0x971   :  { %v6316_v9 = vpop.eup %6315 }
 0x972   :  { %4883 = vadd.xlane.f32.xlu1 %v6316_v9 }
 0x976   :  { %4897 = vadd.xlane.f32.xlu1 %v4894_v12 }
 0x9fb   :  { %v4882_v26 = vpop.xlane.xlu1 %4881 }
 0x9fc   :  { %6317 = vlog2.f32 %v4882_v26 }
 0x9ff   :  { %v4884_v18 = vpop.xlane.xlu1 %4883 }
 0xa00   :  { %6319 = vlog2.f32 %v4884_v18 }
 0xa03   :  { %v4898_v22 = vpop.xlane.xlu1 %4897 }
 0xa06   :  { %v6318_v41 = vpop.eup %6317 }
 0xa07   :  { %v4886_v28 = vmul.f32 0.6931472, %v6318_v41 }
 0xa09   :  { %v4889_v60 = vadd.f32 %v4886_v28, %v4872_v46 }
 0xa0a   :  { %v6320_v16 = vpop.eup %6319 }
 0xa0b   :  { %v4899_v37 = vsub.f32 %v4889_v60, %v4896_v21  ;;  %v4888_v7 = vmul.f32 0.6931472, %v6320_v16 }
 0xa0d   :  { %v4890_v30 = vadd.f32 %v4888_v7, %v4874_v35  ;;  %v4917_v49 = vmul.f32 %v4915_v34, %v4899_v37 }
 0xa0f   :  { %v4900_v15 = vsub.f32 %v4890_v30, %v4898_v22  ;;  %v4919_v52 = vadd.f32 %v4917_v49, %v4909_v63 }
 0xa11   :  { %v4918_v27 = vmul.f32 %v4915_v34, %v4900_v15  ;;  %4921 = vst [vmem:[%s8301_s13] sm:$0xff] %v4919_v52 }
 0xa13   :  { %v4920_v51 = vadd.f32 %v4918_v27, %v4910_v20 }
 0xa15   :  { %4922 = vst [vmem:[%s8301_s13 + $0x8] sm:$0xff] %v4920_v51 }

</bundles_post_ra>
